<compile_context>
chip_gen: v7x
topology: tpu7x:2x2x1
jax: 0.10.0
libtpu: 0.0.40
codegen_flags: <defaults>
</compile_context>

<pallas_src>
import functools
import math

import jax
import jax.numpy as jnp
from jax import lax
from jax.experimental import pallas as pl
from jax.experimental.pallas import tpu as pltpu

F32 = jnp.float32
BF16 = jnp.bfloat16
LN_EPS = 1e-5


# ----------------------------- Pallas kernels ------------------------------

def _layernorm(h, g, b):
    mu = jnp.mean(h, axis=-1, keepdims=True)
    var = jnp.mean((h - mu) ** 2, axis=-1, keepdims=True)
    return (h - mu) * lax.rsqrt(var + LN_EPS) * g + b


def self_attn_ln_block(x, lengths, wqkv, bqkv, wo, bo, g, beta, *, num_heads, causal):
    """Fused self-attention sublayer: LayerNorm(x + OutProj(MHA(QKV(x))))."""
    B, S, D = x.shape
    Dh = D // num_heads
    inv_scale = 1.0 / math.sqrt(Dh)

    def kernel(len_ref, x_ref, wqkv_ref, bqkv_ref, wo_ref, bo_ref, g_ref, b_ref, o_ref):
        b = pl.program_id(0)
        kv_len = len_ref[b]
        xb = x_ref[0, :, :]                                           # (S, D) f32
        # Fused QKV projection (one MXU call), bf16 in / f32 accumulate.
        qkv = jnp.dot(xb.astype(BF16), wqkv_ref[...],
                      preferred_element_type=jnp.float32) + bqkv_ref[...]   # (S, 3D)
        # Mask built in-kernel from the sequence length (and causality).
        row = lax.broadcasted_iota(jnp.int32, (S, S), 0)
        col = lax.broadcasted_iota(jnp.int32, (S, S), 1)
        valid = col < kv_len
        if causal:
            valid = jnp.logical_and(valid, col <= row)
        proj = jnp.zeros((S, D), jnp.float32)
        for h in range(num_heads):                                     # static unroll
            qh = qkv[:, h * Dh:(h + 1) * Dh]
            kh = qkv[:, D + h * Dh:D + (h + 1) * Dh]
            vh = qkv[:, 2 * D + h * Dh:2 * D + (h + 1) * Dh]
            s = lax.dot_general(qh.astype(BF16), kh.astype(BF16),
                                (((1,), (1,)), ((), ())),
                                preferred_element_type=jnp.float32) * inv_scale
            s = jnp.where(valid, s, -1e9)
            s = s - jnp.max(s, axis=-1, keepdims=True)
            p = jnp.exp(s)
            p = p * pl.reciprocal(jnp.sum(p, axis=-1, keepdims=True), approx=True)
            oh = jnp.dot(p.astype(BF16), vh.astype(BF16),
                         preferred_element_type=jnp.float32)           # (S, Dh)
            # concat_h(oh) @ Wo  ==  sum_h oh @ Wo[h*Dh:(h+1)*Dh, :]
            proj = proj + jnp.dot(oh.astype(BF16),
                                  wo_ref[h * Dh:(h + 1) * Dh, :].astype(BF16),
                                  preferred_element_type=jnp.float32)
        hres = xb + proj + bo_ref[...]
        o_ref[0, :, :] = _layernorm(hres, g_ref[...], b_ref[...])

    return pl.pallas_call(
        kernel,
        out_shape=jax.ShapeDtypeStruct((B, S, D), F32),
        grid_spec=pltpu.PrefetchScalarGridSpec(
            num_scalar_prefetch=1,
            grid=(B,),
            in_specs=[
                pl.BlockSpec((1, S, D), lambda b, lens: (b, 0, 0)),
                pl.BlockSpec((D, 3 * D), lambda b, lens: (0, 0)),
                pl.BlockSpec((1, 3 * D), lambda b, lens: (0, 0)),
                pl.BlockSpec((D, D), lambda b, lens: (0, 0)),
                pl.BlockSpec((1, D), lambda b, lens: (0, 0)),
                pl.BlockSpec((1, D), lambda b, lens: (0, 0)),
                pl.BlockSpec((1, D), lambda b, lens: (0, 0)),
            ],
            out_specs=pl.BlockSpec((1, S, D), lambda b, lens: (b, 0, 0)),
        ),
        compiler_params=pltpu.CompilerParams(dimension_semantics=("parallel",)),
    )(lengths, x, wqkv, bqkv, wo, bo, g, beta)


def cross_attn_ln_block(xq, xkv, lengths, wq, bq, wkv, bkv, wo, bo, g, beta, *, num_heads):
    """Fused cross-attention sublayer: LayerNorm(xq + OutProj(MHA(Q(xq), KV(xkv))))."""
    B, Sq, D = xq.shape
    Sk = xkv.shape[1]
    Dh = D // num_heads
    inv_scale = 1.0 / math.sqrt(Dh)

    def kernel(len_ref, xq_ref, xkv_ref, wq_ref, bq_ref, wkv_ref, bkv_ref,
               wo_ref, bo_ref, g_ref, b_ref, o_ref):
        b = pl.program_id(0)
        kv_len = len_ref[b]
        xqb = xq_ref[0, :, :]                                          # (Sq, D)
        xkb = xkv_ref[0, :, :]                                         # (Sk, D)
        q = jnp.dot(xqb.astype(BF16), wq_ref[...],
                    preferred_element_type=jnp.float32) + bq_ref[...]       # (Sq, D)
        kv = jnp.dot(xkb.astype(BF16), wkv_ref[...],
                     preferred_element_type=jnp.float32) + bkv_ref[...]     # (Sk, 2D)
        col = lax.broadcasted_iota(jnp.int32, (Sq, Sk), 1)
        valid = col < kv_len
        proj = jnp.zeros((Sq, D), jnp.float32)
        for h in range(num_heads):
            qh = q[:, h * Dh:(h + 1) * Dh]
            kh = kv[:, h * Dh:(h + 1) * Dh]
            vh = kv[:, D + h * Dh:D + (h + 1) * Dh]
            s = lax.dot_general(qh.astype(BF16), kh.astype(BF16),
                                (((1,), (1,)), ((), ())),
                                preferred_element_type=jnp.float32) * inv_scale
            s = jnp.where(valid, s, -1e9)
            s = s - jnp.max(s, axis=-1, keepdims=True)
            p = jnp.exp(s)
            p = p * pl.reciprocal(jnp.sum(p, axis=-1, keepdims=True), approx=True)
            oh = jnp.dot(p.astype(BF16), vh.astype(BF16),
                         preferred_element_type=jnp.float32)
            proj = proj + jnp.dot(oh.astype(BF16),
                                  wo_ref[h * Dh:(h + 1) * Dh, :].astype(BF16),
                                  preferred_element_type=jnp.float32)
        hres = xqb + proj + bo_ref[...]
        o_ref[0, :, :] = _layernorm(hres, g_ref[...], b_ref[...])

    return pl.pallas_call(
        kernel,
        out_shape=jax.ShapeDtypeStruct((B, Sq, D), F32),
        grid_spec=pltpu.PrefetchScalarGridSpec(
            num_scalar_prefetch=1,
            grid=(B,),
            in_specs=[
                pl.BlockSpec((1, Sq, D), lambda b, lens: (b, 0, 0)),
                pl.BlockSpec((1, Sk, D), lambda b, lens: (b, 0, 0)),
                pl.BlockSpec((D, D), lambda b, lens: (0, 0)),
                pl.BlockSpec((1, D), lambda b, lens: (0, 0)),
                pl.BlockSpec((D, 2 * D), lambda b, lens: (0, 0)),
                pl.BlockSpec((1, 2 * D), lambda b, lens: (0, 0)),
                pl.BlockSpec((D, D), lambda b, lens: (0, 0)),
                pl.BlockSpec((1, D), lambda b, lens: (0, 0)),
                pl.BlockSpec((1, D), lambda b, lens: (0, 0)),
                pl.BlockSpec((1, D), lambda b, lens: (0, 0)),
            ],
            out_specs=pl.BlockSpec((1, Sq, D), lambda b, lens: (b, 0, 0)),
        ),
        compiler_params=pltpu.CompilerParams(dimension_semantics=("parallel",)),
    )(lengths, xq, xkv, wq, bq, wkv, bkv, wo, bo, g, beta)


def ffn_ln_block(x2d, w1, b1, w2, b2, g, beta):
    """Fused feed-forward sublayer: LayerNorm(x + FF2(ReLU(FF1(x))))."""
    N, D = x2d.shape

    def kernel(x_ref, w1_ref, b1_ref, w2_ref, b2_ref, g_ref, b_ref, o_ref):
        x = x_ref[...]
        h = jnp.dot(x.astype(BF16), w1_ref[...],
                    preferred_element_type=jnp.float32) + b1_ref[...]
        h = jnp.maximum(h, 0.0)
        y = jnp.dot(h.astype(BF16), w2_ref[...],
                    preferred_element_type=jnp.float32) + b2_ref[...]
        o_ref[...] = _layernorm(x + y, g_ref[...], b_ref[...])

    return pl.pallas_call(
        kernel, out_shape=jax.ShapeDtypeStruct((N, D), F32)
    )(x2d, w1, b1, w2, b2, g, beta)


def tied_proj_ce_pallas(x2d, emb, targets, *, label_smoothing, ignore_id, batch_size):
    """Fused tied output projection (x @ emb.T) + label-smoothed CE + accuracy.
    Emits two (1,1) scalars (loss, acc); all reductions done in-kernel (f32 path)."""
    N, D = x2d.shape
    V = emb.shape[0]
    eps = float(label_smoothing)
    tgt = targets.reshape(N, 1).astype(jnp.int32)

    def kernel(x_ref, emb_ref, t_ref, loss_ref, acc_ref):
        # logits in f32 to keep the loss path exact (emb consumed in stored layout).
        logits = lax.dot_general(x_ref[...], emb_ref[...],
                                 (((1,), (1,)), ((), ())),
                                 preferred_element_type=jnp.float32)   # (N, V)
        t = t_ref[...]
        iota = lax.broadcasted_iota(jnp.int32, (N, V), 1)
        onehot = iota == t
        m = jnp.max(logits, axis=-1, keepdims=True)
        z = logits - m
        lse = jnp.log(jnp.sum(jnp.exp(z), axis=-1, keepdims=True))
        logp = z - lse
        nll = -jnp.sum(jnp.where(onehot, logp, 0.0), axis=-1, keepdims=True)
        smooth = -jnp.mean(logp, axis=-1, keepdims=True)
        valid = (t != ignore_id).astype(jnp.float32)
        loss_row = valid * ((1.0 - eps) * nll + eps * smooth)
        # deterministic first-argmax (matches torch.argmax tie-break convention)
        pred = jnp.min(jnp.where(logits == m, iota, V), axis=-1, keepdims=True)
        corr_row = valid * (pred == t).astype(jnp.float32)
        loss_ref[...] = jnp.sum(loss_row, axis=0, keepdims=True) / batch_size
        acc_ref[...] = (jnp.sum(corr_row, axis=0, keepdims=True)
                        / jnp.maximum(jnp.sum(valid, axis=0, keepdims=True), 1.0))

    loss, acc = pl.pallas_call(
        kernel,
        out_shape=(jax.ShapeDtypeStruct((1, 1), F32),
                   jax.ShapeDtypeStruct((1, 1), F32)),
    )(x2d.astype(F32), emb.astype(F32), tgt)
    return loss[0, 0], acc[0, 0]


# ------------------------------- model glue --------------------------------

def positional_encoding(S, D):
    pos = jnp.arange(S, dtype=F32)[:, None]
    div = jnp.exp(jnp.arange(0, D, 2, dtype=F32) * (-math.log(10000.0) / D))
    ang = pos * div[None, :]
    pe = jnp.zeros((S, D), F32)
    pe = pe.at[:, 0::2].set(jnp.sin(ang))
    pe = pe.at[:, 1::2].set(jnp.cos(ang))
    return pe


def init_params(key, vocab, d_model, d_ff, num_layers, pad_id):
    keys = iter(jax.random.split(key, 1 + num_layers * 32))

    def norm(shape, dtype=F32, scale=0.02):
        return (scale * jax.random.normal(next(keys), shape, F32)).astype(dtype)

    emb = norm((vocab, d_model))
    emb = emb.at[pad_id].set(0.0)   # padding_idx row is zero, like nn.Embedding

    def ln_pair():
        return jnp.ones((1, d_model), F32), jnp.zeros((1, d_model), F32)

    def enc_layer():
        g1, b1 = ln_pair()
        g2, b2 = ln_pair()
        return {
            # weights pre-transposed to (Din, Dout); big matmul weights in bf16,
            # wo kept f32 (sliced per-head on the sublane axis inside the kernel)
            "wqkv": norm((d_model, 3 * d_model), BF16),
            "bqkv": jnp.zeros((1, 3 * d_model), F32),
            "wo": norm((d_model, d_model), F32),
            "bo": jnp.zeros((1, d_model), F32),
            "ln1_g": g1, "ln1_b": b1,
            "w1": norm((d_model, d_ff), BF16), "b1": jnp.zeros((1, d_ff), F32),
            "w2": norm((d_ff, d_model), BF16), "b2": jnp.zeros((1, d_model), F32),
            "ln2_g": g2, "ln2_b": b2,
        }

    def dec_layer():
        g1, b1 = ln_pair()
        g2, b2 = ln_pair()
        g3, b3 = ln_pair()
        return {
            "s_wqkv": norm((d_model, 3 * d_model), BF16),
            "s_bqkv": jnp.zeros((1, 3 * d_model), F32),
            "s_wo": norm((d_model, d_model), F32),
            "s_bo": jnp.zeros((1, d_model), F32),
            "ln1_g": g1, "ln1_b": b1,
            "c_wq": norm((d_model, d_model), BF16),
            "c_bq": jnp.zeros((1, d_model), F32),
            "c_wkv": norm((d_model, 2 * d_model), BF16),
            "c_bkv": jnp.zeros((1, 2 * d_model), F32),
            "c_wo": norm((d_model, d_model), F32),
            "c_bo": jnp.zeros((1, d_model), F32),
            "ln2_g": g2, "ln2_b": b2,
            "w1": norm((d_model, d_ff), BF16), "b1": jnp.zeros((1, d_ff), F32),
            "w2": norm((d_ff, d_model), BF16), "b2": jnp.zeros((1, d_model), F32),
            "ln3_g": g3, "ln3_b": b3,
        }

    return {"emb": emb,
            "enc": [enc_layer() for _ in range(num_layers)],
            "dec": [dec_layer() for _ in range(num_layers)]}


def model_forward(params, enc_token, enc_len, dec_token, dec_len, tgt_token,
                  *, num_heads, label_smoothing, ignore_id):
    emb = params["emb"]
    V, D = emb.shape
    B, S1 = enc_token.shape
    S2 = dec_token.shape[1]
    scale = math.sqrt(D)
    enc_len = enc_len.astype(jnp.int32)
    dec_len = dec_len.astype(jnp.int32)

    # encoder
    x_enc = emb[enc_token] * scale + positional_encoding(S1, D)[None]
    # dropout1: identity (eval)
    for lp in params["enc"]:
        x_enc = self_attn_ln_block(x_enc, enc_len, lp["wqkv"], lp["bqkv"],
                                   lp["wo"], lp["bo"], lp["ln1_g"], lp["ln1_b"],
                                   num_heads=num_heads, causal=False)
        x_enc = ffn_ln_block(x_enc.reshape(B * S1, D),
                             lp["w1"], lp["b1"], lp["w2"], lp["b2"],
                             lp["ln2_g"], lp["ln2_b"]).reshape(B, S1, D)

    # decoder
    x_dec = emb[dec_token] * scale + positional_encoding(S2, D)[None]
    # dropout2: identity (eval)
    for lp in params["dec"]:
        x_dec = self_attn_ln_block(x_dec, dec_len, lp["s_wqkv"], lp["s_bqkv"],
                                   lp["s_wo"], lp["s_bo"], lp["ln1_g"], lp["ln1_b"],
                                   num_heads=num_heads, causal=True)
        x_dec = cross_attn_ln_block(x_dec, x_enc, enc_len,
                                    lp["c_wq"], lp["c_bq"], lp["c_wkv"], lp["c_bkv"],
                                    lp["c_wo"], lp["c_bo"], lp["ln2_g"], lp["ln2_b"],
                                    num_heads=num_heads)
        x_dec = ffn_ln_block(x_dec.reshape(B * S2, D),
                             lp["w1"], lp["b1"], lp["w2"], lp["b2"],
                             lp["ln3_g"], lp["ln3_b"]).reshape(B, S2, D)

    # tied output projection + label-smoothed CE (sum/B) + accuracy, fused
    loss, acc = tied_proj_ce_pallas(
        x_dec.reshape(B * S2, D), emb, tgt_token.reshape(-1),
        label_smoothing=label_smoothing, ignore_id=ignore_id, batch_size=B)
    return loss, acc


# ----------------------------------- main -----------------------------------

if __name__ == "__main__":
    vocab_size, d_model, num_heads, d_ff, num_layers = 64, 32, 4, 64, 2
    pad_id, bos_id, eos_id, ignore_id = 0, 1, 2, -100
    label_smoothing = 0.1
    B, S1, S2 = 2, 8, 8

    key = jax.random.PRNGKey(0)
    kp, k1, k2, k3 = jax.random.split(key, 4)
    params = init_params(kp, vocab_size, d_model, d_ff, num_layers, pad_id)

    enc_len = jnp.array([8, 5], jnp.int32)
    dec_len = jnp.array([8, 6], jnp.int32)
    enc_token = jax.random.randint(k1, (B, S1), 3, vocab_size, jnp.int32)
    dec_token = jax.random.randint(k2, (B, S2), 3, vocab_size, jnp.int32)
    tgt_token = jax.random.randint(k3, (B, S2), 3, vocab_size, jnp.int32)
    enc_token = jnp.where(jnp.arange(S1)[None, :] < enc_len[:, None], enc_token, pad_id)
    dec_token = jnp.where(jnp.arange(S2)[None, :] < dec_len[:, None], dec_token, pad_id)
    tgt_token = jnp.where(jnp.arange(S2)[None, :] < dec_len[:, None], tgt_token, ignore_id)

    forward = jax.jit(functools.partial(
        model_forward, num_heads=num_heads,
        label_smoothing=label_smoothing, ignore_id=ignore_id))
    loss, acc = forward(params, enc_token, enc_len, dec_token, dec_len, tgt_token)
    jax.block_until_ready((loss, acc))
    print("KERNEL_OK")
</pallas_src>

<mosaic_0001>
module attributes {stable_mosaic.version = 11 : i64} {
  func.func @kernel(%arg0: i32, %arg1: memref<2xi32, #tpu.memory_space<smem>>, %arg2: memref<1x8x32xf32, #tpu.memory_space<vmem>>, %arg3: memref<32x96xbf16, #tpu.memory_space<vmem>>, %arg4: memref<1x96xf32, #tpu.memory_space<vmem>>, %arg5: memref<32x32xf32, #tpu.memory_space<vmem>>, %arg6: memref<1x32xf32, #tpu.memory_space<vmem>>, %arg7: memref<1x32xf32, #tpu.memory_space<vmem>>, %arg8: memref<1x32xf32, #tpu.memory_space<vmem>>, %arg9: memref<1x8x32xf32, #tpu.memory_space<vmem>>) attributes {dimension_semantics = [#tpu.dimension_semantics<parallel>], iteration_bounds = array<i64: 2>, scalar_prefetch = 1 : i64, scratch_operands = 0 : i64, tpu.core_type = #tpu.core_type<tc>, window_params = [{transform_indices = @transform_0, window_bounds = array<i64: 1, 8, 32>}, {pipeline_mode = #tpu.pipeline_mode<synchronous>, transform_indices = @transform_1, window_bounds = array<i64: 32, 96>}, {pipeline_mode = #tpu.pipeline_mode<synchronous>, transform_indices = @transform_2, window_bounds = array<i64: 1, 96>}, {pipeline_mode = #tpu.pipeline_mode<synchronous>, transform_indices = @transform_3, window_bounds = array<i64: 32, 32>}, {pipeline_mode = #tpu.pipeline_mode<synchronous>, transform_indices = @transform_4, window_bounds = array<i64: 1, 32>}, {pipeline_mode = #tpu.pipeline_mode<synchronous>, transform_indices = @transform_5, window_bounds = array<i64: 1, 32>}, {pipeline_mode = #tpu.pipeline_mode<synchronous>, transform_indices = @transform_6, window_bounds = array<i64: 1, 32>}, {transform_indices = @transform_7, window_bounds = array<i64: 1, 8, 32>}]} {
    %0 = arith.index_cast %arg0 : i32 to index
    %1 = memref.load %arg1[%0] : memref<2xi32, #tpu.memory_space<smem>>
    %c0 = arith.constant 0 : index
    %c0_0 = arith.constant 0 : index
    %c0_1 = arith.constant 0 : index
    %2 = vector.load %arg2[%c0, %c0_0, %c0_1] : memref<1x8x32xf32, #tpu.memory_space<vmem>>, vector<1x8x32xf32>
    %3 = vector.shape_cast %2 : vector<1x8x32xf32> to vector<8x32xf32>
    %4 = arith.truncf %3 : vector<8x32xf32> to vector<8x32xbf16>
    %c0_2 = arith.constant 0 : index
    %c0_3 = arith.constant 0 : index
    %5 = vector.load %arg3[%c0_2, %c0_3] : memref<32x96xbf16, #tpu.memory_space<vmem>>, vector<32x96xbf16>
    %cst = arith.constant dense<0.000000e+00> : vector<8x96xf32>
    %6 = tpu.matmul %4, %5, %cst {dimension_numbers = #tpu.dot_dimension_numbers<[1], [0], [0], [1], [0, 0, 1, 1], [], []>} : vector<8x32xbf16>, vector<32x96xbf16>, vector<8x96xf32> -> vector<8x96xf32>
    %c0_4 = arith.constant 0 : index
    %c0_5 = arith.constant 0 : index
    %7 = vector.load %arg4[%c0_4, %c0_5] : memref<1x96xf32, #tpu.memory_space<vmem>>, vector<1x96xf32>
    %8 = vector.broadcast %7 : vector<1x96xf32> to vector<8x96xf32>
    %9 = arith.addf %6, %8 : vector<8x96xf32>
    %10 = tpu.iota {dimensions = array<i32: 1>} : vector<8x8xi32>
    %11 = vector.broadcast %1 : i32 to vector<8x8xi32>
    %12 = arith.cmpi slt, %10, %11 : vector<8x8xi32>
    %cst_6 = arith.constant 0.000000e+00 : f32
    %13 = vector.broadcast %cst_6 : f32 to vector<8x32xf32>
    %14 = vector.extract_strided_slice %9 {offsets = [0, 0], sizes = [8, 8], strides = [1, 1]} : vector<8x96xf32> to vector<8x8xf32>
    %15 = vector.extract_strided_slice %9 {offsets = [0, 32], sizes = [8, 8], strides = [1, 1]} : vector<8x96xf32> to vector<8x8xf32>
    %16 = vector.extract_strided_slice %9 {offsets = [0, 64], sizes = [8, 8], strides = [1, 1]} : vector<8x96xf32> to vector<8x8xf32>
    %17 = arith.truncf %14 : vector<8x8xf32> to vector<8x8xbf16>
    %18 = arith.truncf %15 : vector<8x8xf32> to vector<8x8xbf16>
    %cst_7 = arith.constant dense<0.000000e+00> : vector<8x8xf32>
    %19 = tpu.matmul %17, %18, %cst_7 {dimension_numbers = #tpu.dot_dimension_numbers<[1], [1], [0], [0], [0, 0, 1, 0], [], []>} : vector<8x8xbf16>, vector<8x8xbf16>, vector<8x8xf32> -> vector<8x8xf32>
    %cst_8 = arith.constant 0.353553385 : f32
    %20 = vector.broadcast %cst_8 : f32 to vector<8x8xf32>
    %21 = arith.mulf %19, %20 : vector<8x8xf32>
    %cst_9 = arith.constant -1.000000e+09 : f32
    %22 = vector.broadcast %cst_9 : f32 to vector<8x8xf32>
    %23 = arith.select %12, %21, %22 : vector<8x8xi1>, vector<8x8xf32>
    %cst_10 = arith.constant dense<0xFF800000> : vector<8xf32>
    %24 = vector.multi_reduction <maximumf>, %23, %cst_10 [1] : vector<8x8xf32> to vector<8xf32>
    %25 = vector.shape_cast %24 : vector<8xf32> to vector<8x1xf32>
    %26 = vector.broadcast %25 : vector<8x1xf32> to vector<8x8xf32>
    %27 = arith.subf %23, %26 : vector<8x8xf32>
    %28 = math.exp %27 : vector<8x8xf32>
    %cst_11 = arith.constant dense<0.000000e+00> : vector<8xf32>
    %29 = vector.multi_reduction <add>, %28, %cst_11 [1] : vector<8x8xf32> to vector<8xf32>
    %30 = vector.shape_cast %29 : vector<8xf32> to vector<8x1xf32>
    %31 = tpu.reciprocal %30 {approx = true} : vector<8x1xf32> -> vector<8x1xf32>
    %32 = vector.broadcast %31 : vector<8x1xf32> to vector<8x8xf32>
    %33 = arith.mulf %28, %32 : vector<8x8xf32>
    %34 = arith.truncf %33 : vector<8x8xf32> to vector<8x8xbf16>
    %35 = arith.truncf %16 : vector<8x8xf32> to vector<8x8xbf16>
    %cst_12 = arith.constant dense<0.000000e+00> : vector<8x8xf32>
    %36 = tpu.matmul %34, %35, %cst_12 {dimension_numbers = #tpu.dot_dimension_numbers<[1], [0], [0], [1], [0, 0, 1, 1], [], []>} : vector<8x8xbf16>, vector<8x8xbf16>, vector<8x8xf32> -> vector<8x8xf32>
    %37 = arith.truncf %36 : vector<8x8xf32> to vector<8x8xbf16>
    %c0_13 = arith.constant 0 : index
    %c0_14 = arith.constant 0 : index
    %38 = vector.load %arg5[%c0_13, %c0_14] : memref<32x32xf32, #tpu.memory_space<vmem>>, vector<8x32xf32>
    %39 = arith.truncf %38 : vector<8x32xf32> to vector<8x32xbf16>
    %cst_15 = arith.constant dense<0.000000e+00> : vector<8x32xf32>
    %40 = tpu.matmul %37, %39, %cst_15 {dimension_numbers = #tpu.dot_dimension_numbers<[1], [0], [0], [1], [0, 0, 1, 1], [], []>} : vector<8x8xbf16>, vector<8x32xbf16>, vector<8x32xf32> -> vector<8x32xf32>
    %41 = arith.addf %13, %40 : vector<8x32xf32>
    %42 = vector.extract_strided_slice %9 {offsets = [0, 8], sizes = [8, 8], strides = [1, 1]} : vector<8x96xf32> to vector<8x8xf32>
    %43 = vector.extract_strided_slice %9 {offsets = [0, 40], sizes = [8, 8], strides = [1, 1]} : vector<8x96xf32> to vector<8x8xf32>
    %44 = vector.extract_strided_slice %9 {offsets = [0, 72], sizes = [8, 8], strides = [1, 1]} : vector<8x96xf32> to vector<8x8xf32>
    %45 = arith.truncf %42 : vector<8x8xf32> to vector<8x8xbf16>
    %46 = arith.truncf %43 : vector<8x8xf32> to vector<8x8xbf16>
    %cst_16 = arith.constant dense<0.000000e+00> : vector<8x8xf32>
    %47 = tpu.matmul %45, %46, %cst_16 {dimension_numbers = #tpu.dot_dimension_numbers<[1], [1], [0], [0], [0, 0, 1, 0], [], []>} : vector<8x8xbf16>, vector<8x8xbf16>, vector<8x8xf32> -> vector<8x8xf32>
    %cst_17 = arith.constant 0.353553385 : f32
    %48 = vector.broadcast %cst_17 : f32 to vector<8x8xf32>
    %49 = arith.mulf %47, %48 : vector<8x8xf32>
    %cst_18 = arith.constant -1.000000e+09 : f32
    %50 = vector.broadcast %cst_18 : f32 to vector<8x8xf32>
    %51 = arith.select %12, %49, %50 : vector<8x8xi1>, vector<8x8xf32>
    %cst_19 = arith.constant dense<0xFF800000> : vector<8xf32>
    %52 = vector.multi_reduction <maximumf>, %51, %cst_19 [1] : vector<8x8xf32> to vector<8xf32>
    %53 = vector.shape_cast %52 : vector<8xf32> to vector<8x1xf32>
    %54 = vector.broadcast %53 : vector<8x1xf32> to vector<8x8xf32>
    %55 = arith.subf %51, %54 : vector<8x8xf32>
    %56 = math.exp %55 : vector<8x8xf32>
    %cst_20 = arith.constant dense<0.000000e+00> : vector<8xf32>
    %57 = vector.multi_reduction <add>, %56, %cst_20 [1] : vector<8x8xf32> to vector<8xf32>
    %58 = vector.shape_cast %57 : vector<8xf32> to vector<8x1xf32>
    %59 = tpu.reciprocal %58 {approx = true} : vector<8x1xf32> -> vector<8x1xf32>
    %60 = vector.broadcast %59 : vector<8x1xf32> to vector<8x8xf32>
    %61 = arith.mulf %56, %60 : vector<8x8xf32>
    %62 = arith.truncf %61 : vector<8x8xf32> to vector<8x8xbf16>
    %63 = arith.truncf %44 : vector<8x8xf32> to vector<8x8xbf16>
    %cst_21 = arith.constant dense<0.000000e+00> : vector<8x8xf32>
    %64 = tpu.matmul %62, %63, %cst_21 {dimension_numbers = #tpu.dot_dimension_numbers<[1], [0], [0], [1], [0, 0, 1, 1], [], []>} : vector<8x8xbf16>, vector<8x8xbf16>, vector<8x8xf32> -> vector<8x8xf32>
    %65 = arith.truncf %64 : vector<8x8xf32> to vector<8x8xbf16>
    %c8 = arith.constant 8 : index
    %c0_22 = arith.constant 0 : index
    %66 = vector.load %arg5[%c8, %c0_22] : memref<32x32xf32, #tpu.memory_space<vmem>>, vector<8x32xf32>
    %67 = arith.truncf %66 : vector<8x32xf32> to vector<8x32xbf16>
    %cst_23 = arith.constant dense<0.000000e+00> : vector<8x32xf32>
    %68 = tpu.matmul %65, %67, %cst_23 {dimension_numbers = #tpu.dot_dimension_numbers<[1], [0], [0], [1], [0, 0, 1, 1], [], []>} : vector<8x8xbf16>, vector<8x32xbf16>, vector<8x32xf32> -> vector<8x32xf32>
    %69 = arith.addf %41, %68 : vector<8x32xf32>
    %70 = vector.extract_strided_slice %9 {offsets = [0, 16], sizes = [8, 8], strides = [1, 1]} : vector<8x96xf32> to vector<8x8xf32>
    %71 = vector.extract_strided_slice %9 {offsets = [0, 48], sizes = [8, 8], strides = [1, 1]} : vector<8x96xf32> to vector<8x8xf32>
    %72 = vector.extract_strided_slice %9 {offsets = [0, 80], sizes = [8, 8], strides = [1, 1]} : vector<8x96xf32> to vector<8x8xf32>
    %73 = arith.truncf %70 : vector<8x8xf32> to vector<8x8xbf16>
    %74 = arith.truncf %71 : vector<8x8xf32> to vector<8x8xbf16>
    %cst_24 = arith.constant dense<0.000000e+00> : vector<8x8xf32>
    %75 = tpu.matmul %73, %74, %cst_24 {dimension_numbers = #tpu.dot_dimension_numbers<[1], [1], [0], [0], [0, 0, 1, 0], [], []>} : vector<8x8xbf16>, vector<8x8xbf16>, vector<8x8xf32> -> vector<8x8xf32>
    %cst_25 = arith.constant 0.353553385 : f32
    %76 = vector.broadcast %cst_25 : f32 to vector<8x8xf32>
    %77 = arith.mulf %75, %76 : vector<8x8xf32>
    %cst_26 = arith.constant -1.000000e+09 : f32
    %78 = vector.broadcast %cst_26 : f32 to vector<8x8xf32>
    %79 = arith.select %12, %77, %78 : vector<8x8xi1>, vector<8x8xf32>
    %cst_27 = arith.constant dense<0xFF800000> : vector<8xf32>
    %80 = vector.multi_reduction <maximumf>, %79, %cst_27 [1] : vector<8x8xf32> to vector<8xf32>
    %81 = vector.shape_cast %80 : vector<8xf32> to vector<8x1xf32>
    %82 = vector.broadcast %81 : vector<8x1xf32> to vector<8x8xf32>
    %83 = arith.subf %79, %82 : vector<8x8xf32>
    %84 = math.exp %83 : vector<8x8xf32>
    %cst_28 = arith.constant dense<0.000000e+00> : vector<8xf32>
    %85 = vector.multi_reduction <add>, %84, %cst_28 [1] : vector<8x8xf32> to vector<8xf32>
    %86 = vector.shape_cast %85 : vector<8xf32> to vector<8x1xf32>
    %87 = tpu.reciprocal %86 {approx = true} : vector<8x1xf32> -> vector<8x1xf32>
    %88 = vector.broadcast %87 : vector<8x1xf32> to vector<8x8xf32>
    %89 = arith.mulf %84, %88 : vector<8x8xf32>
    %90 = arith.truncf %89 : vector<8x8xf32> to vector<8x8xbf16>
    %91 = arith.truncf %72 : vector<8x8xf32> to vector<8x8xbf16>
    %cst_29 = arith.constant dense<0.000000e+00> : vector<8x8xf32>
    %92 = tpu.matmul %90, %91, %cst_29 {dimension_numbers = #tpu.dot_dimension_numbers<[1], [0], [0], [1], [0, 0, 1, 1], [], []>} : vector<8x8xbf16>, vector<8x8xbf16>, vector<8x8xf32> -> vector<8x8xf32>
    %93 = arith.truncf %92 : vector<8x8xf32> to vector<8x8xbf16>
    %c16 = arith.constant 16 : index
    %c0_30 = arith.constant 0 : index
    %94 = vector.load %arg5[%c16, %c0_30] : memref<32x32xf32, #tpu.memory_space<vmem>>, vector<8x32xf32>
    %95 = arith.truncf %94 : vector<8x32xf32> to vector<8x32xbf16>
    %cst_31 = arith.constant dense<0.000000e+00> : vector<8x32xf32>
    %96 = tpu.matmul %93, %95, %cst_31 {dimension_numbers = #tpu.dot_dimension_numbers<[1], [0], [0], [1], [0, 0, 1, 1], [], []>} : vector<8x8xbf16>, vector<8x32xbf16>, vector<8x32xf32> -> vector<8x32xf32>
    %97 = arith.addf %69, %96 : vector<8x32xf32>
    %98 = vector.extract_strided_slice %9 {offsets = [0, 24], sizes = [8, 8], strides = [1, 1]} : vector<8x96xf32> to vector<8x8xf32>
    %99 = vector.extract_strided_slice %9 {offsets = [0, 56], sizes = [8, 8], strides = [1, 1]} : vector<8x96xf32> to vector<8x8xf32>
    %100 = vector.extract_strided_slice %9 {offsets = [0, 88], sizes = [8, 8], strides = [1, 1]} : vector<8x96xf32> to vector<8x8xf32>
    %101 = arith.truncf %98 : vector<8x8xf32> to vector<8x8xbf16>
    %102 = arith.truncf %99 : vector<8x8xf32> to vector<8x8xbf16>
    %cst_32 = arith.constant dense<0.000000e+00> : vector<8x8xf32>
    %103 = tpu.matmul %101, %102, %cst_32 {dimension_numbers = #tpu.dot_dimension_numbers<[1], [1], [0], [0], [0, 0, 1, 0], [], []>} : vector<8x8xbf16>, vector<8x8xbf16>, vector<8x8xf32> -> vector<8x8xf32>
    %cst_33 = arith.constant 0.353553385 : f32
    %104 = vector.broadcast %cst_33 : f32 to vector<8x8xf32>
    %105 = arith.mulf %103, %104 : vector<8x8xf32>
    %cst_34 = arith.constant -1.000000e+09 : f32
    %106 = vector.broadcast %cst_34 : f32 to vector<8x8xf32>
    %107 = arith.select %12, %105, %106 : vector<8x8xi1>, vector<8x8xf32>
    %cst_35 = arith.constant dense<0xFF800000> : vector<8xf32>
    %108 = vector.multi_reduction <maximumf>, %107, %cst_35 [1] : vector<8x8xf32> to vector<8xf32>
    %109 = vector.shape_cast %108 : vector<8xf32> to vector<8x1xf32>
    %110 = vector.broadcast %109 : vector<8x1xf32> to vector<8x8xf32>
    %111 = arith.subf %107, %110 : vector<8x8xf32>
    %112 = math.exp %111 : vector<8x8xf32>
    %cst_36 = arith.constant dense<0.000000e+00> : vector<8xf32>
    %113 = vector.multi_reduction <add>, %112, %cst_36 [1] : vector<8x8xf32> to vector<8xf32>
    %114 = vector.shape_cast %113 : vector<8xf32> to vector<8x1xf32>
    %115 = tpu.reciprocal %114 {approx = true} : vector<8x1xf32> -> vector<8x1xf32>
    %116 = vector.broadcast %115 : vector<8x1xf32> to vector<8x8xf32>
    %117 = arith.mulf %112, %116 : vector<8x8xf32>
    %118 = arith.truncf %117 : vector<8x8xf32> to vector<8x8xbf16>
    %119 = arith.truncf %100 : vector<8x8xf32> to vector<8x8xbf16>
    %cst_37 = arith.constant dense<0.000000e+00> : vector<8x8xf32>
    %120 = tpu.matmul %118, %119, %cst_37 {dimension_numbers = #tpu.dot_dimension_numbers<[1], [0], [0], [1], [0, 0, 1, 1], [], []>} : vector<8x8xbf16>, vector<8x8xbf16>, vector<8x8xf32> -> vector<8x8xf32>
    %121 = arith.truncf %120 : vector<8x8xf32> to vector<8x8xbf16>
    %c24 = arith.constant 24 : index
    %c0_38 = arith.constant 0 : index
    %122 = vector.load %arg5[%c24, %c0_38] : memref<32x32xf32, #tpu.memory_space<vmem>>, vector<8x32xf32>
    %123 = arith.truncf %122 : vector<8x32xf32> to vector<8x32xbf16>
    %cst_39 = arith.constant dense<0.000000e+00> : vector<8x32xf32>
    %124 = tpu.matmul %121, %123, %cst_39 {dimension_numbers = #tpu.dot_dimension_numbers<[1], [0], [0], [1], [0, 0, 1, 1], [], []>} : vector<8x8xbf16>, vector<8x32xbf16>, vector<8x32xf32> -> vector<8x32xf32>
    %125 = arith.addf %97, %124 : vector<8x32xf32>
    %126 = arith.addf %3, %125 : vector<8x32xf32>
    %c0_40 = arith.constant 0 : index
    %c0_41 = arith.constant 0 : index
    %127 = vector.load %arg6[%c0_40, %c0_41] : memref<1x32xf32, #tpu.memory_space<vmem>>, vector<1x32xf32>
    %128 = vector.broadcast %127 : vector<1x32xf32> to vector<8x32xf32>
    %129 = arith.addf %126, %128 : vector<8x32xf32>
    %c0_42 = arith.constant 0 : index
    %c0_43 = arith.constant 0 : index
    %130 = vector.load %arg7[%c0_42, %c0_43] : memref<1x32xf32, #tpu.memory_space<vmem>>, vector<1x32xf32>
    %c0_44 = arith.constant 0 : index
    %c0_45 = arith.constant 0 : index
    %131 = vector.load %arg8[%c0_44, %c0_45] : memref<1x32xf32, #tpu.memory_space<vmem>>, vector<1x32xf32>
    %cst_46 = arith.constant dense<0.000000e+00> : vector<8xf32>
    %132 = vector.multi_reduction <add>, %129, %cst_46 [1] : vector<8x32xf32> to vector<8xf32>
    %133 = vector.shape_cast %132 : vector<8xf32> to vector<8x1xf32>
    %cst_47 = arith.constant 3.200000e+01 : f32
    %134 = vector.broadcast %cst_47 : f32 to vector<8x1xf32>
    %135 = arith.divf %133, %134 : vector<8x1xf32>
    %136 = vector.broadcast %135 : vector<8x1xf32> to vector<8x32xf32>
    %137 = arith.subf %129, %136 : vector<8x32xf32>
    %138 = arith.mulf %137, %137 : vector<8x32xf32>
    %cst_48 = arith.constant dense<0.000000e+00> : vector<8xf32>
    %139 = vector.multi_reduction <add>, %138, %cst_48 [1] : vector<8x32xf32> to vector<8xf32>
    %140 = vector.shape_cast %139 : vector<8xf32> to vector<8x1xf32>
    %cst_49 = arith.constant 3.200000e+01 : f32
    %141 = vector.broadcast %cst_49 : f32 to vector<8x1xf32>
    %142 = arith.divf %140, %141 : vector<8x1xf32>
    %143 = vector.broadcast %135 : vector<8x1xf32> to vector<8x32xf32>
    %144 = arith.subf %129, %143 : vector<8x32xf32>
    %cst_50 = arith.constant 9.99999974E-6 : f32
    %145 = vector.broadcast %cst_50 : f32 to vector<8x1xf32>
    %146 = arith.addf %142, %145 : vector<8x1xf32>
    %147 = math.rsqrt %146 : vector<8x1xf32>
    %148 = vector.broadcast %147 : vector<8x1xf32> to vector<8x32xf32>
    %149 = arith.mulf %144, %148 : vector<8x32xf32>
    %150 = vector.broadcast %130 : vector<1x32xf32> to vector<8x32xf32>
    %151 = arith.mulf %149, %150 : vector<8x32xf32>
    %152 = vector.broadcast %131 : vector<1x32xf32> to vector<8x32xf32>
    %153 = arith.addf %151, %152 : vector<8x32xf32>
    %c0_51 = arith.constant 0 : index
    %c0_52 = arith.constant 0 : index
    %c0_53 = arith.constant 0 : index
    %154 = vector.load %arg9[%c0_51, %c0_52, %c0_53] : memref<1x8x32xf32, #tpu.memory_space<vmem>>, vector<1x8x32xf32>
    %155 = vector.shape_cast %154 : vector<1x8x32xf32> to vector<8x32xf32>
    %156 = vector.shape_cast %153 : vector<8x32xf32> to vector<1x8x32xf32>
    tpu.vector_store %arg9[%c0_51, %c0_52, %c0_53], %156 {strides = array<i32>} : memref<1x8x32xf32, #tpu.memory_space<vmem>>, vector<1x8x32xf32>,
    return
  }
  func.func @transform_0(%arg0: i32, %arg1: memref<2xi32, #tpu.memory_space<smem>>) -> (i32, i32, i32) {
    %c0_i32 = arith.constant 0 : i32
    %c0_i32_0 = arith.constant 0 : i32
    %c0_i32_1 = arith.constant 0 : i32
    return %arg0, %c0_i32, %c0_i32_0 : i32, i32, i32
  }
  func.func @transform_1(%arg0: i32, %arg1: memref<2xi32, #tpu.memory_space<smem>>) -> (i32, i32) {
    %c0_i32 = arith.constant 0 : i32
    %c0_i32_0 = arith.constant 0 : i32
    %c0_i32_1 = arith.constant 0 : i32
    return %c0_i32, %c0_i32_0 : i32, i32
  }
  func.func @transform_2(%arg0: i32, %arg1: memref<2xi32, #tpu.memory_space<smem>>) -> (i32, i32) {
    %c0_i32 = arith.constant 0 : i32
    %c0_i32_0 = arith.constant 0 : i32
    %c0_i32_1 = arith.constant 0 : i32
    return %c0_i32, %c0_i32_0 : i32, i32
  }
  func.func @transform_3(%arg0: i32, %arg1: memref<2xi32, #tpu.memory_space<smem>>) -> (i32, i32) {
    %c0_i32 = arith.constant 0 : i32
    %c0_i32_0 = arith.constant 0 : i32
    %c0_i32_1 = arith.constant 0 : i32
    return %c0_i32, %c0_i32_0 : i32, i32
  }
  func.func @transform_4(%arg0: i32, %arg1: memref<2xi32, #tpu.memory_space<smem>>) -> (i32, i32) {
    %c0_i32 = arith.constant 0 : i32
    %c0_i32_0 = arith.constant 0 : i32
    %c0_i32_1 = arith.constant 0 : i32
    return %c0_i32, %c0_i32_0 : i32, i32
  }
  func.func @transform_5(%arg0: i32, %arg1: memref<2xi32, #tpu.memory_space<smem>>) -> (i32, i32) {
    %c0_i32 = arith.constant 0 : i32
    %c0_i32_0 = arith.constant 0 : i32
    %c0_i32_1 = arith.constant 0 : i32
    return %c0_i32, %c0_i32_0 : i32, i32
  }
  func.func @transform_6(%arg0: i32, %arg1: memref<2xi32, #tpu.memory_space<smem>>) -> (i32, i32) {
    %c0_i32 = arith.constant 0 : i32
    %c0_i32_0 = arith.constant 0 : i32
    %c0_i32_1 = arith.constant 0 : i32
    return %c0_i32, %c0_i32_0 : i32, i32
  }
  func.func @transform_7(%arg0: i32, %arg1: memref<2xi32, #tpu.memory_space<smem>>) -> (i32, i32, i32) {
    %c0_i32 = arith.constant 0 : i32
    %c0_i32_0 = arith.constant 0 : i32
    %c0_i32_1 = arith.constant 0 : i32
    return %arg0, %c0_i32, %c0_i32_0 : i32, i32, i32
  }
}

module attributes {stable_mosaic.version = 11 : i64} {
  func.func @kernel(%arg0: i32, %arg1: memref<2xi32, #tpu.memory_space<smem>>, %arg2: memref<1x8x32xf32, #tpu.memory_space<vmem>>, %arg3: memref<32x96xbf16, #tpu.memory_space<vmem>>, %arg4: memref<1x96xf32, #tpu.memory_space<vmem>>, %arg5: memref<32x32xf32, #tpu.memory_space<vmem>>, %arg6: memref<1x32xf32, #tpu.memory_space<vmem>>, %arg7: memref<1x32xf32, #tpu.memory_space<vmem>>, %arg8: memref<1x32xf32, #tpu.memory_space<vmem>>, %arg9: memref<1x8x32xf32, #tpu.memory_space<vmem>>) attributes {dimension_semantics = [#tpu.dimension_semantics<parallel>], iteration_bounds = array<i64: 2>, scalar_prefetch = 1 : i64, scratch_operands = 0 : i64, tpu.core_type = #tpu.core_type<tc>, window_params = [{transform_indices = @transform_0, window_bounds = array<i64: 1, 8, 32>}, {pipeline_mode = #tpu.pipeline_mode<synchronous>, transform_indices = @transform_1, window_bounds = array<i64: 32, 96>}, {pipeline_mode = #tpu.pipeline_mode<synchronous>, transform_indices = @transform_2, window_bounds = array<i64: 1, 96>}, {pipeline_mode = #tpu.pipeline_mode<synchronous>, transform_indices = @transform_3, window_bounds = array<i64: 32, 32>}, {pipeline_mode = #tpu.pipeline_mode<synchronous>, transform_indices = @transform_4, window_bounds = array<i64: 1, 32>}, {pipeline_mode = #tpu.pipeline_mode<synchronous>, transform_indices = @transform_5, window_bounds = array<i64: 1, 32>}, {pipeline_mode = #tpu.pipeline_mode<synchronous>, transform_indices = @transform_6, window_bounds = array<i64: 1, 32>}, {transform_indices = @transform_7, window_bounds = array<i64: 1, 8, 32>}]} {
    %0 = arith.index_cast %arg0 : i32 to index
    %1 = memref.load %arg1[%0] : memref<2xi32, #tpu.memory_space<smem>>
    %c0 = arith.constant 0 : index
    %c0_0 = arith.constant 0 : index
    %c0_1 = arith.constant 0 : index
    %2 = vector.load %arg2[%c0, %c0_0, %c0_1] : memref<1x8x32xf32, #tpu.memory_space<vmem>>, vector<1x8x32xf32>
    %3 = vector.shape_cast %2 : vector<1x8x32xf32> to vector<8x32xf32>
    %4 = arith.truncf %3 : vector<8x32xf32> to vector<8x32xbf16>
    %c0_2 = arith.constant 0 : index
    %c0_3 = arith.constant 0 : index
    %5 = vector.load %arg3[%c0_2, %c0_3] : memref<32x96xbf16, #tpu.memory_space<vmem>>, vector<32x96xbf16>
    %cst = arith.constant dense<0.000000e+00> : vector<8x96xf32>
    %6 = tpu.matmul %4, %5, %cst {dimension_numbers = #tpu.dot_dimension_numbers<[1], [0], [0], [1], [0, 0, 1, 1], [], []>} : vector<8x32xbf16>, vector<32x96xbf16>, vector<8x96xf32> -> vector<8x96xf32>
    %c0_4 = arith.constant 0 : index
    %c0_5 = arith.constant 0 : index
    %7 = vector.load %arg4[%c0_4, %c0_5] : memref<1x96xf32, #tpu.memory_space<vmem>>, vector<1x96xf32>
    %8 = vector.broadcast %7 : vector<1x96xf32> to vector<8x96xf32>
    %9 = arith.addf %6, %8 : vector<8x96xf32>
    %10 = tpu.iota {dimensions = array<i32: 0>} : vector<8x8xi32>
    %11 = tpu.iota {dimensions = array<i32: 1>} : vector<8x8xi32>
    %12 = vector.broadcast %1 : i32 to vector<8x8xi32>
    %13 = arith.cmpi slt, %11, %12 : vector<8x8xi32>
    %14 = arith.cmpi sle, %11, %10 : vector<8x8xi32>
    %15 = arith.andi %13, %14 : vector<8x8xi1>
    %cst_6 = arith.constant 0.000000e+00 : f32
    %16 = vector.broadcast %cst_6 : f32 to vector<8x32xf32>
    %17 = vector.extract_strided_slice %9 {offsets = [0, 0], sizes = [8, 8], strides = [1, 1]} : vector<8x96xf32> to vector<8x8xf32>
    %18 = vector.extract_strided_slice %9 {offsets = [0, 32], sizes = [8, 8], strides = [1, 1]} : vector<8x96xf32> to vector<8x8xf32>
    %19 = vector.extract_strided_slice %9 {offsets = [0, 64], sizes = [8, 8], strides = [1, 1]} : vector<8x96xf32> to vector<8x8xf32>
    %20 = arith.truncf %17 : vector<8x8xf32> to vector<8x8xbf16>
    %21 = arith.truncf %18 : vector<8x8xf32> to vector<8x8xbf16>
    %cst_7 = arith.constant dense<0.000000e+00> : vector<8x8xf32>
    %22 = tpu.matmul %20, %21, %cst_7 {dimension_numbers = #tpu.dot_dimension_numbers<[1], [1], [0], [0], [0, 0, 1, 0], [], []>} : vector<8x8xbf16>, vector<8x8xbf16>, vector<8x8xf32> -> vector<8x8xf32>
    %cst_8 = arith.constant 0.353553385 : f32
    %23 = vector.broadcast %cst_8 : f32 to vector<8x8xf32>
    %24 = arith.mulf %22, %23 : vector<8x8xf32>
    %cst_9 = arith.constant -1.000000e+09 : f32
    %25 = vector.broadcast %cst_9 : f32 to vector<8x8xf32>
    %26 = arith.select %15, %24, %25 : vector<8x8xi1>, vector<8x8xf32>
    %cst_10 = arith.constant dense<0xFF800000> : vector<8xf32>
    %27 = vector.multi_reduction <maximumf>, %26, %cst_10 [1] : vector<8x8xf32> to vector<8xf32>
    %28 = vector.shape_cast %27 : vector<8xf32> to vector<8x1xf32>
    %29 = vector.broadcast %28 : vector<8x1xf32> to vector<8x8xf32>
    %30 = arith.subf %26, %29 : vector<8x8xf32>
    %31 = math.exp %30 : vector<8x8xf32>
    %cst_11 = arith.constant dense<0.000000e+00> : vector<8xf32>
    %32 = vector.multi_reduction <add>, %31, %cst_11 [1] : vector<8x8xf32> to vector<8xf32>
    %33 = vector.shape_cast %32 : vector<8xf32> to vector<8x1xf32>
    %34 = tpu.reciprocal %33 {approx = true} : vector<8x1xf32> -> vector<8x1xf32>
    %35 = vector.broadcast %34 : vector<8x1xf32> to vector<8x8xf32>
    %36 = arith.mulf %31, %35 : vector<8x8xf32>
    %37 = arith.truncf %36 : vector<8x8xf32> to vector<8x8xbf16>
    %38 = arith.truncf %19 : vector<8x8xf32> to vector<8x8xbf16>
    %cst_12 = arith.constant dense<0.000000e+00> : vector<8x8xf32>
    %39 = tpu.matmul %37, %38, %cst_12 {dimension_numbers = #tpu.dot_dimension_numbers<[1], [0], [0], [1], [0, 0, 1, 1], [], []>} : vector<8x8xbf16>, vector<8x8xbf16>, vector<8x8xf32> -> vector<8x8xf32>
    %40 = arith.truncf %39 : vector<8x8xf32> to vector<8x8xbf16>
    %c0_13 = arith.constant 0 : index
    %c0_14 = arith.constant 0 : index
    %41 = vector.load %arg5[%c0_13, %c0_14] : memref<32x32xf32, #tpu.memory_space<vmem>>, vector<8x32xf32>
    %42 = arith.truncf %41 : vector<8x32xf32> to vector<8x32xbf16>
    %cst_15 = arith.constant dense<0.000000e+00> : vector<8x32xf32>
    %43 = tpu.matmul %40, %42, %cst_15 {dimension_numbers = #tpu.dot_dimension_numbers<[1], [0], [0], [1], [0, 0, 1, 1], [], []>} : vector<8x8xbf16>, vector<8x32xbf16>, vector<8x32xf32> -> vector<8x32xf32>
    %44 = arith.addf %16, %43 : vector<8x32xf32>
    %45 = vector.extract_strided_slice %9 {offsets = [0, 8], sizes = [8, 8], strides = [1, 1]} : vector<8x96xf32> to vector<8x8xf32>
    %46 = vector.extract_strided_slice %9 {offsets = [0, 40], sizes = [8, 8], strides = [1, 1]} : vector<8x96xf32> to vector<8x8xf32>
    %47 = vector.extract_strided_slice %9 {offsets = [0, 72], sizes = [8, 8], strides = [1, 1]} : vector<8x96xf32> to vector<8x8xf32>
    %48 = arith.truncf %45 : vector<8x8xf32> to vector<8x8xbf16>
    %49 = arith.truncf %46 : vector<8x8xf32> to vector<8x8xbf16>
    %cst_16 = arith.constant dense<0.000000e+00> : vector<8x8xf32>
    %50 = tpu.matmul %48, %49, %cst_16 {dimension_numbers = #tpu.dot_dimension_numbers<[1], [1], [0], [0], [0, 0, 1, 0], [], []>} : vector<8x8xbf16>, vector<8x8xbf16>, vector<8x8xf32> -> vector<8x8xf32>
    %cst_17 = arith.constant 0.353553385 : f32
    %51 = vector.broadcast %cst_17 : f32 to vector<8x8xf32>
    %52 = arith.mulf %50, %51 : vector<8x8xf32>
    %cst_18 = arith.constant -1.000000e+09 : f32
    %53 = vector.broadcast %cst_18 : f32 to vector<8x8xf32>
    %54 = arith.select %15, %52, %53 : vector<8x8xi1>, vector<8x8xf32>
    %cst_19 = arith.constant dense<0xFF800000> : vector<8xf32>
    %55 = vector.multi_reduction <maximumf>, %54, %cst_19 [1] : vector<8x8xf32> to vector<8xf32>
    %56 = vector.shape_cast %55 : vector<8xf32> to vector<8x1xf32>
    %57 = vector.broadcast %56 : vector<8x1xf32> to vector<8x8xf32>
    %58 = arith.subf %54, %57 : vector<8x8xf32>
    %59 = math.exp %58 : vector<8x8xf32>
    %cst_20 = arith.constant dense<0.000000e+00> : vector<8xf32>
    %60 = vector.multi_reduction <add>, %59, %cst_20 [1] : vector<8x8xf32> to vector<8xf32>
    %61 = vector.shape_cast %60 : vector<8xf32> to vector<8x1xf32>
    %62 = tpu.reciprocal %61 {approx = true} : vector<8x1xf32> -> vector<8x1xf32>
    %63 = vector.broadcast %62 : vector<8x1xf32> to vector<8x8xf32>
    %64 = arith.mulf %59, %63 : vector<8x8xf32>
    %65 = arith.truncf %64 : vector<8x8xf32> to vector<8x8xbf16>
    %66 = arith.truncf %47 : vector<8x8xf32> to vector<8x8xbf16>
    %cst_21 = arith.constant dense<0.000000e+00> : vector<8x8xf32>
    %67 = tpu.matmul %65, %66, %cst_21 {dimension_numbers = #tpu.dot_dimension_numbers<[1], [0], [0], [1], [0, 0, 1, 1], [], []>} : vector<8x8xbf16>, vector<8x8xbf16>, vector<8x8xf32> -> vector<8x8xf32>
    %68 = arith.truncf %67 : vector<8x8xf32> to vector<8x8xbf16>
    %c8 = arith.constant 8 : index
    %c0_22 = arith.constant 0 : index
    %69 = vector.load %arg5[%c8, %c0_22] : memref<32x32xf32, #tpu.memory_space<vmem>>, vector<8x32xf32>
    %70 = arith.truncf %69 : vector<8x32xf32> to vector<8x32xbf16>
    %cst_23 = arith.constant dense<0.000000e+00> : vector<8x32xf32>
    %71 = tpu.matmul %68, %70, %cst_23 {dimension_numbers = #tpu.dot_dimension_numbers<[1], [0], [0], [1], [0, 0, 1, 1], [], []>} : vector<8x8xbf16>, vector<8x32xbf16>, vector<8x32xf32> -> vector<8x32xf32>
    %72 = arith.addf %44, %71 : vector<8x32xf32>
    %73 = vector.extract_strided_slice %9 {offsets = [0, 16], sizes = [8, 8], strides = [1, 1]} : vector<8x96xf32> to vector<8x8xf32>
    %74 = vector.extract_strided_slice %9 {offsets = [0, 48], sizes = [8, 8], strides = [1, 1]} : vector<8x96xf32> to vector<8x8xf32>
    %75 = vector.extract_strided_slice %9 {offsets = [0, 80], sizes = [8, 8], strides = [1, 1]} : vector<8x96xf32> to vector<8x8xf32>
    %76 = arith.truncf %73 : vector<8x8xf32> to vector<8x8xbf16>
    %77 = arith.truncf %74 : vector<8x8xf32> to vector<8x8xbf16>
    %cst_24 = arith.constant dense<0.000000e+00> : vector<8x8xf32>
    %78 = tpu.matmul %76, %77, %cst_24 {dimension_numbers = #tpu.dot_dimension_numbers<[1], [1], [0], [0], [0, 0, 1, 0], [], []>} : vector<8x8xbf16>, vector<8x8xbf16>, vector<8x8xf32> -> vector<8x8xf32>
    %cst_25 = arith.constant 0.353553385 : f32
    %79 = vector.broadcast %cst_25 : f32 to vector<8x8xf32>
    %80 = arith.mulf %78, %79 : vector<8x8xf32>
    %cst_26 = arith.constant -1.000000e+09 : f32
    %81 = vector.broadcast %cst_26 : f32 to vector<8x8xf32>
    %82 = arith.select %15, %80, %81 : vector<8x8xi1>, vector<8x8xf32>
    %cst_27 = arith.constant dense<0xFF800000> : vector<8xf32>
    %83 = vector.multi_reduction <maximumf>, %82, %cst_27 [1] : vector<8x8xf32> to vector<8xf32>
    %84 = vector.shape_cast %83 : vector<8xf32> to vector<8x1xf32>
    %85 = vector.broadcast %84 : vector<8x1xf32> to vector<8x8xf32>
    %86 = arith.subf %82, %85 : vector<8x8xf32>
    %87 = math.exp %86 : vector<8x8xf32>
    %cst_28 = arith.constant dense<0.000000e+00> : vector<8xf32>
    %88 = vector.multi_reduction <add>, %87, %cst_28 [1] : vector<8x8xf32> to vector<8xf32>
    %89 = vector.shape_cast %88 : vector<8xf32> to vector<8x1xf32>
    %90 = tpu.reciprocal %89 {approx = true} : vector<8x1xf32> -> vector<8x1xf32>
    %91 = vector.broadcast %90 : vector<8x1xf32> to vector<8x8xf32>
    %92 = arith.mulf %87, %91 : vector<8x8xf32>
    %93 = arith.truncf %92 : vector<8x8xf32> to vector<8x8xbf16>
    %94 = arith.truncf %75 : vector<8x8xf32> to vector<8x8xbf16>
    %cst_29 = arith.constant dense<0.000000e+00> : vector<8x8xf32>
    %95 = tpu.matmul %93, %94, %cst_29 {dimension_numbers = #tpu.dot_dimension_numbers<[1], [0], [0], [1], [0, 0, 1, 1], [], []>} : vector<8x8xbf16>, vector<8x8xbf16>, vector<8x8xf32> -> vector<8x8xf32>
    %96 = arith.truncf %95 : vector<8x8xf32> to vector<8x8xbf16>
    %c16 = arith.constant 16 : index
    %c0_30 = arith.constant 0 : index
    %97 = vector.load %arg5[%c16, %c0_30] : memref<32x32xf32, #tpu.memory_space<vmem>>, vector<8x32xf32>
    %98 = arith.truncf %97 : vector<8x32xf32> to vector<8x32xbf16>
    %cst_31 = arith.constant dense<0.000000e+00> : vector<8x32xf32>
    %99 = tpu.matmul %96, %98, %cst_31 {dimension_numbers = #tpu.dot_dimension_numbers<[1], [0], [0], [1], [0, 0, 1, 1], [], []>} : vector<8x8xbf16>, vector<8x32xbf16>, vector<8x32xf32> -> vector<8x32xf32>
    %100 = arith.addf %72, %99 : vector<8x32xf32>
    %101 = vector.extract_strided_slice %9 {offsets = [0, 24], sizes = [8, 8], strides = [1, 1]} : vector<8x96xf32> to vector<8x8xf32>
    %102 = vector.extract_strided_slice %9 {offsets = [0, 56], sizes = [8, 8], strides = [1, 1]} : vector<8x96xf32> to vector<8x8xf32>
    %103 = vector.extract_strided_slice %9 {offsets = [0, 88], sizes = [8, 8], strides = [1, 1]} : vector<8x96xf32> to vector<8x8xf32>
    %104 = arith.truncf %101 : vector<8x8xf32> to vector<8x8xbf16>
    %105 = arith.truncf %102 : vector<8x8xf32> to vector<8x8xbf16>
    %cst_32 = arith.constant dense<0.000000e+00> : vector<8x8xf32>
    %106 = tpu.matmul %104, %105, %cst_32 {dimension_numbers = #tpu.dot_dimension_numbers<[1], [1], [0], [0], [0, 0, 1, 0], [], []>} : vector<8x8xbf16>, vector<8x8xbf16>, vector<8x8xf32> -> vector<8x8xf32>
    %cst_33 = arith.constant 0.353553385 : f32
    %107 = vector.broadcast %cst_33 : f32 to vector<8x8xf32>
    %108 = arith.mulf %106, %107 : vector<8x8xf32>
    %cst_34 = arith.constant -1.000000e+09 : f32
    %109 = vector.broadcast %cst_34 : f32 to vector<8x8xf32>
    %110 = arith.select %15, %108, %109 : vector<8x8xi1>, vector<8x8xf32>
    %cst_35 = arith.constant dense<0xFF800000> : vector<8xf32>
    %111 = vector.multi_reduction <maximumf>, %110, %cst_35 [1] : vector<8x8xf32> to vector<8xf32>
    %112 = vector.shape_cast %111 : vector<8xf32> to vector<8x1xf32>
    %113 = vector.broadcast %112 : vector<8x1xf32> to vector<8x8xf32>
    %114 = arith.subf %110, %113 : vector<8x8xf32>
    %115 = math.exp %114 : vector<8x8xf32>
    %cst_36 = arith.constant dense<0.000000e+00> : vector<8xf32>
    %116 = vector.multi_reduction <add>, %115, %cst_36 [1] : vector<8x8xf32> to vector<8xf32>
    %117 = vector.shape_cast %116 : vector<8xf32> to vector<8x1xf32>
    %118 = tpu.reciprocal %117 {approx = true} : vector<8x1xf32> -> vector<8x1xf32>
    %119 = vector.broadcast %118 : vector<8x1xf32> to vector<8x8xf32>
    %120 = arith.mulf %115, %119 : vector<8x8xf32>
    %121 = arith.truncf %120 : vector<8x8xf32> to vector<8x8xbf16>
    %122 = arith.truncf %103 : vector<8x8xf32> to vector<8x8xbf16>
    %cst_37 = arith.constant dense<0.000000e+00> : vector<8x8xf32>
    %123 = tpu.matmul %121, %122, %cst_37 {dimension_numbers = #tpu.dot_dimension_numbers<[1], [0], [0], [1], [0, 0, 1, 1], [], []>} : vector<8x8xbf16>, vector<8x8xbf16>, vector<8x8xf32> -> vector<8x8xf32>
    %124 = arith.truncf %123 : vector<8x8xf32> to vector<8x8xbf16>
    %c24 = arith.constant 24 : index
    %c0_38 = arith.constant 0 : index
    %125 = vector.load %arg5[%c24, %c0_38] : memref<32x32xf32, #tpu.memory_space<vmem>>, vector<8x32xf32>
    %126 = arith.truncf %125 : vector<8x32xf32> to vector<8x32xbf16>
    %cst_39 = arith.constant dense<0.000000e+00> : vector<8x32xf32>
    %127 = tpu.matmul %124, %126, %cst_39 {dimension_numbers = #tpu.dot_dimension_numbers<[1], [0], [0], [1], [0, 0, 1, 1], [], []>} : vector<8x8xbf16>, vector<8x32xbf16>, vector<8x32xf32> -> vector<8x32xf32>
    %128 = arith.addf %100, %127 : vector<8x32xf32>
    %129 = arith.addf %3, %128 : vector<8x32xf32>
    %c0_40 = arith.constant 0 : index
    %c0_41 = arith.constant 0 : index
    %130 = vector.load %arg6[%c0_40, %c0_41] : memref<1x32xf32, #tpu.memory_space<vmem>>, vector<1x32xf32>
    %131 = vector.broadcast %130 : vector<1x32xf32> to vector<8x32xf32>
    %132 = arith.addf %129, %131 : vector<8x32xf32>
    %c0_42 = arith.constant 0 : index
    %c0_43 = arith.constant 0 : index
    %133 = vector.load %arg7[%c0_42, %c0_43] : memref<1x32xf32, #tpu.memory_space<vmem>>, vector<1x32xf32>
    %c0_44 = arith.constant 0 : index
    %c0_45 = arith.constant 0 : index
    %134 = vector.load %arg8[%c0_44, %c0_45] : memref<1x32xf32, #tpu.memory_space<vmem>>, vector<1x32xf32>
    %cst_46 = arith.constant dense<0.000000e+00> : vector<8xf32>
    %135 = vector.multi_reduction <add>, %132, %cst_46 [1] : vector<8x32xf32> to vector<8xf32>
    %136 = vector.shape_cast %135 : vector<8xf32> to vector<8x1xf32>
    %cst_47 = arith.constant 3.200000e+01 : f32
    %137 = vector.broadcast %cst_47 : f32 to vector<8x1xf32>
    %138 = arith.divf %136, %137 : vector<8x1xf32>
    %139 = vector.broadcast %138 : vector<8x1xf32> to vector<8x32xf32>
    %140 = arith.subf %132, %139 : vector<8x32xf32>
    %141 = arith.mulf %140, %140 : vector<8x32xf32>
    %cst_48 = arith.constant dense<0.000000e+00> : vector<8xf32>
    %142 = vector.multi_reduction <add>, %141, %cst_48 [1] : vector<8x32xf32> to vector<8xf32>
    %143 = vector.shape_cast %142 : vector<8xf32> to vector<8x1xf32>
    %cst_49 = arith.constant 3.200000e+01 : f32
    %144 = vector.broadcast %cst_49 : f32 to vector<8x1xf32>
    %145 = arith.divf %143, %144 : vector<8x1xf32>
    %146 = vector.broadcast %138 : vector<8x1xf32> to vector<8x32xf32>
    %147 = arith.subf %132, %146 : vector<8x32xf32>
    %cst_50 = arith.constant 9.99999974E-6 : f32
    %148 = vector.broadcast %cst_50 : f32 to vector<8x1xf32>
    %149 = arith.addf %145, %148 : vector<8x1xf32>
    %150 = math.rsqrt %149 : vector<8x1xf32>
    %151 = vector.broadcast %150 : vector<8x1xf32> to vector<8x32xf32>
    %152 = arith.mulf %147, %151 : vector<8x32xf32>
    %153 = vector.broadcast %133 : vector<1x32xf32> to vector<8x32xf32>
    %154 = arith.mulf %152, %153 : vector<8x32xf32>
    %155 = vector.broadcast %134 : vector<1x32xf32> to vector<8x32xf32>
    %156 = arith.addf %154, %155 : vector<8x32xf32>
    %c0_51 = arith.constant 0 : index
    %c0_52 = arith.constant 0 : index
    %c0_53 = arith.constant 0 : index
    %157 = vector.load %arg9[%c0_51, %c0_52, %c0_53] : memref<1x8x32xf32, #tpu.memory_space<vmem>>, vector<1x8x32xf32>
    %158 = vector.shape_cast %157 : vector<1x8x32xf32> to vector<8x32xf32>
    %159 = vector.shape_cast %156 : vector<8x32xf32> to vector<1x8x32xf32>
    tpu.vector_store %arg9[%c0_51, %c0_52, %c0_53], %159 {strides = array<i32>} : memref<1x8x32xf32, #tpu.memory_space<vmem>>, vector<1x8x32xf32>,
    return
  }
  func.func @transform_0(%arg0: i32, %arg1: memref<2xi32, #tpu.memory_space<smem>>) -> (i32, i32, i32) {
    %c0_i32 = arith.constant 0 : i32
    %c0_i32_0 = arith.constant 0 : i32
    %c0_i32_1 = arith.constant 0 : i32
    return %arg0, %c0_i32, %c0_i32_0 : i32, i32, i32
  }
  func.func @transform_1(%arg0: i32, %arg1: memref<2xi32, #tpu.memory_space<smem>>) -> (i32, i32) {
    %c0_i32 = arith.constant 0 : i32
    %c0_i32_0 = arith.constant 0 : i32
    %c0_i32_1 = arith.constant 0 : i32
    return %c0_i32, %c0_i32_0 : i32, i32
  }
  func.func @transform_2(%arg0: i32, %arg1: memref<2xi32, #tpu.memory_space<smem>>) -> (i32, i32) {
    %c0_i32 = arith.constant 0 : i32
    %c0_i32_0 = arith.constant 0 : i32
    %c0_i32_1 = arith.constant 0 : i32
    return %c0_i32, %c0_i32_0 : i32, i32
  }
  func.func @transform_3(%arg0: i32, %arg1: memref<2xi32, #tpu.memory_space<smem>>) -> (i32, i32) {
    %c0_i32 = arith.constant 0 : i32
    %c0_i32_0 = arith.constant 0 : i32
    %c0_i32_1 = arith.constant 0 : i32
    return %c0_i32, %c0_i32_0 : i32, i32
  }
  func.func @transform_4(%arg0: i32, %arg1: memref<2xi32, #tpu.memory_space<smem>>) -> (i32, i32) {
    %c0_i32 = arith.constant 0 : i32
    %c0_i32_0 = arith.constant 0 : i32
    %c0_i32_1 = arith.constant 0 : i32
    return %c0_i32, %c0_i32_0 : i32, i32
  }
  func.func @transform_5(%arg0: i32, %arg1: memref<2xi32, #tpu.memory_space<smem>>) -> (i32, i32) {
    %c0_i32 = arith.constant 0 : i32
    %c0_i32_0 = arith.constant 0 : i32
    %c0_i32_1 = arith.constant 0 : i32
    return %c0_i32, %c0_i32_0 : i32, i32
  }
  func.func @transform_6(%arg0: i32, %arg1: memref<2xi32, #tpu.memory_space<smem>>) -> (i32, i32) {
    %c0_i32 = arith.constant 0 : i32
    %c0_i32_0 = arith.constant 0 : i32
    %c0_i32_1 = arith.constant 0 : i32
    return %c0_i32, %c0_i32_0 : i32, i32
  }
  func.func @transform_7(%arg0: i32, %arg1: memref<2xi32, #tpu.memory_space<smem>>) -> (i32, i32, i32) {
    %c0_i32 = arith.constant 0 : i32
    %c0_i32_0 = arith.constant 0 : i32
    %c0_i32_1 = arith.constant 0 : i32
    return %arg0, %c0_i32, %c0_i32_0 : i32, i32, i32
  }
}

module attributes {stable_mosaic.version = 11 : i64} {
  func.func @kernel(%arg0: memref<16x32xf32, #tpu.memory_space<vmem>>, %arg1: memref<32x64xbf16, #tpu.memory_space<vmem>>, %arg2: memref<1x64xf32, #tpu.memory_space<vmem>>, %arg3: memref<64x32xbf16, #tpu.memory_space<vmem>>, %arg4: memref<1x32xf32, #tpu.memory_space<vmem>>, %arg5: memref<1x32xf32, #tpu.memory_space<vmem>>, %arg6: memref<1x32xf32, #tpu.memory_space<vmem>>, %arg7: memref<16x32xf32, #tpu.memory_space<vmem>>) attributes {dimension_semantics = [], scalar_prefetch = 0 : i64, scratch_operands = 0 : i64, tpu.core_type = #tpu.core_type<tc>} {
    %c0 = arith.constant 0 : index
    %c0_0 = arith.constant 0 : index
    %0 = vector.load %arg0[%c0, %c0_0] : memref<16x32xf32, #tpu.memory_space<vmem>>, vector<16x32xf32>
    %1 = arith.truncf %0 : vector<16x32xf32> to vector<16x32xbf16>
    %c0_1 = arith.constant 0 : index
    %c0_2 = arith.constant 0 : index
    %2 = vector.load %arg1[%c0_1, %c0_2] : memref<32x64xbf16, #tpu.memory_space<vmem>>, vector<32x64xbf16>
    %cst = arith.constant dense<0.000000e+00> : vector<16x64xf32>
    %3 = tpu.matmul %1, %2, %cst {dimension_numbers = #tpu.dot_dimension_numbers<[1], [0], [0], [1], [0, 0, 1, 1], [], []>} : vector<16x32xbf16>, vector<32x64xbf16>, vector<16x64xf32> -> vector<16x64xf32>
    %c0_3 = arith.constant 0 : index
    %c0_4 = arith.constant 0 : index
    %4 = vector.load %arg2[%c0_3, %c0_4] : memref<1x64xf32, #tpu.memory_space<vmem>>, vector<1x64xf32>
    %5 = vector.broadcast %4 : vector<1x64xf32> to vector<16x64xf32>
    %6 = arith.addf %3, %5 : vector<16x64xf32>
    %cst_5 = arith.constant 0.000000e+00 : f32
    %7 = vector.broadcast %cst_5 : f32 to vector<16x64xf32>
    %8 = arith.maximumf %6, %7 : vector<16x64xf32>
    %9 = arith.truncf %8 : vector<16x64xf32> to vector<16x64xbf16>
    %c0_6 = arith.constant 0 : index
    %c0_7 = arith.constant 0 : index
    %10 = vector.load %arg3[%c0_6, %c0_7] : memref<64x32xbf16, #tpu.memory_space<vmem>>, vector<64x32xbf16>
    %cst_8 = arith.constant dense<0.000000e+00> : vector<16x32xf32>
    %11 = tpu.matmul %9, %10, %cst_8 {dimension_numbers = #tpu.dot_dimension_numbers<[1], [0], [0], [1], [0, 0, 1, 1], [], []>} : vector<16x64xbf16>, vector<64x32xbf16>, vector<16x32xf32> -> vector<16x32xf32>
    %c0_9 = arith.constant 0 : index
    %c0_10 = arith.constant 0 : index
    %12 = vector.load %arg4[%c0_9, %c0_10] : memref<1x32xf32, #tpu.memory_space<vmem>>, vector<1x32xf32>
    %13 = vector.broadcast %12 : vector<1x32xf32> to vector<16x32xf32>
    %14 = arith.addf %11, %13 : vector<16x32xf32>
    %15 = arith.addf %0, %14 : vector<16x32xf32>
    %c0_11 = arith.constant 0 : index
    %c0_12 = arith.constant 0 : index
    %16 = vector.load %arg5[%c0_11, %c0_12] : memref<1x32xf32, #tpu.memory_space<vmem>>, vector<1x32xf32>
    %c0_13 = arith.constant 0 : index
    %c0_14 = arith.constant 0 : index
    %17 = vector.load %arg6[%c0_13, %c0_14] : memref<1x32xf32, #tpu.memory_space<vmem>>, vector<1x32xf32>
    %cst_15 = arith.constant dense<0.000000e+00> : vector<16xf32>
    %18 = vector.multi_reduction <add>, %15, %cst_15 [1] : vector<16x32xf32> to vector<16xf32>
    %19 = vector.shape_cast %18 : vector<16xf32> to vector<16x1xf32>
    %cst_16 = arith.constant 3.200000e+01 : f32
    %20 = vector.broadcast %cst_16 : f32 to vector<16x1xf32>
    %21 = arith.divf %19, %20 : vector<16x1xf32>
    %22 = vector.broadcast %21 : vector<16x1xf32> to vector<16x32xf32>
    %23 = arith.subf %15, %22 : vector<16x32xf32>
    %24 = arith.mulf %23, %23 : vector<16x32xf32>
    %cst_17 = arith.constant dense<0.000000e+00> : vector<16xf32>
    %25 = vector.multi_reduction <add>, %24, %cst_17 [1] : vector<16x32xf32> to vector<16xf32>
    %26 = vector.shape_cast %25 : vector<16xf32> to vector<16x1xf32>
    %cst_18 = arith.constant 3.200000e+01 : f32
    %27 = vector.broadcast %cst_18 : f32 to vector<16x1xf32>
    %28 = arith.divf %26, %27 : vector<16x1xf32>
    %29 = vector.broadcast %21 : vector<16x1xf32> to vector<16x32xf32>
    %30 = arith.subf %15, %29 : vector<16x32xf32>
    %cst_19 = arith.constant 9.99999974E-6 : f32
    %31 = vector.broadcast %cst_19 : f32 to vector<16x1xf32>
    %32 = arith.addf %28, %31 : vector<16x1xf32>
    %33 = math.rsqrt %32 : vector<16x1xf32>
    %34 = vector.broadcast %33 : vector<16x1xf32> to vector<16x32xf32>
    %35 = arith.mulf %30, %34 : vector<16x32xf32>
    %36 = vector.broadcast %16 : vector<1x32xf32> to vector<16x32xf32>
    %37 = arith.mulf %35, %36 : vector<16x32xf32>
    %38 = vector.broadcast %17 : vector<1x32xf32> to vector<16x32xf32>
    %39 = arith.addf %37, %38 : vector<16x32xf32>
    %c0_20 = arith.constant 0 : index
    %c0_21 = arith.constant 0 : index
    %40 = vector.load %arg7[%c0_20, %c0_21] : memref<16x32xf32, #tpu.memory_space<vmem>>, vector<16x32xf32>
    tpu.vector_store %arg7[%c0_20, %c0_21], %39 {strides = array<i32>} : memref<16x32xf32, #tpu.memory_space<vmem>>, vector<16x32xf32>,
    return
  }
}

module attributes {stable_mosaic.version = 11 : i64} {
  func.func @kernel(%arg0: i32, %arg1: memref<2xi32, #tpu.memory_space<smem>>, %arg2: memref<1x8x32xf32, #tpu.memory_space<vmem>>, %arg3: memref<1x8x32xf32, #tpu.memory_space<vmem>>, %arg4: memref<32x32xbf16, #tpu.memory_space<vmem>>, %arg5: memref<1x32xf32, #tpu.memory_space<vmem>>, %arg6: memref<32x64xbf16, #tpu.memory_space<vmem>>, %arg7: memref<1x64xf32, #tpu.memory_space<vmem>>, %arg8: memref<32x32xf32, #tpu.memory_space<vmem>>, %arg9: memref<1x32xf32, #tpu.memory_space<vmem>>, %arg10: memref<1x32xf32, #tpu.memory_space<vmem>>, %arg11: memref<1x32xf32, #tpu.memory_space<vmem>>, %arg12: memref<1x8x32xf32, #tpu.memory_space<vmem>>) attributes {dimension_semantics = [#tpu.dimension_semantics<parallel>], iteration_bounds = array<i64: 2>, scalar_prefetch = 1 : i64, scratch_operands = 0 : i64, tpu.core_type = #tpu.core_type<tc>, window_params = [{transform_indices = @transform_0, window_bounds = array<i64: 1, 8, 32>}, {transform_indices = @transform_1, window_bounds = array<i64: 1, 8, 32>}, {pipeline_mode = #tpu.pipeline_mode<synchronous>, transform_indices = @transform_2, window_bounds = array<i64: 32, 32>}, {pipeline_mode = #tpu.pipeline_mode<synchronous>, transform_indices = @transform_3, window_bounds = array<i64: 1, 32>}, {pipeline_mode = #tpu.pipeline_mode<synchronous>, transform_indices = @transform_4, window_bounds = array<i64: 32, 64>}, {pipeline_mode = #tpu.pipeline_mode<synchronous>, transform_indices = @transform_5, window_bounds = array<i64: 1, 64>}, {pipeline_mode = #tpu.pipeline_mode<synchronous>, transform_indices = @transform_6, window_bounds = array<i64: 32, 32>}, {pipeline_mode = #tpu.pipeline_mode<synchronous>, transform_indices = @transform_7, window_bounds = array<i64: 1, 32>}, {pipeline_mode = #tpu.pipeline_mode<synchronous>, transform_indices = @transform_8, window_bounds = array<i64: 1, 32>}, {pipeline_mode = #tpu.pipeline_mode<synchronous>, transform_indices = @transform_9, window_bounds = array<i64: 1, 32>}, {transform_indices = @transform_10, window_bounds = array<i64: 1, 8, 32>}]} {
    %0 = arith.index_cast %arg0 : i32 to index
    %1 = memref.load %arg1[%0] : memref<2xi32, #tpu.memory_space<smem>>
    %c0 = arith.constant 0 : index
    %c0_0 = arith.constant 0 : index
    %c0_1 = arith.constant 0 : index
    %2 = vector.load %arg2[%c0, %c0_0, %c0_1] : memref<1x8x32xf32, #tpu.memory_space<vmem>>, vector<1x8x32xf32>
    %3 = vector.shape_cast %2 : vector<1x8x32xf32> to vector<8x32xf32>
    %c0_2 = arith.constant 0 : index
    %c0_3 = arith.constant 0 : index
    %c0_4 = arith.constant 0 : index
    %4 = vector.load %arg3[%c0_2, %c0_3, %c0_4] : memref<1x8x32xf32, #tpu.memory_space<vmem>>, vector<1x8x32xf32>
    %5 = vector.shape_cast %4 : vector<1x8x32xf32> to vector<8x32xf32>
    %6 = arith.truncf %3 : vector<8x32xf32> to vector<8x32xbf16>
    %c0_5 = arith.constant 0 : index
    %c0_6 = arith.constant 0 : index
    %7 = vector.load %arg4[%c0_5, %c0_6] : memref<32x32xbf16, #tpu.memory_space<vmem>>, vector<32x32xbf16>
    %cst = arith.constant dense<0.000000e+00> : vector<8x32xf32>
    %8 = tpu.matmul %6, %7, %cst {dimension_numbers = #tpu.dot_dimension_numbers<[1], [0], [0], [1], [0, 0, 1, 1], [], []>} : vector<8x32xbf16>, vector<32x32xbf16>, vector<8x32xf32> -> vector<8x32xf32>
    %c0_7 = arith.constant 0 : index
    %c0_8 = arith.constant 0 : index
    %9 = vector.load %arg5[%c0_7, %c0_8] : memref<1x32xf32, #tpu.memory_space<vmem>>, vector<1x32xf32>
    %10 = vector.broadcast %9 : vector<1x32xf32> to vector<8x32xf32>
    %11 = arith.addf %8, %10 : vector<8x32xf32>
    %12 = arith.truncf %5 : vector<8x32xf32> to vector<8x32xbf16>
    %c0_9 = arith.constant 0 : index
    %c0_10 = arith.constant 0 : index
    %13 = vector.load %arg6[%c0_9, %c0_10] : memref<32x64xbf16, #tpu.memory_space<vmem>>, vector<32x64xbf16>
    %cst_11 = arith.constant dense<0.000000e+00> : vector<8x64xf32>
    %14 = tpu.matmul %12, %13, %cst_11 {dimension_numbers = #tpu.dot_dimension_numbers<[1], [0], [0], [1], [0, 0, 1, 1], [], []>} : vector<8x32xbf16>, vector<32x64xbf16>, vector<8x64xf32> -> vector<8x64xf32>
    %c0_12 = arith.constant 0 : index
    %c0_13 = arith.constant 0 : index
    %15 = vector.load %arg7[%c0_12, %c0_13] : memref<1x64xf32, #tpu.memory_space<vmem>>, vector<1x64xf32>
    %16 = vector.broadcast %15 : vector<1x64xf32> to vector<8x64xf32>
    %17 = arith.addf %14, %16 : vector<8x64xf32>
    %18 = tpu.iota {dimensions = array<i32: 1>} : vector<8x8xi32>
    %19 = vector.broadcast %1 : i32 to vector<8x8xi32>
    %20 = arith.cmpi slt, %18, %19 : vector<8x8xi32>
    %cst_14 = arith.constant 0.000000e+00 : f32
    %21 = vector.broadcast %cst_14 : f32 to vector<8x32xf32>
    %22 = vector.extract_strided_slice %11 {offsets = [0, 0], sizes = [8, 8], strides = [1, 1]} : vector<8x32xf32> to vector<8x8xf32>
    %23 = vector.extract_strided_slice %17 {offsets = [0, 0], sizes = [8, 8], strides = [1, 1]} : vector<8x64xf32> to vector<8x8xf32>
    %24 = vector.extract_strided_slice %17 {offsets = [0, 32], sizes = [8, 8], strides = [1, 1]} : vector<8x64xf32> to vector<8x8xf32>
    %25 = arith.truncf %22 : vector<8x8xf32> to vector<8x8xbf16>
    %26 = arith.truncf %23 : vector<8x8xf32> to vector<8x8xbf16>
    %cst_15 = arith.constant dense<0.000000e+00> : vector<8x8xf32>
    %27 = tpu.matmul %25, %26, %cst_15 {dimension_numbers = #tpu.dot_dimension_numbers<[1], [1], [0], [0], [0, 0, 1, 0], [], []>} : vector<8x8xbf16>, vector<8x8xbf16>, vector<8x8xf32> -> vector<8x8xf32>
    %cst_16 = arith.constant 0.353553385 : f32
    %28 = vector.broadcast %cst_16 : f32 to vector<8x8xf32>
    %29 = arith.mulf %27, %28 : vector<8x8xf32>
    %cst_17 = arith.constant -1.000000e+09 : f32
    %30 = vector.broadcast %cst_17 : f32 to vector<8x8xf32>
    %31 = arith.select %20, %29, %30 : vector<8x8xi1>, vector<8x8xf32>
    %cst_18 = arith.constant dense<0xFF800000> : vector<8xf32>
    %32 = vector.multi_reduction <maximumf>, %31, %cst_18 [1] : vector<8x8xf32> to vector<8xf32>
    %33 = vector.shape_cast %32 : vector<8xf32> to vector<8x1xf32>
    %34 = vector.broadcast %33 : vector<8x1xf32> to vector<8x8xf32>
    %35 = arith.subf %31, %34 : vector<8x8xf32>
    %36 = math.exp %35 : vector<8x8xf32>
    %cst_19 = arith.constant dense<0.000000e+00> : vector<8xf32>
    %37 = vector.multi_reduction <add>, %36, %cst_19 [1] : vector<8x8xf32> to vector<8xf32>
    %38 = vector.shape_cast %37 : vector<8xf32> to vector<8x1xf32>
    %39 = tpu.reciprocal %38 {approx = true} : vector<8x1xf32> -> vector<8x1xf32>
    %40 = vector.broadcast %39 : vector<8x1xf32> to vector<8x8xf32>
    %41 = arith.mulf %36, %40 : vector<8x8xf32>
    %42 = arith.truncf %41 : vector<8x8xf32> to vector<8x8xbf16>
    %43 = arith.truncf %24 : vector<8x8xf32> to vector<8x8xbf16>
    %cst_20 = arith.constant dense<0.000000e+00> : vector<8x8xf32>
    %44 = tpu.matmul %42, %43, %cst_20 {dimension_numbers = #tpu.dot_dimension_numbers<[1], [0], [0], [1], [0, 0, 1, 1], [], []>} : vector<8x8xbf16>, vector<8x8xbf16>, vector<8x8xf32> -> vector<8x8xf32>
    %45 = arith.truncf %44 : vector<8x8xf32> to vector<8x8xbf16>
    %c0_21 = arith.constant 0 : index
    %c0_22 = arith.constant 0 : index
    %46 = vector.load %arg8[%c0_21, %c0_22] : memref<32x32xf32, #tpu.memory_space<vmem>>, vector<8x32xf32>
    %47 = arith.truncf %46 : vector<8x32xf32> to vector<8x32xbf16>
    %cst_23 = arith.constant dense<0.000000e+00> : vector<8x32xf32>
    %48 = tpu.matmul %45, %47, %cst_23 {dimension_numbers = #tpu.dot_dimension_numbers<[1], [0], [0], [1], [0, 0, 1, 1], [], []>} : vector<8x8xbf16>, vector<8x32xbf16>, vector<8x32xf32> -> vector<8x32xf32>
    %49 = arith.addf %21, %48 : vector<8x32xf32>
    %50 = vector.extract_strided_slice %11 {offsets = [0, 8], sizes = [8, 8], strides = [1, 1]} : vector<8x32xf32> to vector<8x8xf32>
    %51 = vector.extract_strided_slice %17 {offsets = [0, 8], sizes = [8, 8], strides = [1, 1]} : vector<8x64xf32> to vector<8x8xf32>
    %52 = vector.extract_strided_slice %17 {offsets = [0, 40], sizes = [8, 8], strides = [1, 1]} : vector<8x64xf32> to vector<8x8xf32>
    %53 = arith.truncf %50 : vector<8x8xf32> to vector<8x8xbf16>
    %54 = arith.truncf %51 : vector<8x8xf32> to vector<8x8xbf16>
    %cst_24 = arith.constant dense<0.000000e+00> : vector<8x8xf32>
    %55 = tpu.matmul %53, %54, %cst_24 {dimension_numbers = #tpu.dot_dimension_numbers<[1], [1], [0], [0], [0, 0, 1, 0], [], []>} : vector<8x8xbf16>, vector<8x8xbf16>, vector<8x8xf32> -> vector<8x8xf32>
    %cst_25 = arith.constant 0.353553385 : f32
    %56 = vector.broadcast %cst_25 : f32 to vector<8x8xf32>
    %57 = arith.mulf %55, %56 : vector<8x8xf32>
    %cst_26 = arith.constant -1.000000e+09 : f32
    %58 = vector.broadcast %cst_26 : f32 to vector<8x8xf32>
    %59 = arith.select %20, %57, %58 : vector<8x8xi1>, vector<8x8xf32>
    %cst_27 = arith.constant dense<0xFF800000> : vector<8xf32>
    %60 = vector.multi_reduction <maximumf>, %59, %cst_27 [1] : vector<8x8xf32> to vector<8xf32>
    %61 = vector.shape_cast %60 : vector<8xf32> to vector<8x1xf32>
    %62 = vector.broadcast %61 : vector<8x1xf32> to vector<8x8xf32>
    %63 = arith.subf %59, %62 : vector<8x8xf32>
    %64 = math.exp %63 : vector<8x8xf32>
    %cst_28 = arith.constant dense<0.000000e+00> : vector<8xf32>
    %65 = vector.multi_reduction <add>, %64, %cst_28 [1] : vector<8x8xf32> to vector<8xf32>
    %66 = vector.shape_cast %65 : vector<8xf32> to vector<8x1xf32>
    %67 = tpu.reciprocal %66 {approx = true} : vector<8x1xf32> -> vector<8x1xf32>
    %68 = vector.broadcast %67 : vector<8x1xf32> to vector<8x8xf32>
    %69 = arith.mulf %64, %68 : vector<8x8xf32>
    %70 = arith.truncf %69 : vector<8x8xf32> to vector<8x8xbf16>
    %71 = arith.truncf %52 : vector<8x8xf32> to vector<8x8xbf16>
    %cst_29 = arith.constant dense<0.000000e+00> : vector<8x8xf32>
    %72 = tpu.matmul %70, %71, %cst_29 {dimension_numbers = #tpu.dot_dimension_numbers<[1], [0], [0], [1], [0, 0, 1, 1], [], []>} : vector<8x8xbf16>, vector<8x8xbf16>, vector<8x8xf32> -> vector<8x8xf32>
    %73 = arith.truncf %72 : vector<8x8xf32> to vector<8x8xbf16>
    %c8 = arith.constant 8 : index
    %c0_30 = arith.constant 0 : index
    %74 = vector.load %arg8[%c8, %c0_30] : memref<32x32xf32, #tpu.memory_space<vmem>>, vector<8x32xf32>
    %75 = arith.truncf %74 : vector<8x32xf32> to vector<8x32xbf16>
    %cst_31 = arith.constant dense<0.000000e+00> : vector<8x32xf32>
    %76 = tpu.matmul %73, %75, %cst_31 {dimension_numbers = #tpu.dot_dimension_numbers<[1], [0], [0], [1], [0, 0, 1, 1], [], []>} : vector<8x8xbf16>, vector<8x32xbf16>, vector<8x32xf32> -> vector<8x32xf32>
    %77 = arith.addf %49, %76 : vector<8x32xf32>
    %78 = vector.extract_strided_slice %11 {offsets = [0, 16], sizes = [8, 8], strides = [1, 1]} : vector<8x32xf32> to vector<8x8xf32>
    %79 = vector.extract_strided_slice %17 {offsets = [0, 16], sizes = [8, 8], strides = [1, 1]} : vector<8x64xf32> to vector<8x8xf32>
    %80 = vector.extract_strided_slice %17 {offsets = [0, 48], sizes = [8, 8], strides = [1, 1]} : vector<8x64xf32> to vector<8x8xf32>
    %81 = arith.truncf %78 : vector<8x8xf32> to vector<8x8xbf16>
    %82 = arith.truncf %79 : vector<8x8xf32> to vector<8x8xbf16>
    %cst_32 = arith.constant dense<0.000000e+00> : vector<8x8xf32>
    %83 = tpu.matmul %81, %82, %cst_32 {dimension_numbers = #tpu.dot_dimension_numbers<[1], [1], [0], [0], [0, 0, 1, 0], [], []>} : vector<8x8xbf16>, vector<8x8xbf16>, vector<8x8xf32> -> vector<8x8xf32>
    %cst_33 = arith.constant 0.353553385 : f32
    %84 = vector.broadcast %cst_33 : f32 to vector<8x8xf32>
    %85 = arith.mulf %83, %84 : vector<8x8xf32>
    %cst_34 = arith.constant -1.000000e+09 : f32
    %86 = vector.broadcast %cst_34 : f32 to vector<8x8xf32>
    %87 = arith.select %20, %85, %86 : vector<8x8xi1>, vector<8x8xf32>
    %cst_35 = arith.constant dense<0xFF800000> : vector<8xf32>
    %88 = vector.multi_reduction <maximumf>, %87, %cst_35 [1] : vector<8x8xf32> to vector<8xf32>
    %89 = vector.shape_cast %88 : vector<8xf32> to vector<8x1xf32>
    %90 = vector.broadcast %89 : vector<8x1xf32> to vector<8x8xf32>
    %91 = arith.subf %87, %90 : vector<8x8xf32>
    %92 = math.exp %91 : vector<8x8xf32>
    %cst_36 = arith.constant dense<0.000000e+00> : vector<8xf32>
    %93 = vector.multi_reduction <add>, %92, %cst_36 [1] : vector<8x8xf32> to vector<8xf32>
    %94 = vector.shape_cast %93 : vector<8xf32> to vector<8x1xf32>
    %95 = tpu.reciprocal %94 {approx = true} : vector<8x1xf32> -> vector<8x1xf32>
    %96 = vector.broadcast %95 : vector<8x1xf32> to vector<8x8xf32>
    %97 = arith.mulf %92, %96 : vector<8x8xf32>
    %98 = arith.truncf %97 : vector<8x8xf32> to vector<8x8xbf16>
    %99 = arith.truncf %80 : vector<8x8xf32> to vector<8x8xbf16>
    %cst_37 = arith.constant dense<0.000000e+00> : vector<8x8xf32>
    %100 = tpu.matmul %98, %99, %cst_37 {dimension_numbers = #tpu.dot_dimension_numbers<[1], [0], [0], [1], [0, 0, 1, 1], [], []>} : vector<8x8xbf16>, vector<8x8xbf16>, vector<8x8xf32> -> vector<8x8xf32>
    %101 = arith.truncf %100 : vector<8x8xf32> to vector<8x8xbf16>
    %c16 = arith.constant 16 : index
    %c0_38 = arith.constant 0 : index
    %102 = vector.load %arg8[%c16, %c0_38] : memref<32x32xf32, #tpu.memory_space<vmem>>, vector<8x32xf32>
    %103 = arith.truncf %102 : vector<8x32xf32> to vector<8x32xbf16>
    %cst_39 = arith.constant dense<0.000000e+00> : vector<8x32xf32>
    %104 = tpu.matmul %101, %103, %cst_39 {dimension_numbers = #tpu.dot_dimension_numbers<[1], [0], [0], [1], [0, 0, 1, 1], [], []>} : vector<8x8xbf16>, vector<8x32xbf16>, vector<8x32xf32> -> vector<8x32xf32>
    %105 = arith.addf %77, %104 : vector<8x32xf32>
    %106 = vector.extract_strided_slice %11 {offsets = [0, 24], sizes = [8, 8], strides = [1, 1]} : vector<8x32xf32> to vector<8x8xf32>
    %107 = vector.extract_strided_slice %17 {offsets = [0, 24], sizes = [8, 8], strides = [1, 1]} : vector<8x64xf32> to vector<8x8xf32>
    %108 = vector.extract_strided_slice %17 {offsets = [0, 56], sizes = [8, 8], strides = [1, 1]} : vector<8x64xf32> to vector<8x8xf32>
    %109 = arith.truncf %106 : vector<8x8xf32> to vector<8x8xbf16>
    %110 = arith.truncf %107 : vector<8x8xf32> to vector<8x8xbf16>
    %cst_40 = arith.constant dense<0.000000e+00> : vector<8x8xf32>
    %111 = tpu.matmul %109, %110, %cst_40 {dimension_numbers = #tpu.dot_dimension_numbers<[1], [1], [0], [0], [0, 0, 1, 0], [], []>} : vector<8x8xbf16>, vector<8x8xbf16>, vector<8x8xf32> -> vector<8x8xf32>
    %cst_41 = arith.constant 0.353553385 : f32
    %112 = vector.broadcast %cst_41 : f32 to vector<8x8xf32>
    %113 = arith.mulf %111, %112 : vector<8x8xf32>
    %cst_42 = arith.constant -1.000000e+09 : f32
    %114 = vector.broadcast %cst_42 : f32 to vector<8x8xf32>
    %115 = arith.select %20, %113, %114 : vector<8x8xi1>, vector<8x8xf32>
    %cst_43 = arith.constant dense<0xFF800000> : vector<8xf32>
    %116 = vector.multi_reduction <maximumf>, %115, %cst_43 [1] : vector<8x8xf32> to vector<8xf32>
    %117 = vector.shape_cast %116 : vector<8xf32> to vector<8x1xf32>
    %118 = vector.broadcast %117 : vector<8x1xf32> to vector<8x8xf32>
    %119 = arith.subf %115, %118 : vector<8x8xf32>
    %120 = math.exp %119 : vector<8x8xf32>
    %cst_44 = arith.constant dense<0.000000e+00> : vector<8xf32>
    %121 = vector.multi_reduction <add>, %120, %cst_44 [1] : vector<8x8xf32> to vector<8xf32>
    %122 = vector.shape_cast %121 : vector<8xf32> to vector<8x1xf32>
    %123 = tpu.reciprocal %122 {approx = true} : vector<8x1xf32> -> vector<8x1xf32>
    %124 = vector.broadcast %123 : vector<8x1xf32> to vector<8x8xf32>
    %125 = arith.mulf %120, %124 : vector<8x8xf32>
    %126 = arith.truncf %125 : vector<8x8xf32> to vector<8x8xbf16>
    %127 = arith.truncf %108 : vector<8x8xf32> to vector<8x8xbf16>
    %cst_45 = arith.constant dense<0.000000e+00> : vector<8x8xf32>
    %128 = tpu.matmul %126, %127, %cst_45 {dimension_numbers = #tpu.dot_dimension_numbers<[1], [0], [0], [1], [0, 0, 1, 1], [], []>} : vector<8x8xbf16>, vector<8x8xbf16>, vector<8x8xf32> -> vector<8x8xf32>
    %129 = arith.truncf %128 : vector<8x8xf32> to vector<8x8xbf16>
    %c24 = arith.constant 24 : index
    %c0_46 = arith.constant 0 : index
    %130 = vector.load %arg8[%c24, %c0_46] : memref<32x32xf32, #tpu.memory_space<vmem>>, vector<8x32xf32>
    %131 = arith.truncf %130 : vector<8x32xf32> to vector<8x32xbf16>
    %cst_47 = arith.constant dense<0.000000e+00> : vector<8x32xf32>
    %132 = tpu.matmul %129, %131, %cst_47 {dimension_numbers = #tpu.dot_dimension_numbers<[1], [0], [0], [1], [0, 0, 1, 1], [], []>} : vector<8x8xbf16>, vector<8x32xbf16>, vector<8x32xf32> -> vector<8x32xf32>
    %133 = arith.addf %105, %132 : vector<8x32xf32>
    %134 = arith.addf %3, %133 : vector<8x32xf32>
    %c0_48 = arith.constant 0 : index
    %c0_49 = arith.constant 0 : index
    %135 = vector.load %arg9[%c0_48, %c0_49] : memref<1x32xf32, #tpu.memory_space<vmem>>, vector<1x32xf32>
    %136 = vector.broadcast %135 : vector<1x32xf32> to vector<8x32xf32>
    %137 = arith.addf %134, %136 : vector<8x32xf32>
    %c0_50 = arith.constant 0 : index
    %c0_51 = arith.constant 0 : index
    %138 = vector.load %arg10[%c0_50, %c0_51] : memref<1x32xf32, #tpu.memory_space<vmem>>, vector<1x32xf32>
    %c0_52 = arith.constant 0 : index
    %c0_53 = arith.constant 0 : index
    %139 = vector.load %arg11[%c0_52, %c0_53] : memref<1x32xf32, #tpu.memory_space<vmem>>, vector<1x32xf32>
    %cst_54 = arith.constant dense<0.000000e+00> : vector<8xf32>
    %140 = vector.multi_reduction <add>, %137, %cst_54 [1] : vector<8x32xf32> to vector<8xf32>
    %141 = vector.shape_cast %140 : vector<8xf32> to vector<8x1xf32>
    %cst_55 = arith.constant 3.200000e+01 : f32
    %142 = vector.broadcast %cst_55 : f32 to vector<8x1xf32>
    %143 = arith.divf %141, %142 : vector<8x1xf32>
    %144 = vector.broadcast %143 : vector<8x1xf32> to vector<8x32xf32>
    %145 = arith.subf %137, %144 : vector<8x32xf32>
    %146 = arith.mulf %145, %145 : vector<8x32xf32>
    %cst_56 = arith.constant dense<0.000000e+00> : vector<8xf32>
    %147 = vector.multi_reduction <add>, %146, %cst_56 [1] : vector<8x32xf32> to vector<8xf32>
    %148 = vector.shape_cast %147 : vector<8xf32> to vector<8x1xf32>
    %cst_57 = arith.constant 3.200000e+01 : f32
    %149 = vector.broadcast %cst_57 : f32 to vector<8x1xf32>
    %150 = arith.divf %148, %149 : vector<8x1xf32>
    %151 = vector.broadcast %143 : vector<8x1xf32> to vector<8x32xf32>
    %152 = arith.subf %137, %151 : vector<8x32xf32>
    %cst_58 = arith.constant 9.99999974E-6 : f32
    %153 = vector.broadcast %cst_58 : f32 to vector<8x1xf32>
    %154 = arith.addf %150, %153 : vector<8x1xf32>
    %155 = math.rsqrt %154 : vector<8x1xf32>
    %156 = vector.broadcast %155 : vector<8x1xf32> to vector<8x32xf32>
    %157 = arith.mulf %152, %156 : vector<8x32xf32>
    %158 = vector.broadcast %138 : vector<1x32xf32> to vector<8x32xf32>
    %159 = arith.mulf %157, %158 : vector<8x32xf32>
    %160 = vector.broadcast %139 : vector<1x32xf32> to vector<8x32xf32>
    %161 = arith.addf %159, %160 : vector<8x32xf32>
    %c0_59 = arith.constant 0 : index
    %c0_60 = arith.constant 0 : index
    %c0_61 = arith.constant 0 : index
    %162 = vector.load %arg12[%c0_59, %c0_60, %c0_61] : memref<1x8x32xf32, #tpu.memory_space<vmem>>, vector<1x8x32xf32>
    %163 = vector.shape_cast %162 : vector<1x8x32xf32> to vector<8x32xf32>
    %164 = vector.shape_cast %161 : vector<8x32xf32> to vector<1x8x32xf32>
    tpu.vector_store %arg12[%c0_59, %c0_60, %c0_61], %164 {strides = array<i32>} : memref<1x8x32xf32, #tpu.memory_space<vmem>>, vector<1x8x32xf32>,
    return
  }
  func.func @transform_0(%arg0: i32, %arg1: memref<2xi32, #tpu.memory_space<smem>>) -> (i32, i32, i32) {
    %c0_i32 = arith.constant 0 : i32
    %c0_i32_0 = arith.constant 0 : i32
    %c0_i32_1 = arith.constant 0 : i32
    return %arg0, %c0_i32, %c0_i32_0 : i32, i32, i32
  }
  func.func @transform_1(%arg0: i32, %arg1: memref<2xi32, #tpu.memory_space<smem>>) -> (i32, i32, i32) {
    %c0_i32 = arith.constant 0 : i32
    %c0_i32_0 = arith.constant 0 : i32
    %c0_i32_1 = arith.constant 0 : i32
    return %arg0, %c0_i32, %c0_i32_0 : i32, i32, i32
  }
  func.func @transform_2(%arg0: i32, %arg1: memref<2xi32, #tpu.memory_space<smem>>) -> (i32, i32) {
    %c0_i32 = arith.constant 0 : i32
    %c0_i32_0 = arith.constant 0 : i32
    %c0_i32_1 = arith.constant 0 : i32
    return %c0_i32, %c0_i32_0 : i32, i32
  }
  func.func @transform_3(%arg0: i32, %arg1: memref<2xi32, #tpu.memory_space<smem>>) -> (i32, i32) {
    %c0_i32 = arith.constant 0 : i32
    %c0_i32_0 = arith.constant 0 : i32
    %c0_i32_1 = arith.constant 0 : i32
    return %c0_i32, %c0_i32_0 : i32, i32
  }
  func.func @transform_4(%arg0: i32, %arg1: memref<2xi32, #tpu.memory_space<smem>>) -> (i32, i32) {
    %c0_i32 = arith.constant 0 : i32
    %c0_i32_0 = arith.constant 0 : i32
    %c0_i32_1 = arith.constant 0 : i32
    return %c0_i32, %c0_i32_0 : i32, i32
  }
  func.func @transform_5(%arg0: i32, %arg1: memref<2xi32, #tpu.memory_space<smem>>) -> (i32, i32) {
    %c0_i32 = arith.constant 0 : i32
    %c0_i32_0 = arith.constant 0 : i32
    %c0_i32_1 = arith.constant 0 : i32
    return %c0_i32, %c0_i32_0 : i32, i32
  }
  func.func @transform_6(%arg0: i32, %arg1: memref<2xi32, #tpu.memory_space<smem>>) -> (i32, i32) {
    %c0_i32 = arith.constant 0 : i32
    %c0_i32_0 = arith.constant 0 : i32
    %c0_i32_1 = arith.constant 0 : i32
    return %c0_i32, %c0_i32_0 : i32, i32
  }
  func.func @transform_7(%arg0: i32, %arg1: memref<2xi32, #tpu.memory_space<smem>>) -> (i32, i32) {
    %c0_i32 = arith.constant 0 : i32
    %c0_i32_0 = arith.constant 0 : i32
    %c0_i32_1 = arith.constant 0 : i32
    return %c0_i32, %c0_i32_0 : i32, i32
  }
  func.func @transform_8(%arg0: i32, %arg1: memref<2xi32, #tpu.memory_space<smem>>) -> (i32, i32) {
    %c0_i32 = arith.constant 0 : i32
    %c0_i32_0 = arith.constant 0 : i32
    %c0_i32_1 = arith.constant 0 : i32
    return %c0_i32, %c0_i32_0 : i32, i32
  }
  func.func @transform_9(%arg0: i32, %arg1: memref<2xi32, #tpu.memory_space<smem>>) -> (i32, i32) {
    %c0_i32 = arith.constant 0 : i32
    %c0_i32_0 = arith.constant 0 : i32
    %c0_i32_1 = arith.constant 0 : i32
    return %c0_i32, %c0_i32_0 : i32, i32
  }
  func.func @transform_10(%arg0: i32, %arg1: memref<2xi32, #tpu.memory_space<smem>>) -> (i32, i32, i32) {
    %c0_i32 = arith.constant 0 : i32
    %c0_i32_0 = arith.constant 0 : i32
    %c0_i32_1 = arith.constant 0 : i32
    return %arg0, %c0_i32, %c0_i32_0 : i32, i32, i32
  }
}

module attributes {stable_mosaic.version = 11 : i64} {
  func.func @kernel(%arg0: memref<16x32xf32, #tpu.memory_space<vmem>>, %arg1: memref<64x32xf32, #tpu.memory_space<vmem>>, %arg2: memref<16x1xi32, #tpu.memory_space<vmem>>, %arg3: memref<1x1xf32, #tpu.memory_space<vmem>>, %arg4: memref<1x1xf32, #tpu.memory_space<vmem>>) attributes {dimension_semantics = [], scalar_prefetch = 0 : i64, scratch_operands = 0 : i64, tpu.core_type = #tpu.core_type<tc>} {
    %c0 = arith.constant 0 : index
    %c0_0 = arith.constant 0 : index
    %0 = vector.load %arg0[%c0, %c0_0] : memref<16x32xf32, #tpu.memory_space<vmem>>, vector<16x32xf32>
    %c0_1 = arith.constant 0 : index
    %c0_2 = arith.constant 0 : index
    %1 = vector.load %arg1[%c0_1, %c0_2] : memref<64x32xf32, #tpu.memory_space<vmem>>, vector<64x32xf32>
    %cst = arith.constant dense<0.000000e+00> : vector<16x64xf32>
    %2 = tpu.matmul %0, %1, %cst {dimension_numbers = #tpu.dot_dimension_numbers<[1], [1], [0], [0], [0, 0, 1, 0], [], []>} : vector<16x32xf32>, vector<64x32xf32>, vector<16x64xf32> -> vector<16x64xf32>
    %c0_3 = arith.constant 0 : index
    %c0_4 = arith.constant 0 : index
    %3 = vector.load %arg2[%c0_3, %c0_4] : memref<16x1xi32, #tpu.memory_space<vmem>>, vector<16x1xi32>
    %4 = tpu.iota {dimensions = array<i32: 1>} : vector<16x64xi32>
    %5 = vector.broadcast %3 : vector<16x1xi32> to vector<16x64xi32>
    %6 = arith.cmpi eq, %4, %5 : vector<16x64xi32>
    %cst_5 = arith.constant dense<0xFF800000> : vector<16xf32>
    %7 = vector.multi_reduction <maximumf>, %2, %cst_5 [1] : vector<16x64xf32> to vector<16xf32>
    %8 = vector.shape_cast %7 : vector<16xf32> to vector<16x1xf32>
    %9 = vector.broadcast %8 : vector<16x1xf32> to vector<16x64xf32>
    %10 = arith.subf %2, %9 : vector<16x64xf32>
    %11 = math.exp %10 : vector<16x64xf32>
    %cst_6 = arith.constant dense<0.000000e+00> : vector<16xf32>
    %12 = vector.multi_reduction <add>, %11, %cst_6 [1] : vector<16x64xf32> to vector<16xf32>
    %13 = vector.shape_cast %12 : vector<16xf32> to vector<16x1xf32>
    %14 = math.log %13 : vector<16x1xf32>
    %15 = vector.broadcast %14 : vector<16x1xf32> to vector<16x64xf32>
    %16 = arith.subf %10, %15 : vector<16x64xf32>
    %cst_7 = arith.constant 0.000000e+00 : f32
    %17 = vector.broadcast %cst_7 : f32 to vector<16x64xf32>
    %18 = arith.select %6, %16, %17 : vector<16x64xi1>, vector<16x64xf32>
    %cst_8 = arith.constant dense<0.000000e+00> : vector<16xf32>
    %19 = vector.multi_reduction <add>, %18, %cst_8 [1] : vector<16x64xf32> to vector<16xf32>
    %20 = vector.shape_cast %19 : vector<16xf32> to vector<16x1xf32>
    %cst_9 = arith.constant 0.000000e+00 : f32
    %21 = vector.broadcast %cst_9 : f32 to vector<16x1xf32>
    %22 = arith.subf %21, %20 : vector<16x1xf32>
    %cst_10 = arith.constant dense<0.000000e+00> : vector<16xf32>
    %23 = vector.multi_reduction <add>, %16, %cst_10 [1] : vector<16x64xf32> to vector<16xf32>
    %24 = vector.shape_cast %23 : vector<16xf32> to vector<16x1xf32>
    %cst_11 = arith.constant 6.400000e+01 : f32
    %25 = vector.broadcast %cst_11 : f32 to vector<16x1xf32>
    %26 = arith.divf %24, %25 : vector<16x1xf32>
    %cst_12 = arith.constant 0.000000e+00 : f32
    %27 = vector.broadcast %cst_12 : f32 to vector<16x1xf32>
    %28 = arith.subf %27, %26 : vector<16x1xf32>
    %c-100_i32 = arith.constant -100 : i32
    %29 = vector.broadcast %c-100_i32 : i32 to vector<16x1xi32>
    %30 = arith.cmpi ne, %3, %29 : vector<16x1xi32>
    %31 = arith.extui %30 : vector<16x1xi1> to vector<16x1xi32>
    %32 = arith.sitofp %31 : vector<16x1xi32> to vector<16x1xf32>
    %cst_13 = arith.constant 0.899999976 : f32
    %33 = vector.broadcast %cst_13 : f32 to vector<16x1xf32>
    %34 = arith.mulf %33, %22 : vector<16x1xf32>
    %cst_14 = arith.constant 1.000000e-01 : f32
    %35 = vector.broadcast %cst_14 : f32 to vector<16x1xf32>
    %36 = arith.mulf %35, %28 : vector<16x1xf32>
    %37 = arith.addf %34, %36 : vector<16x1xf32>
    %38 = arith.mulf %32, %37 : vector<16x1xf32>
    %39 = vector.broadcast %8 : vector<16x1xf32> to vector<16x64xf32>
    %40 = arith.cmpf oeq, %2, %39 : vector<16x64xf32>
    %c64_i32 = arith.constant 64 : i32
    %41 = vector.broadcast %c64_i32 : i32 to vector<16x64xi32>
    %42 = arith.select %40, %4, %41 : vector<16x64xi1>, vector<16x64xi32>
    %cst_15 = arith.constant dense<2147483647> : vector<16xi32>
    %43 = vector.multi_reduction <minsi>, %42, %cst_15 [1] : vector<16x64xi32> to vector<16xi32>
    %44 = vector.shape_cast %43 : vector<16xi32> to vector<16x1xi32>
    %45 = arith.cmpi eq, %44, %3 : vector<16x1xi32>
    %46 = arith.extui %45 : vector<16x1xi1> to vector<16x1xi32>
    %47 = arith.sitofp %46 : vector<16x1xi32> to vector<16x1xf32>
    %48 = arith.mulf %32, %47 : vector<16x1xf32>
    %cst_16 = arith.constant dense<0.000000e+00> : vector<1xf32>
    %49 = vector.multi_reduction <add>, %38, %cst_16 [0] : vector<16x1xf32> to vector<1xf32>
    %50 = vector.shape_cast %49 : vector<1xf32> to vector<1x1xf32>
    %cst_17 = arith.constant 2.000000e+00 : f32
    %51 = vector.broadcast %cst_17 : f32 to vector<1x1xf32>
    %52 = arith.divf %50, %51 : vector<1x1xf32>
    %c0_18 = arith.constant 0 : index
    %c0_19 = arith.constant 0 : index
    %53 = vector.load %arg3[%c0_18, %c0_19] : memref<1x1xf32, #tpu.memory_space<vmem>>, vector<1x1xf32>
    tpu.vector_store %arg3[%c0_18, %c0_19], %52 {strides = array<i32>} : memref<1x1xf32, #tpu.memory_space<vmem>>, vector<1x1xf32>,
    %cst_20 = arith.constant dense<0.000000e+00> : vector<1xf32>
    %54 = vector.multi_reduction <add>, %48, %cst_20 [0] : vector<16x1xf32> to vector<1xf32>
    %55 = vector.shape_cast %54 : vector<1xf32> to vector<1x1xf32>
    %cst_21 = arith.constant dense<0.000000e+00> : vector<1xf32>
    %56 = vector.multi_reduction <add>, %32, %cst_21 [0] : vector<16x1xf32> to vector<1xf32>
    %57 = vector.shape_cast %56 : vector<1xf32> to vector<1x1xf32>
    %cst_22 = arith.constant 1.000000e+00 : f32
    %58 = vector.broadcast %cst_22 : f32 to vector<1x1xf32>
    %59 = arith.maximumf %57, %58 : vector<1x1xf32>
    %60 = arith.divf %55, %59 : vector<1x1xf32>
    %c0_23 = arith.constant 0 : index
    %c0_24 = arith.constant 0 : index
    %61 = vector.load %arg4[%c0_23, %c0_24] : memref<1x1xf32, #tpu.memory_space<vmem>>, vector<1x1xf32>
    tpu.vector_store %arg4[%c0_23, %c0_24], %60 {strides = array<i32>} : memref<1x1xf32, #tpu.memory_space<vmem>>, vector<1x1xf32>,
    return
  }
}

</mosaic_0001>

<bundles_post_ra>
// kernel: model_forward.12
= control target key start
LH: loop header
LB: loop body
LE: loop exit
PB: predicated region body
PF: predicated region fallthrough
CT: control target
= control target key end

     0   :  { %v290_v0 = vmov 0.0   ;;  %vm291_vm0 = vmmov 0   ;;  %vm53_vm1 = vcmask 261120   ;;  %vm140_vm2 = vcmask 523264   ;;  %s381_s1 = inlined_call_operand.vmem [shape: bf16[32,64], index: 1, kind: input, shape index: {}]   ;;  %s382_s0 = inlined_call_operand.vmem [shape: f32[16,32], index: 0, kind: input, shape index: {}]   ;;  %s383_s3 = inlined_call_operand.vmem [shape: bf16[64,32], index: 3, kind: input, shape index: {}]   ;;  %s384_s2 = inlined_call_operand.vmem [shape: f32[1,64], index: 2, kind: input, shape index: {}]   ;;  %s385_s4 = inlined_call_operand.vmem [shape: f32[1,32], index: 4, kind: input, shape index: {}]   ;;  %s386_s5 = inlined_call_operand.vmem [shape: f32[1,32], index: 5, kind: input, shape index: {}]   ;;  %s387_s6 = inlined_call_operand.vmem [shape: f32[1,32], index: 6, kind: input, shape index: {}]   ;;  %s388_s7 = inlined_call_operand.vmem [shape: f32[16,32], index: 7, kind: output, shape index: {}]  }
   0x1   :  { %258 = vmatprep.subr.bf16.mxu0 %v290_v0  ;;  %v280_v1 = vld [vmem:[%s381_s1] sm:$0xff]   ;;  %262 = vmatprep.mubr.msk.bf16.mxu0 %vm291_vm0, %v290_v0  ;;  %v281_v2 = vld [vmem:[%s381_s1 + $0x8] sm:$0xff]   ;;  %v284_v8 = vld [vmem:[%s383_s3 + $0x10] sm:$0xff]  }
   0x2   :  { %266 = vmatprep.subr.bf16.mxu1 %v290_v0  ;;  %274 = vmatprep.mubr.msk.bf16.mxu1 %vm291_vm0, %v290_v0  ;;  %v27_v3 = vld [vmem:[%s382_s0] sm:$0xff]  ;;  %v28_v4 = vld [vmem:[%s382_s0 + $0x8] sm:$0xff]  ;;  %v285_v9 = vld [vmem:[%s383_s3 + $0x18] sm:$0xff]  }
   0x3   :  { %259 = vmatpush3.bf16.msra.mxu0 %v280_v1  ;;  %v282_v5 = vld [vmem:[%s383_s3] sm:$0xff]   ;;  %v283_v6 = vld [vmem:[%s383_s3 + $0x8] sm:$0xff]   ;;  %v29_v7 = vpack.c.bf16 %v28_v4, %v27_v3 }
   0x4   :  { %260 = vmatprep.subr.bf16.mxu0 %v290_v0  ;;  %267 = vmatpush3.bf16.msra.mxu1 %v282_v5  ;;  %v238_v10 = vld [vmem:[%s384_s2] ss:$0 sm:$0xff] }
   0x5   :  { %268 = vmatprep.subr.bf16.mxu1 %v290_v0  ;;  %v242_v20 = vld [vmem:[%s385_s4] ss:$0 sm:$0xff] }
   0x6   :  { %v248_v48 = vld [vmem:[%s386_s5] ss:$0 sm:$0xff] }
   0x7   :  { %261 = vmatpush3.bf16.msra.mxu0 %v281_v2  ;;  %v249_v50 = vld [vmem:[%s387_s6] ss:$0 sm:$0xff] }
   0x8   :  { %269 = vmatpush3.bf16.msra.mxu1 %v283_v6 }
   0x9   :  { %270 = vmatprep.subr.bf16.mxu1 %v290_v0 }
   0xa   :  { %263 = vmatmul.mubr.msk.bf16.vlgmr.msra.gmra.mrb[0].mxu0 %vm53_vm1, %v29_v7 }
   0xc   :  { %271 = vmatpush3.bf16.msra.mxu1 %v284_v8 }
   0xd   :  { %272 = vmatprep.subr.bf16.mxu1 %v290_v0 }
  0x10   :  { %273 = vmatpush3.bf16.msra.mxu1 %v285_v9 }
  0xdd   :  { %v91_v11 = vpop.f32.mrb[0].mxu0 }
  0xde   :  { %v92_v12 = vadd.f32 %v238_v10, %v91_v11  ;;  %v264_v13 = vpop.f32.mrb[1].mxu0 }
  0xdf   :  { %v94_v14 = vpop.f32.mrb[2].mxu0 }
  0xe0   :  { %v95_v15 = vadd.f32 %v238_v10, %v94_v14  ;;  %v265_v16 = vpop.f32.mrb[3].mxu0  ;;  %v98_v17 = vmax.f32 %v92_v12, 0.0 }
  0xe2   :  { %v99_v18 = vmax.f32 %v95_v15, 0.0 }
  0xe4   :  { %v100_v19 = vpack.c.bf16 %v99_v18, %v98_v17 }
  0xe6   :  { %275 = vmatmul.mubr.msk.bf16.vlgmr.msra.gmra.mrb[0].mxu1 %vm140_vm2, %v100_v19 }
 0x1b9   :  { %v178_v21 = vpop.f32.mrb[0].mxu1 }
 0x1ba   :  { %v179_v22 = vadd.f32 %v242_v20, %v178_v21  ;;  %v276_v23 = vpop.f32.mrb[1].mxu1 }
 0x1bb   :  { %v181_v24 = vpop.f32.mrb[2].mxu1 }
 0x1bc   :  { %v182_v25 = vadd.f32 %v242_v20, %v181_v24  ;;  %v277_v26 = vpop.f32.mrb[3].mxu1  ;;  %v185_v27 = vadd.f32 %v179_v22, %v27_v3 }
 0x1be   :  { %v189_v28 = vsel %vm53_vm1, %v185_v27, 0.0  ;;  %v186_v29 = vadd.f32 %v182_v25, %v28_v4 }
 0x1bf   :  { %190 = vadd.xlane.f32.xlu0 %v189_v28 }
 0x1c0   :  { %v192_v30 = vsel %vm53_vm1, %v186_v29, 0.0 }
 0x1c3   :  { %193 = vadd.xlane.f32.xlu0 %v192_v30 }
 0x24c   :  { %v191_v31 = vpop.xlane.xlu0 %190 }
 0x24d   :  { %v196_v32 = vmul.f32 0.03125, %v191_v31 }
 0x24f   :  { %v198_v33 = vsub.f32 %v185_v27, %v196_v32 }
 0x250   :  { %v194_v34 = vpop.xlane.xlu0 %193 }
 0x251   :  { %v197_v35 = vmul.f32 0.03125, %v194_v34  ;;  %v200_v36 = vmul.f32 %v198_v33, %v198_v33 }
 0x253   :  { %v199_v37 = vsub.f32 %v186_v29, %v197_v35  ;;  %v202_v38 = vsel %vm53_vm1, %v200_v36, 0.0 }
 0x254   :  { %203 = vadd.xlane.f32.xlu1 %v202_v38 }
 0x255   :  { %v201_v39 = vmul.f32 %v199_v37, %v199_v37 }
 0x257   :  { %v205_v40 = vsel %vm53_vm1, %v201_v39, 0.0 }
 0x258   :  { %206 = vadd.xlane.f32.xlu1 %v205_v40 }
 0x2e1   :  { %v204_v41 = vpop.xlane.xlu1 %203 }
 0x2e2   :  { %v208_v42 = vmul.f32 0.03125, %v204_v41 }
 0x2e4   :  { %v210_v43 = vadd.f32 1e-05, %v208_v42 }
 0x2e5   :  { %v207_v44 = vpop.xlane.xlu1 %206 }
 0x2e6   :  { %286 = vrsqrt.f32 %v210_v43  ;;  %v209_v45 = vmul.f32 0.03125, %v207_v44 }
 0x2e8   :  { %v211_v46 = vadd.f32 1e-05, %v209_v45 }
 0x2ea   :  { %288 = vrsqrt.f32 %v211_v46 }
 0x2f0   :  { %v287_v47 = vpop.eup %286 }
 0x2f1   :  { %v214_v49 = vmul.f32 %v287_v47, %v198_v33 }
 0x2f3   :  { %v222_v51 = vmul.f32 %v248_v48, %v214_v49 }
 0x2f4   :  { %v289_v52 = vpop.eup %288 }
 0x2f5   :  { %v230_v53 = vadd.f32 %v249_v50, %v222_v51  ;;  %v215_v54 = vmul.f32 %v289_v52, %v199_v37 }
 0x2f7   :  { %232 = vst.msk [vmem:[%s388_s7] sm:$0xff] %vm53_vm1, %v230_v53  ;;  %v223_v55 = vmul.f32 %v248_v48, %v215_v54 }
 0x2f9   :  { %v231_v56 = vadd.f32 %v249_v50, %v223_v55 }
 0x2fb   :  { %233 = vst.msk [vmem:[%s388_s7 + $0x8] sm:$0xff] %vm53_vm1, %v231_v56 }

// kernel: model_forward.11
= control target key start
LH: loop header
LB: loop body
LE: loop exit
PB: predicated region body
PF: predicated region fallthrough
CT: control target
= control target key end

     0   :  { %s1527_s0 = inlined_call_operand.vmem [shape: s32[2], index: 0, kind: input, shape index: {}]   ;;  %s1528_s1 = inlined_call_operand.vmem [shape: f32[2,8,32], index: 1, kind: input, shape index: {}]   ;;  %s1529_s2 = inlined_call_operand.vmem [shape: bf16[32,96], index: 2, kind: input, shape index: {}]   ;;  %s1530_s3 = inlined_call_operand.vmem [shape: f32[1,96], index: 3, kind: input, shape index: {}]   ;;  %s1531_s4 = inlined_call_operand.vmem [shape: f32[32,32], index: 4, kind: input, shape index: {}]   ;;  %s1532_s5 = inlined_call_operand.vmem [shape: f32[1,32], index: 5, kind: input, shape index: {}]   ;;  %s1533_s6 = inlined_call_operand.vmem [shape: f32[1,32], index: 6, kind: input, shape index: {}]   ;;  %s1534_s7 = inlined_call_operand.vmem [shape: f32[1,32], index: 7, kind: input, shape index: {}]   ;;  %s1535_s8 = inlined_call_operand.vmem [shape: f32[2,8,32], index: 8, kind: output, shape index: {}]  }
   0x1   :  { %s13_s29 = sshll.u32 %s1527_s0, 4  ;;  %s14_s29 = int_to_ptr.vmem [resolvable:$true] %s13_s29 }
   0x2   :  { %s1274_s30 = scalar_lea.vmem %s14_s29, 16  ;;  %p1279_p1 = scmp.lt.s32.totalorder %s14_s29, %s14_s29 }
   0x3   :  { %p1275_p0 = scmp.ne.s32.totalorder %s14_s29, %s1274_s30  ;;  %p1280_p2 = scmp.lt.s32.totalorder %s1274_s30, %s1274_s30 }
   0x5   :  { %p1281_p3 = por %p1280_p2, %p1279_p1 }
   0x7   :  { %p1282_p4 = pnand %p1281_p3, %p1275_p0 }
   0x9   :  { %1285 = shalt.err (!%p1282_p4)  }
   0xa   :  { %s1296_s9 = smov [#allocation3]  }
   0xb   :  { %16 = dma.vmem_to_smem %s14_s29, 16, %s1296_s9, [#allocation2] }
   0xc   :  { %1290 = dma.done.wait [#allocation2], 16 }
   0xd   :  { %1291 = vsyncadd [#allocation2], 4294967280 }
   0xe   :  { %18 = sfence }
   0xf   :  { %s1358_s10 = smov 0  }
  0x10 LB: > { %s1364_s0 = sadd.s32 4294967295, %s1294_s10   ;;  %p1101_p5 = scmp.ge.s32.totalorder %s1294_s10, 1  ;;  %s1294_s10 = sphi %s1358_s10, %s24_s10  }
  0x11   : > { %p243_p6 = scmp.lt.s32.totalorder %s1294_s10, 3 }
  0x13   : > { %p244_p7 = pnand %p1101_p5, %p243_p6 }
  0x14   : > { %v1254_v0 = vld [vmem:[%s1529_s2] sm:$0xff] (!%p244_p7)   ;;  %v1297_v1 = vmov (!%p244_p7), 0.0   ;;  %v1255_v2 = vld [vmem:[%s1529_s2 + $0x8] sm:$0xff] (!%p244_p7)   ;;  %vm1298_vm0 = vmmov (!%p244_p7), 0   ;;  %p273_p8 = scmp.lt.s32.totalorder (!%p244_p7), %s1364_s0, 1  ;;  %vm308_vm1 = vcmask (!%p244_p7), 261120   ;;  %v352_v17 = vlaneseq (!%p244_p7) }
  0x15   : > { %247 = sbr.rel (%p244_p7) target bundleno = 2951 (0xb87), region = 48  ;;  %1152 = vmatprep.subr.bf16.mxu0 (!%p244_p7), %v1297_v1  ;;  %1160 = vmatprep.subr.bf16.mxu1 (!%p244_p7), %v1297_v1  ;;  %v1104_v5 = vld [vmem:[%s1530_s3] ss:$0 sm:$0xff] (!%p244_p7)  ;;  %s1299_s22 = smov (!%p244_p7), 120   ;;  %vm360_vm2 = vcmask (!%p244_p7), 64512   ;;  %vm426_vm4 = vcmask (!%p244_p7), 1043456  }
  0x16   : > { %1153 = vmatpush3.bf16.msra.mxu0 (!%p244_p7), %v1254_v0  ;;  %1156 = vmatprep.mubr.msk.bf16.mxu0 (!%p244_p7), %vm1298_vm0, %v1297_v1  ;;  %s1300_s23 = smov (!%p244_p7), 96   ;;  %s1301_s24 = smov (!%p244_p7), 88   ;;  %v353_v18 = vand.u32 (!%p244_p7), 127, %v352_v17  ;;  %v471_v57 = vld [vmem:[%s1531_s4] sm:$0xff] (!%p244_p7)  ;;  %v586_v59 = vld [vmem:[%s1531_s4 + $0x8] sm:$0xff] (!%p244_p7)  ;;  %v955_v21 = vld [vmem:[%s1531_s4 + $0x18] sm:$0xff] (!%p244_p7) }
  0x17   : > { %1154 = vmatprep.subr.bf16.mxu0 (!%p244_p7), %v1297_v1  ;;  %1162 = vmatprep.mubr.msk.bf16.mxu1 (!%p244_p7), %vm1298_vm0, %v1297_v1  ;;  %s282_s25 = sld [smem:[#allocation3 + %s1364_s0]] (!%p244_p7)  ;;  %s1302_s26 = smov (!%p244_p7), 64   ;;  %v472_v58 = vpack.c.bf16 (!%p244_p7), %v471_v57, %v471_v57  ;;  %v587_v61 = vpack.c.bf16 (!%p244_p7), %v586_v59, %v586_v59 }
  0x18   : > { %s1303_s27 = smov (!%p244_p7), 56   ;;  %s1304_s28 = smov (!%p244_p7), 112  }
  0x19   : > { %s1305_s29 = smov (!%p244_p7), 80   ;;  %v638_v60 = vsel (!%p244_p7), %vm426_vm4, %v472_v58, 0  ;;  %v592_v62 = vsel (!%p244_p7), %vm426_vm4, %v587_v61, 0  ;;  %s1306_s12 = smov (!%p244_p7), 72  }
  0x1a   : > { %1155 = vmatpush3.bf16.msra.mxu0 (!%p244_p7), %v1255_v2  ;;  %s1307_s13 = smov (!%p244_p7), 104   ;;  %s1308_s14 = smov (!%p244_p7), 48  }
  0x1b   : > { %1166 = vmatprep.subr.bf16.mxu0 (!%p244_p7), %v1297_v1 }
  0x1c   : > { %s1383_s15 = scalar_select %p273_p8, %s1364_s0, 1 }
  0x1d   : > { %v354_v19 = vstv %s282_s25 }
  0x1e   : > { %s1102_s16 = sshll.u32 %s1383_s15, 3  ;;  %vm1419_vm3 = vcmp.lt.s32.totalorder %v353_v18, %v354_v19 }
  0x1f   : > { %s276_s19 = scalar_lea.vmem %s1528_s1, %s1102_s16  ;;  %s280_s30 = scalar_lea.vmem %s1535_s8, %s1102_s16 }
  0x20   : > { %v1392_v3 = vld [vmem:[%s276_s19] sm:$0xff]  ;;  %s1309_s19 = smov 40  }
  0x21   : > { %v284_v4 = vpack.c.bf16 %v1392_v3, %v1392_v3 }
  0x23   : > { %1157 = vmatmul.mubr.msk.bf16.vlgmr.msra.gmra.mrb[0].mxu0 %vm308_vm1, %v284_v4 }
  0x24   : > { %1168 = vmatprep.mubr.msk.bf16.mxu0 %vm1298_vm0, %v1297_v1 }
  0xf6   : > { %v346_v6 = vpop.f32.mrb[0].mxu0 }
  0xf7   : > { %v347_v7 = vadd.f32 %v1104_v5, %v346_v6  ;;  %v1158_v8 = vpop.f32.mrb[1].mxu0 }
  0xf8   : > { %v349_v9 = vpop.f32.mrb[2].mxu0 }
  0xf9   : > { %v1402_v10 = vpack.c.bf16 %v347_v7, %v347_v7  ;;  %v1159_v11 = vpop.f32.mrb[3].mxu0 }
  0xfb   : > { %473 = vrot.lane.b32.xlu1 %v1402_v10, %s1299_s22  ;;  %358 = vrot.lane.b32.xlu0 %v1402_v10, %s1300_s23 }
  0xff   : > { %475 = vrot.lane.b32.xlu0 %v1402_v10, %s1301_s24 }
 0x16d   : > { %v359_v12 = vpop.permute.xlu0 %358  ;;  %v474_v16 = vpop.permute.xlu1 %473 }
 0x16e   : > { %v365_v13 = vsel %vm360_vm2, %v359_v12, 0 }
 0x16f   : > { %1161 = vmatpush3.bf16.xpose.msra.mxu1 %v365_v13 }
 0x170   : > { %1172 = vmatprep.subr.bf16.mxu1 %v1297_v1 }
 0x171   : > { %v476_v14 = vpop.permute.xlu0 %475 }
 0x172   : > { %v481_v15 = vsel %vm360_vm2, %v476_v14, 0 }
 0x176   : > { %1163 = vmatmul.mubr.msk.bf16.vlgmr.msra.gmra.mrb[0].mxu1 %vm360_vm2, %v1402_v10 }
 0x177   : > { %1173 = vmatpush3.bf16.xpose.msra.mxu1 %v481_v15  ;;  %1174 = vmatprep.mubr.msk.bf16.mxu1 %vm1298_vm0, %v1297_v1 }
 0x178   : > { %1184 = vmatprep.subr.bf16.mxu1 %v1297_v1 }
 0x17e   : > { %1175 = vmatmul.mubr.msk.bf16.vlgmr.msra.gmra.mrb[4].mxu1 %vm360_vm2, %v474_v16 }
 0x17f   : > { %1186 = vmatprep.mubr.msk.bf16.mxu1 %vm1298_vm0, %v1297_v1  ;;  %1185 = vmatpush3.bf16.msra.mxu1 %v592_v62 }
 0x180   : > { %1196 = vmatprep.subr.bf16.mxu1 %v1297_v1 }
 0x249   : > { %v401_v20 = vpop.f32.mrb[0].mxu1 }
 0x24a   : > { %v407_v22 = vmul.f32 0.35355338, %v401_v20  ;;  %v1164_v23 = vpop.f32.mrb[1].mxu1 }
 0x24b   : > { %v404_v24 = vpop.f32.mrb[2].mxu1 }
 0x24c   : > { %v1165_v25 = vpop.f32.mrb[3].mxu1  ;;  %v408_v26 = vsel %vm1419_vm3, %v407_v22, -1e+09 }
 0x24d   : > { %v409_v27 = vsel %vm360_vm2, %v408_v26, -inf }
 0x24e   : > { %410 = vmax.xlane.f32.xlu1 %v409_v27 }
 0x251   : > { %v517_v28 = vpop.f32.mrb[4].mxu1 }
 0x252   : > { %v523_v29 = vmul.f32 0.35355338, %v517_v28  ;;  %v1176_v30 = vpop.f32.mrb[5].mxu1 }
 0x253   : > { %v520_v31 = vpop.f32.mrb[6].mxu1 }
 0x254   : > { %v1177_v32 = vpop.f32.mrb[7].mxu1  ;;  %v524_v33 = vsel %vm1419_vm3, %v523_v29, -1e+09 }
 0x255   : > { %v525_v34 = vsel %vm360_vm2, %v524_v33, -inf }
 0x256   : > { %526 = vmax.xlane.f32.xlu0 %v525_v34 }
 0x2db   : > { %v411_v35 = vpop.xlane.xlu1 %410 }
 0x2dc   : > { %v412_v36 = vsub.f32 %v408_v26, %v411_v35 }
 0x2de   : > { %v413_v37 = vmul.f32 1.442695, %v412_v36 }
 0x2e0   : > { %1256 = vpow2.f32 %v413_v37 }
 0x2e3   : > { %v527_v38 = vpop.xlane.xlu0 %526 }
 0x2e4   : > { %v528_v39 = vsub.f32 %v524_v33, %v527_v38 }
 0x2e6   : > { %v529_v40 = vmul.f32 1.442695, %v528_v39 }
 0x2e8   : > { %1258 = vpow2.f32 %v529_v40 }
 0x2ea   : > { %v1257_v41 = vpop.eup %1256 }
 0x2eb   : > { %v415_v42 = vsel %vm360_vm2, %v1257_v41, 0.0 }
 0x2ec   : > { %416 = vadd.xlane.f32.xlu0 %v415_v42 }
 0x2f2   : > { %v1259_v43 = vpop.eup %1258 }
 0x2f3   : > { %v531_v44 = vsel %vm360_vm2, %v1259_v43, 0.0 }
 0x2f4   : > { %532 = vadd.xlane.f32.xlu1 %v531_v44 }
 0x302   : > { %421 = vrot.lane.b32.xlu0 %v1402_v10, %s1302_s26 }
 0x305   : > { %537 = vrot.lane.b32.xlu1 %v1402_v10, %s1303_s27 }
 0x306   : > { %680 = vrot.lane.b32.xlu0 %v1402_v10, %s1304_s28 }
 0x309   : > { %682 = vrot.lane.b32.xlu1 %v1402_v10, %s1305_s29 }
 0x379   : > { %v417_v45 = vpop.xlane.xlu0 %416 }
 0x37a   : > { %1260 = vrcp.f32 %v417_v45 }
 0x37d   : > { %v422_v46 = vpop.permute.xlu0 %421 }
 0x37e   : > { %v428_v47 = vsel %vm426_vm4, %v422_v46, 0  ;;  %v793_v46 = vld [vmem:[%s1531_s4 + $0x10] sm:$0xff] }
 0x37f   : > { %1167 = vmatpush3.bf16.msra.mxu0 %v428_v47  ;;  %v794_v47 = vpack.c.bf16 %v793_v46, %v793_v46 }
 0x380   : > { %1178 = vmatprep.subr.bf16.mxu0 %v1297_v1 }
 0x381   : > { %v533_v48 = vpop.xlane.xlu1 %532  ;;  %v681_v14 = vpop.permute.xlu0 %680 }
 0x382   : > { %1262 = vrcp.f32 %v533_v48  ;;  %v799_v48 = vsel %vm426_vm4, %v794_v47, 0 }
 0x384   : > { %v1261_v49 = vpop.eup %1260 }
 0x385   : > { %v419_v50 = vmul.f32 %v1261_v49, %v1257_v41  ;;  %v538_v51 = vpop.permute.xlu1 %537 }
 0x386   : > { %v543_v53 = vsel %vm426_vm4, %v538_v51, 0 }
 0x387   : > { %v420_v52 = vpack.c.bf16 %v419_v50, %v419_v50 }
 0x389   : > { %1169 = vmatmul.mubr.msk.bf16.vlgmr.msra.gmra.mrb[4].mxu0 %vm360_vm2, %v420_v52  ;;  %v683_v6 = vpop.permute.xlu1 %682 }
 0x38a   : > { %1179 = vmatpush3.bf16.msra.mxu0 %v543_v53  ;;  %1180 = vmatprep.mubr.msk.bf16.mxu0 %vm1298_vm0, %v1297_v1  ;;  %v688_v12 = vsel %vm360_vm2, %v683_v6, 0 }
 0x38b   : > { %1190 = vmatprep.subr.bf16.mxu0 %v1297_v1 }
 0x38c   : > { %v1263_v54 = vpop.eup %1262 }
 0x38d   : > { %v535_v55 = vmul.f32 %v1263_v54, %v1259_v43 }
 0x38f   : > { %v536_v56 = vpack.c.bf16 %v535_v55, %v535_v55 }
 0x391   : > { %1181 = vmatmul.mubr.msk.bf16.vlgmr.msra.gmra.mrb[8].mxu0 %vm360_vm2, %v536_v56 }
 0x392   : > { %1192 = vmatprep.mubr.msk.bf16.mxu0 %vm1298_vm0, %v1297_v1  ;;  %1191 = vmatpush3.bf16.msra.mxu0 %v638_v60 }
 0x393   : > { %1202 = vmatprep.subr.bf16.mxu0 %v1297_v1 }
 0x45c   : > { %v464_v63 = vpop.f32.mrb[4].mxu0 }
 0x45d   : > { %v470_v0 = vpack.c.bf16 %v464_v63, %v464_v63  ;;  %v1170_v2 = vpop.f32.mrb[5].mxu0 }
 0x45e   : > { %v467_v4 = vpop.f32.mrb[6].mxu0 }
 0x45f   : > { %v1171_v5 = vpop.f32.mrb[7].mxu0  ;;  %1193 = vmatmul.mubr.msk.bf16.vlgmr.msra.gmra.mrb[12].mxu0 %vm360_vm2, %v470_v0 }
 0x460   : > { %1204 = vmatprep.mubr.msk.bf16.mxu0 %vm1298_vm0, %v1297_v1  ;;  %v956_v5 = vpack.c.bf16 %v955_v21, %v955_v21 }
 0x462   : > { %v961_v6 = vsel %vm426_vm4, %v956_v5, 0 }
 0x464   : > { %v579_v7 = vpop.f32.mrb[8].mxu0 }
 0x465   : > { %v585_v8 = vpack.c.bf16 %v579_v7, %v579_v7  ;;  %v1182_v9 = vpop.f32.mrb[9].mxu0 }
 0x466   : > { %v582_v11 = vpop.f32.mrb[10].mxu0 }
 0x467   : > { %v1183_v13 = vpop.f32.mrb[11].mxu0  ;;  %1187 = vmatmul.mubr.msk.bf16.vlgmr.msra.gmra.mrb[8].mxu1 %vm360_vm2, %v585_v8 }
 0x468   : > { %1197 = vmatpush3.bf16.xpose.msra.mxu1 %v688_v12  ;;  %1198 = vmatprep.mubr.msk.bf16.mxu1 %vm1298_vm0, %v1297_v1 }
 0x469   : > { %1208 = vmatprep.subr.bf16.mxu1 %v1297_v1 }
 0x46f   : > { %1199 = vmatmul.mubr.msk.bf16.vlgmr.msra.gmra.mrb[12].mxu1 %vm360_vm2, %v681_v14 }
 0x470   : > { %1210 = vmatprep.mubr.msk.bf16.mxu1 %vm1298_vm0, %v1297_v1  ;;  %1209 = vmatpush3.bf16.msra.mxu1 %v799_v48 }
 0x471   : > { %1220 = vmatprep.subr.bf16.mxu1 %v1297_v1 }
 0x532   : > { %v674_v15 = vpop.f32.mrb[12].mxu0 }
 0x533   : > { %v1194_v16 = vpop.f32.mrb[13].mxu0 }
 0x534   : > { %v677_v17 = vpop.f32.mrb[14].mxu0 }
 0x535   : > { %v1195_v18 = vpop.f32.mrb[15].mxu0 }
 0x53a   : > { %v628_v19 = vpop.f32.mrb[8].mxu1 }
 0x53b   : > { %v1466_v20 = vadd.f32 %v674_v15, %v628_v19  ;;  %v1188_v22 = vpop.f32.mrb[9].mxu1 }
 0x53c   : > { %v631_v23 = vpop.f32.mrb[10].mxu1 }
 0x53d   : > { %v1189_v24 = vpop.f32.mrb[11].mxu1 }
 0x542   : > { %v724_v25 = vpop.f32.mrb[12].mxu1 }
 0x543   : > { %v730_v26 = vmul.f32 0.35355338, %v724_v25  ;;  %v1200_v27 = vpop.f32.mrb[13].mxu1 }
 0x544   : > { %v727_v28 = vpop.f32.mrb[14].mxu1 }
 0x545   : > { %v1201_v29 = vpop.f32.mrb[15].mxu1  ;;  %v731_v30 = vsel %vm1419_vm3, %v730_v26, -1e+09  ;;  %v1120_v26 = vld [vmem:[%s1532_s5] ss:$0 sm:$0xff] }
 0x546   : > { %v732_v31 = vsel %vm360_vm2, %v731_v30, -inf }
 0x547   : > { %733 = vmax.xlane.f32.xlu1 %v732_v31 }
 0x558   : > { %844 = vrot.lane.b32.xlu1 %v1402_v10, %s1306_s12 }
 0x55c   : > { %842 = vrot.lane.b32.xlu1 %v1402_v10, %s1307_s13 }
 0x5d4   : > { %v734_v32 = vpop.xlane.xlu1 %733 }
 0x5d5   : > { %v735_v33 = vsub.f32 %v731_v30, %v734_v32 }
 0x5d7   : > { %v736_v34 = vmul.f32 1.442695, %v735_v33 }
 0x5d8   : > { %v845_v42 = vpop.permute.xlu1 %844 }
 0x5d9   : > { %1264 = vpow2.f32 %v736_v34  ;;  %v850_v44 = vsel %vm360_vm2, %v845_v42, 0 }
 0x5dc   : > { %v843_v45 = vpop.permute.xlu1 %842 }
 0x5e3   : > { %v1265_v35 = vpop.eup %1264 }
 0x5e4   : > { %v738_v36 = vsel %vm360_vm2, %v1265_v35, 0.0 }
 0x5e5   : > { %739 = vadd.xlane.f32.xlu0 %v738_v36 }
 0x5fb   : > { %744 = vrot.lane.b32.xlu0 %v1402_v10, %s1308_s14 }
 0x672   : > { %v740_v37 = vpop.xlane.xlu0 %739 }
 0x673   : > { %1266 = vrcp.f32 %v740_v37 }
 0x676   : > { %v745_v38 = vpop.permute.xlu0 %744 }
 0x677   : > { %v750_v39 = vsel %vm426_vm4, %v745_v38, 0 }
 0x678   : > { %1203 = vmatpush3.bf16.msra.mxu0 %v750_v39 }
 0x679   : > { %1214 = vmatprep.subr.bf16.mxu0 %v1297_v1 }
 0x67d   : > { %v1267_v40 = vpop.eup %1266 }
 0x67e   : > { %v742_v41 = vmul.f32 %v1267_v40, %v1265_v35 }
 0x680   : > { %v743_v43 = vpack.c.bf16 %v742_v41, %v742_v41  ;;  %v1122_v41 = vld [vmem:[%s1534_s7] ss:$0 sm:$0xff] }
 0x682   : > { %1205 = vmatmul.mubr.msk.bf16.vlgmr.msra.gmra.mrb[16].mxu0 %vm360_vm2, %v743_v43 }
 0x683   : > { %1215 = vmatpush3.bf16.xpose.msra.mxu0 %v850_v44  ;;  %1216 = vmatprep.mubr.msk.bf16.mxu0 %vm1298_vm0, %v1297_v1 }
 0x684   : > { %1226 = vmatprep.subr.bf16.mxu0 %v1297_v1 }
 0x68a   : > { %1217 = vmatmul.mubr.msk.bf16.vlgmr.msra.gmra.mrb[20].mxu0 %vm360_vm2, %v843_v45 }
 0x68b   : > { %1228 = vmatprep.mubr.msk.bf16.mxu0 %vm1298_vm0, %v1297_v1  ;;  %1227 = vmatpush3.bf16.msra.mxu0 %v961_v6 }
 0x755   : > { %v786_v49 = vpop.f32.mrb[16].mxu0 }
 0x756   : > { %v792_v50 = vpack.c.bf16 %v786_v49, %v786_v49  ;;  %v1206_v51 = vpop.f32.mrb[17].mxu0 }
 0x757   : > { %v789_v52 = vpop.f32.mrb[18].mxu0 }
 0x758   : > { %v1207_v53 = vpop.f32.mrb[19].mxu0  ;;  %1211 = vmatmul.mubr.msk.bf16.vlgmr.msra.gmra.mrb[16].mxu1 %vm360_vm2, %v792_v50 }
 0x759   : > { %1222 = vmatprep.mubr.msk.bf16.mxu1 %vm1298_vm0, %v1297_v1 }
 0x75d   : > { %v886_v54 = vpop.f32.mrb[20].mxu0 }
 0x75e   : > { %v892_v55 = vmul.f32 0.35355338, %v886_v54  ;;  %v1218_v56 = vpop.f32.mrb[21].mxu0 }
 0x75f   : > { %v889_v57 = vpop.f32.mrb[22].mxu0 }
 0x760   : > { %v1219_v58 = vpop.f32.mrb[23].mxu0  ;;  %v893_v59 = vsel %vm1419_vm3, %v892_v55, -1e+09 }
 0x761   : > { %v894_v60 = vsel %vm360_vm2, %v893_v59, -inf }
 0x762   : > { %895 = vmax.xlane.f32.xlu0 %v894_v60 }
 0x778   : > { %906 = vrot.lane.b32.xlu0 %v1402_v10, %s1309_s19 }
 0x7ef   : > { %v896_v61 = vpop.xlane.xlu0 %895 }
 0x7f0   : > { %v897_v62 = vsub.f32 %v893_v59, %v896_v61 }
 0x7f2   : > { %v898_v63 = vmul.f32 1.442695, %v897_v62 }
 0x7f3   : > { %v907_v0 = vpop.permute.xlu0 %906 }
 0x7f4   : > { %1268 = vpow2.f32 %v898_v63  ;;  %v912_v1 = vsel %vm426_vm4, %v907_v0, 0 }
 0x7f5   : > { %1221 = vmatpush3.bf16.msra.mxu1 %v912_v1 }
 0x7fe   : > { %v1269_v2 = vpop.eup %1268 }
 0x7ff   : > { %v900_v4 = vsel %vm360_vm2, %v1269_v2, 0.0 }
 0x800   : > { %901 = vadd.xlane.f32.xlu1 %v900_v4 }
 0x82b   : > { %v835_v10 = vpop.f32.mrb[16].mxu1 }
 0x82c   : > { %v841_v7 = vadd.f32 %v835_v10, %v1466_v20  ;;  %v1212_v8 = vpop.f32.mrb[17].mxu1 }
 0x82d   : > { %v838_v9 = vpop.f32.mrb[18].mxu1 }
 0x82e   : > { %v1213_v11 = vpop.f32.mrb[19].mxu1 }
 0x88d   : > { %v902_v12 = vpop.xlane.xlu1 %901 }
 0x88e   : > { %1270 = vrcp.f32 %v902_v12 }
 0x898   : > { %v1271_v13 = vpop.eup %1270 }
 0x899   : > { %v904_v14 = vmul.f32 %v1271_v13, %v1269_v2 }
 0x89b   : > { %v905_v15 = vpack.c.bf16 %v904_v14, %v904_v14 }
 0x89d   : > { %1223 = vmatmul.mubr.msk.bf16.vlgmr.msra.gmra.mrb[20].mxu1 %vm360_vm2, %v905_v15 }
 0x970   : > { %v948_v16 = vpop.f32.mrb[20].mxu1 }
 0x971   : > { %v954_v17 = vpack.c.bf16 %v948_v16, %v948_v16  ;;  %v1224_v18 = vpop.f32.mrb[21].mxu1 }
 0x972   : > { %v951_v19 = vpop.f32.mrb[22].mxu1 }
 0x973   : > { %v1225_v22 = vpop.f32.mrb[23].mxu1  ;;  %1229 = vmatmul.mubr.msk.bf16.vlgmr.msra.gmra.mrb[24].mxu0 %vm360_vm2, %v954_v17 }
 0xa46   : > { %v997_v23 = vpop.f32.mrb[24].mxu0 }
 0xa47   : > { %v1003_v24 = vadd.f32 %v997_v23, %v841_v7  ;;  %v1230_v20 = vpop.f32.mrb[25].mxu0 }
 0xa48   : > { %v1000_v25 = vpop.f32.mrb[26].mxu0 }
 0xa49   : > { %v1004_v27 = vadd.f32 %v1003_v24, %v1392_v3  ;;  %v1231_v28 = vpop.f32.mrb[27].mxu0  ;;  %v1121_v3 = vld [vmem:[%s1533_s6] ss:$0 sm:$0xff] }
 0xa4b   : > { %v1012_v29 = vadd.f32 %v1120_v26, %v1004_v27 }
 0xa4d   : > { %v1015_v30 = vsel %vm308_vm1, %v1012_v29, 0.0 }
 0xa4e   : > { %1016 = vadd.xlane.f32.xlu1 %v1015_v30 }
 0xadb   : > { %v1017_v31 = vpop.xlane.xlu1 %1016 }
 0xadc   : > { %v1019_v32 = vmul.f32 0.03125, %v1017_v31 }
 0xade   : > { %v1020_v33 = vsub.f32 %v1012_v29, %v1019_v32 }
 0xae0   : > { %v1021_v34 = vmul.f32 %v1020_v33, %v1020_v33 }
 0xae2   : > { %v1022_v35 = vsel %vm308_vm1, %v1021_v34, 0.0 }
 0xae3   : > { %1023 = vadd.xlane.f32.xlu1 %v1022_v35 }
 0xb70   : > { %v1024_v36 = vpop.xlane.xlu1 %1023 }
 0xb71   : > { %v1025_v37 = vmul.f32 0.03125, %v1024_v36 }
 0xb73   : > { %v1026_v38 = vadd.f32 1e-05, %v1025_v37 }
 0xb75   : > { %1272 = vrsqrt.f32 %v1026_v38 }
 0xb7f   : > { %v1273_v39 = vpop.eup %1272 }
 0xb80   : > { %v1028_v40 = vmul.f32 %v1273_v39, %v1020_v33 }
 0xb82   : > { %v1035_v42 = vmul.f32 %v1121_v3, %v1028_v40 }
 0xb84   : > { %v1042_v43 = vadd.f32 %v1122_v41, %v1035_v42 }
 0xb86   : > { %1043 = vst.msk [vmem:[%s280_s30] sm:$0xff] %vm308_vm1, %v1042_v43 }
 0xb87 PF: > { %s24_s10 = sadd.s32 1, %s1294_s10  }
 0xb88   : > { %p21_p9 = scmp.ge.s32.totalorder %s24_s10, 4  }
 0xb8a   :  { %23 = sbr.rel (!%p21_p9) target bundleno = 16 (0x10), region = 78 }

// kernel: model_forward.15
= control target key start
LH: loop header
LB: loop body
LE: loop exit
PB: predicated region body
PF: predicated region fallthrough
CT: control target
= control target key end

     0   :  { %s1531_s0 = inlined_call_operand.vmem [shape: s32[2], index: 0, kind: input, shape index: {}]   ;;  %s1532_s1 = inlined_call_operand.vmem [shape: f32[2,8,32], index: 1, kind: input, shape index: {}]   ;;  %s1533_s2 = inlined_call_operand.vmem [shape: bf16[32,96], index: 2, kind: input, shape index: {}]   ;;  %s1534_s3 = inlined_call_operand.vmem [shape: f32[1,96], index: 3, kind: input, shape index: {}]   ;;  %s1535_s4 = inlined_call_operand.vmem [shape: f32[32,32], index: 4, kind: input, shape index: {}]   ;;  %s1536_s5 = inlined_call_operand.vmem [shape: f32[1,32], index: 5, kind: input, shape index: {}]   ;;  %s1537_s6 = inlined_call_operand.vmem [shape: f32[1,32], index: 6, kind: input, shape index: {}]   ;;  %s1538_s7 = inlined_call_operand.vmem [shape: f32[1,32], index: 7, kind: input, shape index: {}]   ;;  %s1539_s8 = inlined_call_operand.vmem [shape: f32[2,8,32], index: 8, kind: output, shape index: {}]  }
   0x1   :  { %s13_s29 = sshll.u32 %s1531_s0, 4  ;;  %s14_s29 = int_to_ptr.vmem [resolvable:$true] %s13_s29 }
   0x2   :  { %s1278_s30 = scalar_lea.vmem %s14_s29, 16  ;;  %p1283_p1 = scmp.lt.s32.totalorder %s14_s29, %s14_s29 }
   0x3   :  { %p1279_p0 = scmp.ne.s32.totalorder %s14_s29, %s1278_s30  ;;  %p1284_p2 = scmp.lt.s32.totalorder %s1278_s30, %s1278_s30 }
   0x5   :  { %p1285_p3 = por %p1284_p2, %p1283_p1 }
   0x7   :  { %p1286_p4 = pnand %p1285_p3, %p1279_p0 }
   0x9   :  { %1289 = shalt.err (!%p1286_p4)  }
   0xa   :  { %s1300_s9 = smov [#allocation3]  }
   0xb   :  { %16 = dma.vmem_to_smem %s14_s29, 16, %s1300_s9, [#allocation2] }
   0xc   :  { %1294 = dma.done.wait [#allocation2], 16 }
   0xd   :  { %1295 = vsyncadd [#allocation2], 4294967280 }
   0xe   :  { %18 = sfence }
   0xf   :  { %s1362_s10 = smov 0  }
  0x10 LB: > { %s1368_s0 = sadd.s32 4294967295, %s1298_s10   ;;  %p1105_p5 = scmp.ge.s32.totalorder %s1298_s10, 1  ;;  %s1298_s10 = sphi %s1362_s10, %s24_s10  }
  0x11   : > { %p243_p6 = scmp.lt.s32.totalorder %s1298_s10, 3 }
  0x13   : > { %p244_p7 = pnand %p1105_p5, %p243_p6 }
  0x14   : > { %v1258_v0 = vld [vmem:[%s1533_s2] sm:$0xff] (!%p244_p7)   ;;  %v1301_v1 = vmov (!%p244_p7), 0.0   ;;  %v1259_v2 = vld [vmem:[%s1533_s2 + $0x8] sm:$0xff] (!%p244_p7)   ;;  %vm1302_vm0 = vmmov (!%p244_p7), 0   ;;  %p273_p8 = scmp.lt.s32.totalorder (!%p244_p7), %s1368_s0, 1  ;;  %vm308_vm1 = vcmask (!%p244_p7), 261120   ;;  %v352_v17 = vlaneseq (!%p244_p7) }
  0x15   : > { %247 = sbr.rel (%p244_p7) target bundleno = 2951 (0xb87), region = 48  ;;  %1156 = vmatprep.subr.bf16.mxu0 (!%p244_p7), %v1301_v1  ;;  %1164 = vmatprep.subr.bf16.mxu1 (!%p244_p7), %v1301_v1  ;;  %v1108_v5 = vld [vmem:[%s1534_s3] ss:$0 sm:$0xff] (!%p244_p7)  ;;  %s1303_s22 = smov (!%p244_p7), 120   ;;  %vm364_vm2 = vcmask (!%p244_p7), 64512   ;;  %vm430_vm6 = vcmask (!%p244_p7), 1043456  }
  0x16   : > { %1157 = vmatpush3.bf16.msra.mxu0 (!%p244_p7), %v1258_v0  ;;  %1160 = vmatprep.mubr.msk.bf16.mxu0 (!%p244_p7), %vm1302_vm0, %v1301_v1  ;;  %s1304_s23 = smov (!%p244_p7), 96   ;;  %s1305_s24 = smov (!%p244_p7), 88   ;;  %v353_v18 = vshrl.u32 (!%p244_p7), %v352_v17, 7  ;;  %v355_v19 = vand.u32 (!%p244_p7), 127, %v352_v17  ;;  %v475_v58 = vld [vmem:[%s1535_s4] sm:$0xff] (!%p244_p7)  ;;  %v590_v60 = vld [vmem:[%s1535_s4 + $0x8] sm:$0xff] (!%p244_p7) }
  0x17   : > { %1158 = vmatprep.subr.bf16.mxu0 (!%p244_p7), %v1301_v1  ;;  %1166 = vmatprep.mubr.msk.bf16.mxu1 (!%p244_p7), %vm1302_vm0, %v1301_v1  ;;  %s282_s25 = sld [smem:[#allocation3 + %s1368_s0]] (!%p244_p7)  ;;  %s1306_s26 = smov (!%p244_p7), 64   ;;  %v476_v59 = vpack.c.bf16 (!%p244_p7), %v475_v58, %v475_v58  ;;  %v591_v62 = vpack.c.bf16 (!%p244_p7), %v590_v60, %v590_v60  ;;  %v959_v22 = vld [vmem:[%s1535_s4 + $0x18] sm:$0xff] (!%p244_p7) }
  0x18   : > { %vm358_vm4 = vcmp.le.s32.totalorder (!%p244_p7), %v355_v19, %v353_v18  ;;  %s1307_s27 = smov (!%p244_p7), 56   ;;  %s1308_s28 = smov (!%p244_p7), 112  }
  0x19   : > { %s1309_s29 = smov (!%p244_p7), 80   ;;  %v642_v61 = vsel (!%p244_p7), %vm430_vm6, %v476_v59, 0  ;;  %v596_v63 = vsel (!%p244_p7), %vm430_vm6, %v591_v62, 0  ;;  %s1310_s12 = smov (!%p244_p7), 72  }
  0x1a   : > { %1159 = vmatpush3.bf16.msra.mxu0 (!%p244_p7), %v1259_v2  ;;  %s1311_s13 = smov (!%p244_p7), 104   ;;  %s1312_s14 = smov (!%p244_p7), 48  }
  0x1b   : > { %1170 = vmatprep.subr.bf16.mxu0 (!%p244_p7), %v1301_v1 }
  0x1c   : > { %s1387_s15 = scalar_select %p273_p8, %s1368_s0, 1 }
  0x1d   : > { %v356_v20 = vstv %s282_s25 }
  0x1e   : > { %s1106_s16 = sshll.u32 %s1387_s15, 3  ;;  %vm357_vm3 = vcmp.lt.s32.totalorder %v355_v19, %v356_v20 }
  0x1f   : > { %s276_s19 = scalar_lea.vmem %s1532_s1, %s1106_s16  ;;  %vm1423_vm5 = vmand %vm357_vm3, %vm358_vm4  ;;  %s280_s30 = scalar_lea.vmem %s1539_s8, %s1106_s16 }
  0x20   : > { %v1396_v3 = vld [vmem:[%s276_s19] sm:$0xff]  ;;  %s1313_s19 = smov 40  }
  0x21   : > { %v284_v4 = vpack.c.bf16 %v1396_v3, %v1396_v3 }
  0x23   : > { %1161 = vmatmul.mubr.msk.bf16.vlgmr.msra.gmra.mrb[0].mxu0 %vm308_vm1, %v284_v4 }
  0x24   : > { %1172 = vmatprep.mubr.msk.bf16.mxu0 %vm1302_vm0, %v1301_v1 }
  0xf6   : > { %v346_v6 = vpop.f32.mrb[0].mxu0 }
  0xf7   : > { %v347_v7 = vadd.f32 %v1108_v5, %v346_v6  ;;  %v1162_v8 = vpop.f32.mrb[1].mxu0 }
  0xf8   : > { %v349_v9 = vpop.f32.mrb[2].mxu0 }
  0xf9   : > { %v1406_v10 = vpack.c.bf16 %v347_v7, %v347_v7  ;;  %v1163_v11 = vpop.f32.mrb[3].mxu0 }
  0xfb   : > { %477 = vrot.lane.b32.xlu1 %v1406_v10, %s1303_s22  ;;  %362 = vrot.lane.b32.xlu0 %v1406_v10, %s1304_s23 }
  0xff   : > { %479 = vrot.lane.b32.xlu0 %v1406_v10, %s1305_s24 }
 0x16d   : > { %v363_v12 = vpop.permute.xlu0 %362  ;;  %v478_v16 = vpop.permute.xlu1 %477 }
 0x16e   : > { %v369_v13 = vsel %vm364_vm2, %v363_v12, 0 }
 0x16f   : > { %1165 = vmatpush3.bf16.xpose.msra.mxu1 %v369_v13 }
 0x170   : > { %1176 = vmatprep.subr.bf16.mxu1 %v1301_v1 }
 0x171   : > { %v480_v14 = vpop.permute.xlu0 %479 }
 0x172   : > { %v485_v15 = vsel %vm364_vm2, %v480_v14, 0 }
 0x176   : > { %1167 = vmatmul.mubr.msk.bf16.vlgmr.msra.gmra.mrb[0].mxu1 %vm364_vm2, %v1406_v10 }
 0x177   : > { %1177 = vmatpush3.bf16.xpose.msra.mxu1 %v485_v15  ;;  %1178 = vmatprep.mubr.msk.bf16.mxu1 %vm1302_vm0, %v1301_v1 }
 0x178   : > { %1188 = vmatprep.subr.bf16.mxu1 %v1301_v1 }
 0x17e   : > { %1179 = vmatmul.mubr.msk.bf16.vlgmr.msra.gmra.mrb[4].mxu1 %vm364_vm2, %v478_v16 }
 0x17f   : > { %1190 = vmatprep.mubr.msk.bf16.mxu1 %vm1302_vm0, %v1301_v1  ;;  %1189 = vmatpush3.bf16.msra.mxu1 %v596_v63 }
 0x180   : > { %1200 = vmatprep.subr.bf16.mxu1 %v1301_v1 }
 0x249   : > { %v405_v21 = vpop.f32.mrb[0].mxu1 }
 0x24a   : > { %v411_v23 = vmul.f32 0.35355338, %v405_v21  ;;  %v1168_v24 = vpop.f32.mrb[1].mxu1 }
 0x24b   : > { %v408_v25 = vpop.f32.mrb[2].mxu1 }
 0x24c   : > { %v1169_v26 = vpop.f32.mrb[3].mxu1  ;;  %v412_v27 = vsel %vm1423_vm5, %v411_v23, -1e+09 }
 0x24d   : > { %v413_v28 = vsel %vm364_vm2, %v412_v27, -inf }
 0x24e   : > { %414 = vmax.xlane.f32.xlu1 %v413_v28 }
 0x251   : > { %v521_v29 = vpop.f32.mrb[4].mxu1 }
 0x252   : > { %v527_v30 = vmul.f32 0.35355338, %v521_v29  ;;  %v1180_v31 = vpop.f32.mrb[5].mxu1 }
 0x253   : > { %v524_v32 = vpop.f32.mrb[6].mxu1 }
 0x254   : > { %v1181_v33 = vpop.f32.mrb[7].mxu1  ;;  %v528_v34 = vsel %vm1423_vm5, %v527_v30, -1e+09 }
 0x255   : > { %v529_v35 = vsel %vm364_vm2, %v528_v34, -inf }
 0x256   : > { %530 = vmax.xlane.f32.xlu0 %v529_v35 }
 0x2db   : > { %v415_v36 = vpop.xlane.xlu1 %414 }
 0x2dc   : > { %v416_v37 = vsub.f32 %v412_v27, %v415_v36 }
 0x2de   : > { %v417_v38 = vmul.f32 1.442695, %v416_v37 }
 0x2e0   : > { %1260 = vpow2.f32 %v417_v38 }
 0x2e3   : > { %v531_v39 = vpop.xlane.xlu0 %530 }
 0x2e4   : > { %v532_v40 = vsub.f32 %v528_v34, %v531_v39 }
 0x2e6   : > { %v533_v41 = vmul.f32 1.442695, %v532_v40 }
 0x2e8   : > { %1262 = vpow2.f32 %v533_v41 }
 0x2ea   : > { %v1261_v42 = vpop.eup %1260 }
 0x2eb   : > { %v419_v43 = vsel %vm364_vm2, %v1261_v42, 0.0 }
 0x2ec   : > { %420 = vadd.xlane.f32.xlu0 %v419_v43 }
 0x2f2   : > { %v1263_v44 = vpop.eup %1262 }
 0x2f3   : > { %v535_v45 = vsel %vm364_vm2, %v1263_v44, 0.0 }
 0x2f4   : > { %536 = vadd.xlane.f32.xlu1 %v535_v45 }
 0x302   : > { %425 = vrot.lane.b32.xlu0 %v1406_v10, %s1306_s26 }
 0x305   : > { %541 = vrot.lane.b32.xlu1 %v1406_v10, %s1307_s27 }
 0x306   : > { %684 = vrot.lane.b32.xlu0 %v1406_v10, %s1308_s28 }
 0x309   : > { %686 = vrot.lane.b32.xlu1 %v1406_v10, %s1309_s29 }
 0x379   : > { %v421_v46 = vpop.xlane.xlu0 %420 }
 0x37a   : > { %1264 = vrcp.f32 %v421_v46 }
 0x37d   : > { %v426_v47 = vpop.permute.xlu0 %425 }
 0x37e   : > { %v432_v48 = vsel %vm430_vm6, %v426_v47, 0  ;;  %v797_v47 = vld [vmem:[%s1535_s4 + $0x10] sm:$0xff] }
 0x37f   : > { %1171 = vmatpush3.bf16.msra.mxu0 %v432_v48  ;;  %v798_v48 = vpack.c.bf16 %v797_v47, %v797_v47 }
 0x380   : > { %1182 = vmatprep.subr.bf16.mxu0 %v1301_v1 }
 0x381   : > { %v537_v49 = vpop.xlane.xlu1 %536  ;;  %v685_v15 = vpop.permute.xlu0 %684 }
 0x382   : > { %1266 = vrcp.f32 %v537_v49  ;;  %v803_v49 = vsel %vm430_vm6, %v798_v48, 0 }
 0x384   : > { %v1265_v50 = vpop.eup %1264 }
 0x385   : > { %v423_v51 = vmul.f32 %v1265_v50, %v1261_v42  ;;  %v542_v52 = vpop.permute.xlu1 %541 }
 0x386   : > { %v547_v54 = vsel %vm430_vm6, %v542_v52, 0 }
 0x387   : > { %v424_v53 = vpack.c.bf16 %v423_v51, %v423_v51 }
 0x389   : > { %1173 = vmatmul.mubr.msk.bf16.vlgmr.msra.gmra.mrb[4].mxu0 %vm364_vm2, %v424_v53  ;;  %v687_v7 = vpop.permute.xlu1 %686 }
 0x38a   : > { %1183 = vmatpush3.bf16.msra.mxu0 %v547_v54  ;;  %1184 = vmatprep.mubr.msk.bf16.mxu0 %vm1302_vm0, %v1301_v1  ;;  %v692_v13 = vsel %vm364_vm2, %v687_v7, 0 }
 0x38b   : > { %1194 = vmatprep.subr.bf16.mxu0 %v1301_v1 }
 0x38c   : > { %v1267_v55 = vpop.eup %1266 }
 0x38d   : > { %v539_v56 = vmul.f32 %v1267_v55, %v1263_v44 }
 0x38f   : > { %v540_v57 = vpack.c.bf16 %v539_v56, %v539_v56 }
 0x391   : > { %1185 = vmatmul.mubr.msk.bf16.vlgmr.msra.gmra.mrb[8].mxu0 %vm364_vm2, %v540_v57 }
 0x392   : > { %1196 = vmatprep.mubr.msk.bf16.mxu0 %vm1302_vm0, %v1301_v1  ;;  %1195 = vmatpush3.bf16.msra.mxu0 %v642_v61 }
 0x393   : > { %1206 = vmatprep.subr.bf16.mxu0 %v1301_v1 }
 0x45c   : > { %v468_v0 = vpop.f32.mrb[4].mxu0 }
 0x45d   : > { %v474_v2 = vpack.c.bf16 %v468_v0, %v468_v0  ;;  %v1174_v4 = vpop.f32.mrb[5].mxu0 }
 0x45e   : > { %v471_v5 = vpop.f32.mrb[6].mxu0 }
 0x45f   : > { %v1175_v6 = vpop.f32.mrb[7].mxu0  ;;  %1197 = vmatmul.mubr.msk.bf16.vlgmr.msra.gmra.mrb[12].mxu0 %vm364_vm2, %v474_v2 }
 0x460   : > { %1208 = vmatprep.mubr.msk.bf16.mxu0 %vm1302_vm0, %v1301_v1  ;;  %v960_v6 = vpack.c.bf16 %v959_v22, %v959_v22 }
 0x462   : > { %v965_v7 = vsel %vm430_vm6, %v960_v6, 0 }
 0x464   : > { %v583_v8 = vpop.f32.mrb[8].mxu0 }
 0x465   : > { %v589_v9 = vpack.c.bf16 %v583_v8, %v583_v8  ;;  %v1186_v11 = vpop.f32.mrb[9].mxu0 }
 0x466   : > { %v586_v12 = vpop.f32.mrb[10].mxu0 }
 0x467   : > { %v1187_v14 = vpop.f32.mrb[11].mxu0  ;;  %1191 = vmatmul.mubr.msk.bf16.vlgmr.msra.gmra.mrb[8].mxu1 %vm364_vm2, %v589_v9 }
 0x468   : > { %1201 = vmatpush3.bf16.xpose.msra.mxu1 %v692_v13  ;;  %1202 = vmatprep.mubr.msk.bf16.mxu1 %vm1302_vm0, %v1301_v1 }
 0x469   : > { %1212 = vmatprep.subr.bf16.mxu1 %v1301_v1 }
 0x46f   : > { %1203 = vmatmul.mubr.msk.bf16.vlgmr.msra.gmra.mrb[12].mxu1 %vm364_vm2, %v685_v15 }
 0x470   : > { %1214 = vmatprep.mubr.msk.bf16.mxu1 %vm1302_vm0, %v1301_v1  ;;  %1213 = vmatpush3.bf16.msra.mxu1 %v803_v49 }
 0x471   : > { %1224 = vmatprep.subr.bf16.mxu1 %v1301_v1 }
 0x532   : > { %v678_v16 = vpop.f32.mrb[12].mxu0 }
 0x533   : > { %v1198_v17 = vpop.f32.mrb[13].mxu0 }
 0x534   : > { %v681_v18 = vpop.f32.mrb[14].mxu0 }
 0x535   : > { %v1199_v19 = vpop.f32.mrb[15].mxu0 }
 0x53a   : > { %v632_v20 = vpop.f32.mrb[8].mxu1 }
 0x53b   : > { %v1470_v21 = vadd.f32 %v678_v16, %v632_v20  ;;  %v1192_v23 = vpop.f32.mrb[9].mxu1 }
 0x53c   : > { %v635_v24 = vpop.f32.mrb[10].mxu1 }
 0x53d   : > { %v1193_v25 = vpop.f32.mrb[11].mxu1 }
 0x542   : > { %v728_v26 = vpop.f32.mrb[12].mxu1 }
 0x543   : > { %v734_v27 = vmul.f32 0.35355338, %v728_v26  ;;  %v1204_v28 = vpop.f32.mrb[13].mxu1 }
 0x544   : > { %v731_v29 = vpop.f32.mrb[14].mxu1 }
 0x545   : > { %v1205_v30 = vpop.f32.mrb[15].mxu1  ;;  %v735_v31 = vsel %vm1423_vm5, %v734_v27, -1e+09  ;;  %v1124_v27 = vld [vmem:[%s1536_s5] ss:$0 sm:$0xff] }
 0x546   : > { %v736_v32 = vsel %vm364_vm2, %v735_v31, -inf }
 0x547   : > { %737 = vmax.xlane.f32.xlu1 %v736_v32 }
 0x558   : > { %848 = vrot.lane.b32.xlu1 %v1406_v10, %s1310_s12 }
 0x55c   : > { %846 = vrot.lane.b32.xlu1 %v1406_v10, %s1311_s13 }
 0x5d4   : > { %v738_v33 = vpop.xlane.xlu1 %737 }
 0x5d5   : > { %v739_v34 = vsub.f32 %v735_v31, %v738_v33 }
 0x5d7   : > { %v740_v35 = vmul.f32 1.442695, %v739_v34 }
 0x5d8   : > { %v849_v43 = vpop.permute.xlu1 %848 }
 0x5d9   : > { %1268 = vpow2.f32 %v740_v35  ;;  %v854_v45 = vsel %vm364_vm2, %v849_v43, 0 }
 0x5dc   : > { %v847_v46 = vpop.permute.xlu1 %846 }
 0x5e3   : > { %v1269_v36 = vpop.eup %1268 }
 0x5e4   : > { %v742_v37 = vsel %vm364_vm2, %v1269_v36, 0.0 }
 0x5e5   : > { %743 = vadd.xlane.f32.xlu0 %v742_v37 }
 0x5fb   : > { %748 = vrot.lane.b32.xlu0 %v1406_v10, %s1312_s14 }
 0x672   : > { %v744_v38 = vpop.xlane.xlu0 %743 }
 0x673   : > { %1270 = vrcp.f32 %v744_v38 }
 0x676   : > { %v749_v39 = vpop.permute.xlu0 %748 }
 0x677   : > { %v754_v40 = vsel %vm430_vm6, %v749_v39, 0 }
 0x678   : > { %1207 = vmatpush3.bf16.msra.mxu0 %v754_v40 }
 0x679   : > { %1218 = vmatprep.subr.bf16.mxu0 %v1301_v1 }
 0x67d   : > { %v1271_v41 = vpop.eup %1270 }
 0x67e   : > { %v746_v42 = vmul.f32 %v1271_v41, %v1269_v36 }
 0x680   : > { %v747_v44 = vpack.c.bf16 %v746_v42, %v746_v42  ;;  %v1126_v42 = vld [vmem:[%s1538_s7] ss:$0 sm:$0xff] }
 0x682   : > { %1209 = vmatmul.mubr.msk.bf16.vlgmr.msra.gmra.mrb[16].mxu0 %vm364_vm2, %v747_v44 }
 0x683   : > { %1219 = vmatpush3.bf16.xpose.msra.mxu0 %v854_v45  ;;  %1220 = vmatprep.mubr.msk.bf16.mxu0 %vm1302_vm0, %v1301_v1 }
 0x684   : > { %1230 = vmatprep.subr.bf16.mxu0 %v1301_v1 }
 0x68a   : > { %1221 = vmatmul.mubr.msk.bf16.vlgmr.msra.gmra.mrb[20].mxu0 %vm364_vm2, %v847_v46 }
 0x68b   : > { %1232 = vmatprep.mubr.msk.bf16.mxu0 %vm1302_vm0, %v1301_v1  ;;  %1231 = vmatpush3.bf16.msra.mxu0 %v965_v7 }
 0x755   : > { %v790_v50 = vpop.f32.mrb[16].mxu0 }
 0x756   : > { %v796_v51 = vpack.c.bf16 %v790_v50, %v790_v50  ;;  %v1210_v52 = vpop.f32.mrb[17].mxu0 }
 0x757   : > { %v793_v53 = vpop.f32.mrb[18].mxu0 }
 0x758   : > { %v1211_v54 = vpop.f32.mrb[19].mxu0  ;;  %1215 = vmatmul.mubr.msk.bf16.vlgmr.msra.gmra.mrb[16].mxu1 %vm364_vm2, %v796_v51 }
 0x759   : > { %1226 = vmatprep.mubr.msk.bf16.mxu1 %vm1302_vm0, %v1301_v1 }
 0x75d   : > { %v890_v55 = vpop.f32.mrb[20].mxu0 }
 0x75e   : > { %v896_v56 = vmul.f32 0.35355338, %v890_v55  ;;  %v1222_v57 = vpop.f32.mrb[21].mxu0 }
 0x75f   : > { %v893_v58 = vpop.f32.mrb[22].mxu0 }
 0x760   : > { %v1223_v59 = vpop.f32.mrb[23].mxu0  ;;  %v897_v60 = vsel %vm1423_vm5, %v896_v56, -1e+09 }
 0x761   : > { %v898_v61 = vsel %vm364_vm2, %v897_v60, -inf }
 0x762   : > { %899 = vmax.xlane.f32.xlu0 %v898_v61 }
 0x778   : > { %910 = vrot.lane.b32.xlu0 %v1406_v10, %s1313_s19 }
 0x7ef   : > { %v900_v62 = vpop.xlane.xlu0 %899 }
 0x7f0   : > { %v901_v63 = vsub.f32 %v897_v60, %v900_v62 }
 0x7f2   : > { %v902_v0 = vmul.f32 1.442695, %v901_v63 }
 0x7f3   : > { %v911_v2 = vpop.permute.xlu0 %910 }
 0x7f4   : > { %1272 = vpow2.f32 %v902_v0  ;;  %v916_v1 = vsel %vm430_vm6, %v911_v2, 0 }
 0x7f5   : > { %1225 = vmatpush3.bf16.msra.mxu1 %v916_v1 }
 0x7fe   : > { %v1273_v4 = vpop.eup %1272 }
 0x7ff   : > { %v904_v5 = vsel %vm364_vm2, %v1273_v4, 0.0 }
 0x800   : > { %905 = vadd.xlane.f32.xlu1 %v904_v5 }
 0x82b   : > { %v839_v10 = vpop.f32.mrb[16].mxu1 }
 0x82c   : > { %v845_v8 = vadd.f32 %v839_v10, %v1470_v21  ;;  %v1216_v9 = vpop.f32.mrb[17].mxu1 }
 0x82d   : > { %v842_v11 = vpop.f32.mrb[18].mxu1 }
 0x82e   : > { %v1217_v12 = vpop.f32.mrb[19].mxu1 }
 0x88d   : > { %v906_v13 = vpop.xlane.xlu1 %905 }
 0x88e   : > { %1274 = vrcp.f32 %v906_v13 }
 0x898   : > { %v1275_v14 = vpop.eup %1274 }
 0x899   : > { %v908_v15 = vmul.f32 %v1275_v14, %v1273_v4 }
 0x89b   : > { %v909_v16 = vpack.c.bf16 %v908_v15, %v908_v15 }
 0x89d   : > { %1227 = vmatmul.mubr.msk.bf16.vlgmr.msra.gmra.mrb[20].mxu1 %vm364_vm2, %v909_v16 }
 0x970   : > { %v952_v17 = vpop.f32.mrb[20].mxu1 }
 0x971   : > { %v958_v18 = vpack.c.bf16 %v952_v17, %v952_v17  ;;  %v1228_v19 = vpop.f32.mrb[21].mxu1 }
 0x972   : > { %v955_v20 = vpop.f32.mrb[22].mxu1 }
 0x973   : > { %v1229_v23 = vpop.f32.mrb[23].mxu1  ;;  %1233 = vmatmul.mubr.msk.bf16.vlgmr.msra.gmra.mrb[24].mxu0 %vm364_vm2, %v958_v18 }
 0xa46   : > { %v1001_v24 = vpop.f32.mrb[24].mxu0 }
 0xa47   : > { %v1007_v25 = vadd.f32 %v1001_v24, %v845_v8  ;;  %v1234_v21 = vpop.f32.mrb[25].mxu0 }
 0xa48   : > { %v1004_v26 = vpop.f32.mrb[26].mxu0 }
 0xa49   : > { %v1008_v28 = vadd.f32 %v1007_v25, %v1396_v3  ;;  %v1235_v29 = vpop.f32.mrb[27].mxu0  ;;  %v1125_v3 = vld [vmem:[%s1537_s6] ss:$0 sm:$0xff] }
 0xa4b   : > { %v1016_v30 = vadd.f32 %v1124_v27, %v1008_v28 }
 0xa4d   : > { %v1019_v31 = vsel %vm308_vm1, %v1016_v30, 0.0 }
 0xa4e   : > { %1020 = vadd.xlane.f32.xlu1 %v1019_v31 }
 0xadb   : > { %v1021_v32 = vpop.xlane.xlu1 %1020 }
 0xadc   : > { %v1023_v33 = vmul.f32 0.03125, %v1021_v32 }
 0xade   : > { %v1024_v34 = vsub.f32 %v1016_v30, %v1023_v33 }
 0xae0   : > { %v1025_v35 = vmul.f32 %v1024_v34, %v1024_v34 }
 0xae2   : > { %v1026_v36 = vsel %vm308_vm1, %v1025_v35, 0.0 }
 0xae3   : > { %1027 = vadd.xlane.f32.xlu1 %v1026_v36 }
 0xb70   : > { %v1028_v37 = vpop.xlane.xlu1 %1027 }
 0xb71   : > { %v1029_v38 = vmul.f32 0.03125, %v1028_v37 }
 0xb73   : > { %v1030_v39 = vadd.f32 1e-05, %v1029_v38 }
 0xb75   : > { %1276 = vrsqrt.f32 %v1030_v39 }
 0xb7f   : > { %v1277_v40 = vpop.eup %1276 }
 0xb80   : > { %v1032_v41 = vmul.f32 %v1277_v40, %v1024_v34 }
 0xb82   : > { %v1039_v43 = vmul.f32 %v1125_v3, %v1032_v41 }
 0xb84   : > { %v1046_v44 = vadd.f32 %v1126_v42, %v1039_v43 }
 0xb86   : > { %1047 = vst.msk [vmem:[%s280_s30] sm:$0xff] %vm308_vm1, %v1046_v44 }
 0xb87 PF: > { %s24_s10 = sadd.s32 1, %s1298_s10  }
 0xb88   : > { %p21_p9 = scmp.ge.s32.totalorder %s24_s10, 4  }
 0xb8a   :  { %23 = sbr.rel (!%p21_p9) target bundleno = 16 (0x10), region = 78 }

// kernel: model_forward.16
= control target key start
LH: loop header
LB: loop body
LE: loop exit
PB: predicated region body
PF: predicated region fallthrough
CT: control target
= control target key end

     0   :  { %s1747_s0 = inlined_call_operand.vmem [shape: s32[2], index: 0, kind: input, shape index: {}]   ;;  %s1748_s1 = inlined_call_operand.vmem [shape: f32[2,8,32], index: 1, kind: input, shape index: {}]   ;;  %s1749_s2 = inlined_call_operand.vmem [shape: f32[2,8,32], index: 2, kind: input, shape index: {}]   ;;  %s1750_s3 = inlined_call_operand.vmem [shape: bf16[32,32], index: 3, kind: input, shape index: {}]   ;;  %s1751_s4 = inlined_call_operand.vmem [shape: f32[1,32], index: 4, kind: input, shape index: {}]   ;;  %s1752_s5 = inlined_call_operand.vmem [shape: bf16[32,64], index: 5, kind: input, shape index: {}]   ;;  %s1753_s6 = inlined_call_operand.vmem [shape: f32[1,64], index: 6, kind: input, shape index: {}]   ;;  %s1754_s7 = inlined_call_operand.vmem [shape: f32[32,32], index: 7, kind: input, shape index: {}]   ;;  %s1755_s8 = inlined_call_operand.vmem [shape: f32[1,32], index: 8, kind: input, shape index: {}]   ;;  %s1756_s9 = inlined_call_operand.vmem [shape: f32[1,32], index: 9, kind: input, shape index: {}]   ;;  %s1757_s10 = inlined_call_operand.vmem [shape: f32[1,32], index: 10, kind: input, shape index: {}]   ;;  %s1758_s11 = inlined_call_operand.vmem [shape: f32[2,8,32], index: 11, kind: output, shape index: {}]  }
   0x1   :  { %s16_s19 = sshll.u32 %s1747_s0, 4  ;;  %s17_s19 = int_to_ptr.vmem [resolvable:$true] %s16_s19 }
   0x2   :  { %s1466_s20 = scalar_lea.vmem %s17_s19, 16  ;;  %p1471_p1 = scmp.lt.s32.totalorder %s17_s19, %s17_s19 }
   0x3   :  { %p1467_p0 = scmp.ne.s32.totalorder %s17_s19, %s1466_s20  ;;  %p1472_p2 = scmp.lt.s32.totalorder %s1466_s20, %s1466_s20 }
   0x5   :  { %p1473_p3 = por %p1472_p2, %p1471_p1 }
   0x7   :  { %p1474_p4 = pnand %p1473_p3, %p1467_p0 }
   0x9   :  { %1477 = shalt.err (!%p1474_p4)  }
   0xa   :  { %s1488_s21 = smov [#allocation3]  }
   0xb   :  { %19 = dma.vmem_to_smem %s17_s19, 16, %s1488_s21, [#allocation2] }
   0xc   :  { %1482 = dma.done.wait [#allocation2], 16 }
   0xd   :  { %1483 = vsyncadd [#allocation2], 4294967280 }
   0xe   :  { %21 = sfence }
   0xf   :  { %s1561_s22 = smov 0  }
  0x10 LB: > { %s1567_s0 = sadd.s32 4294967295, %s1486_s22   ;;  %p1279_p5 = scmp.ge.s32.totalorder %s1486_s22, 1  ;;  %s1486_s22 = sphi %s1561_s22, %s27_s22  }
  0x11   : > { %p327_p6 = scmp.lt.s32.totalorder %s1486_s22, 3 }
  0x13   : > { %p328_p7 = pnand %p1279_p5, %p327_p6 }
  0x14   : > { %v1444_v0 = vld [vmem:[%s1752_s5] sm:$0xff] (!%p328_p7)   ;;  %v1489_v1 = vmov (!%p328_p7), 0.0   ;;  %v1445_v2 = vld [vmem:[%s1752_s5 + $0x8] sm:$0xff] (!%p328_p7)   ;;  %vm1490_vm0 = vmmov (!%p328_p7), 0   ;;  %p367_p8 = scmp.lt.s32.totalorder (!%p328_p7), %s1567_s0, 1  ;;  %vm407_vm1 = vcmask (!%p328_p7), 261120   ;;  %v518_v27 = vlaneseq (!%p328_p7) }
  0x15   : > { %331 = sbr.rel (%p328_p7) target bundleno = 2943 (0xb7f), region = 60  ;;  %1346 = vmatprep.subr.bf16.mxu1 (!%p328_p7), %v1489_v1  ;;  %1338 = vmatprep.subr.bf16.mxu0 (!%p328_p7), %v1489_v1  ;;  %v1446_v3 = vld [vmem:[%s1750_s3] sm:$0xff] (!%p328_p7)   ;;  %v1447_v4 = vld [vmem:[%s1750_s3 + $0x8] sm:$0xff] (!%p328_p7)   ;;  %vm524_vm2 = vcmask (!%p328_p7), 64512   ;;  %s1491_s25 = smov (!%p328_p7), 120   ;;  %vm591_vm4 = vcmask (!%p328_p7), 1043456  }
  0x16   : > { %1347 = vmatpush3.bf16.msra.mxu1 (!%p328_p7), %v1444_v0  ;;  %1350 = vmatprep.mubr.msk.bf16.mxu1 (!%p328_p7), %vm1490_vm0, %v1489_v1  ;;  %v1287_v9 = vld [vmem:[%s1753_s6] ss:$0 sm:$0xff] (!%p328_p7)  ;;  %s380_s26 = sld [smem:[#allocation3 + %s1567_s0]] (!%p328_p7)  ;;  %v519_v28 = vand.u32 (!%p328_p7), 127, %v518_v27  ;;  %s1493_s27 = smov (!%p328_p7), 88   ;;  %v752_v61 = vld [vmem:[%s1754_s7 + $0x8] sm:$0xff] (!%p328_p7) }
  0x17   : > { %1348 = vmatprep.subr.bf16.mxu1 (!%p328_p7), %v1489_v1  ;;  %1342 = vmatprep.mubr.msk.bf16.mxu0 (!%p328_p7), %vm1490_vm0, %v1489_v1  ;;  %v1283_v10 = vld [vmem:[%s1751_s4] ss:$0 sm:$0xff] (!%p328_p7)  ;;  %s1494_s28 = smov (!%p328_p7), 112   ;;  %v753_v62 = vpack.c.bf16 (!%p328_p7), %v752_v61, %v752_v61  ;;  %s1495_s15 = smov (!%p328_p7), 80  }
  0x18   : > { %1339 = vmatpush3.bf16.msra.mxu0 (!%p328_p7), %v1446_v3 }
  0x19   : > { %1340 = vmatprep.subr.bf16.mxu0 (!%p328_p7), %v1489_v1  ;;  %v758_v63 = vsel (!%p328_p7), %vm591_vm4, %v753_v62, 0 }
  0x1a   : > { %1349 = vmatpush3.bf16.msra.mxu1 (!%p328_p7), %v1445_v2 }
  0x1b   : > { %1360 = vmatprep.subr.bf16.mxu1 (!%p328_p7), %v1489_v1 }
  0x1c   : > { %s368_s29 = scalar_select %p367_p8, %s1567_s0, 1  ;;  %1341 = vmatpush3.bf16.msra.mxu0 %v1447_v4  ;;  %v520_v29 = vstv %s380_s26  ;;  %v636_v4 = vld [vmem:[%s1754_s7] sm:$0xff] }
  0x1d   : > { %1354 = vmatprep.subr.bf16.mxu0 %v1489_v1  ;;  %vm1640_vm3 = vcmp.lt.s32.totalorder %v519_v28, %v520_v29  ;;  %s1492_s0 = smov 96  }
  0x1e   : > { %s1593_s13 = sshll.u32 %s368_s29, 3 }
  0x1f   : > { %s374_s16 = scalar_lea.vmem %s1749_s2, %s1593_s13  ;;  %s370_s19 = scalar_lea.vmem %s1748_s1, %s1593_s13 }
  0x20   : > { %v382_v5 = vld [vmem:[%s374_s16] sm:$0xff]  ;;  %s1496_s16 = smov 104   ;;  %s378_s30 = scalar_lea.vmem %s1758_s11, %s1593_s13 }
  0x21   : > { %v451_v6 = vpack.c.bf16 %v382_v5, %v382_v5  ;;  %v1604_v7 = vld [vmem:[%s370_s19] sm:$0xff]  ;;  %v637_v5 = vpack.c.bf16 %v636_v4, %v636_v4  ;;  %s1497_s19 = smov 72  }
  0x22   : > { %v383_v8 = vpack.c.bf16 %v1604_v7, %v1604_v7 }
  0x23   : > { %1351 = vmatmul.mubr.msk.bf16.vlgmr.msra.gmra.mrb[0].mxu1 %vm407_vm1, %v451_v6 }
  0x24   : > { %1343 = vmatmul.mubr.msk.bf16.vlgmr.msra.gmra.mrb[0].mxu0 %vm407_vm1, %v383_v8  ;;  %1362 = vmatprep.mubr.msk.bf16.mxu1 %vm1490_vm0, %v1489_v1 }
  0x25   : > { %1356 = vmatprep.mubr.msk.bf16.mxu0 %vm1490_vm0, %v1489_v1 }
  0xf6   : > { %v512_v11 = vpop.f32.mrb[0].mxu1 }
  0xf7   : > { %v513_v12 = vadd.f32 %v1287_v9, %v512_v11  ;;  %v1352_v13 = vpop.f32.mrb[1].mxu1  ;;  %v445_v14 = vpop.f32.mrb[0].mxu0 }
  0xf8   : > { %v515_v15 = vpop.f32.mrb[2].mxu1  ;;  %v446_v16 = vadd.f32 %v1283_v10, %v445_v14  ;;  %v1344_v17 = vpop.f32.mrb[1].mxu0  ;;  %v804_v10 = vsel %vm591_vm4, %v637_v5, 0 }
  0xf9   : > { %v1621_v18 = vpack.c.bf16 %v513_v12, %v513_v12  ;;  %v1353_v19 = vpop.f32.mrb[3].mxu1  ;;  %v448_v20 = vpop.f32.mrb[2].mxu0 }
  0xfa   : > { %v1345_v21 = vpop.f32.mrb[3].mxu0  ;;  %v1624_v22 = vpack.c.bf16 %v446_v16, %v446_v16 }
  0xfb   : > { %641 = vrot.lane.b32.xlu0 %v1621_v18, %s1491_s25  ;;  %v529_v23 = vsel %vm524_vm2, %v1621_v18, 0 }
  0xfc   : > { %1355 = vmatpush3.bf16.xpose.msra.mxu0 %v529_v23 }
  0xfd   : > { %1366 = vmatprep.subr.bf16.mxu0 %v1489_v1 }
  0xff   : > { %639 = vrot.lane.b32.xlu0 %v1624_v22, %s1491_s25 }
 0x103   : > { %1357 = vmatmul.mubr.msk.bf16.vlgmr.msra.gmra.mrb[4].mxu0 %vm524_vm2, %v1624_v22 }
 0x104   : > { %1368 = vmatprep.mubr.msk.bf16.mxu0 %vm1490_vm0, %v1489_v1 }
 0x16d   : > { %v642_v24 = vpop.permute.xlu0 %641 }
 0x16e   : > { %v647_v25 = vsel %vm524_vm2, %v642_v24, 0 }
 0x16f   : > { %1367 = vmatpush3.bf16.xpose.msra.mxu0 %v647_v25 }
 0x170   : > { %1378 = vmatprep.subr.bf16.mxu0 %v1489_v1 }
 0x171   : > { %v640_v26 = vpop.permute.xlu0 %639 }
 0x176   : > { %1369 = vmatmul.mubr.msk.bf16.vlgmr.msra.gmra.mrb[8].mxu0 %vm524_vm2, %v640_v26 }
 0x177   : > { %1380 = vmatprep.mubr.msk.bf16.mxu0 %vm1490_vm0, %v1489_v1  ;;  %1379 = vmatpush3.bf16.msra.mxu0 %v758_v63 }
 0x178   : > { %1390 = vmatprep.subr.bf16.mxu0 %v1489_v1 }
 0x1d6   : > { %v565_v30 = vpop.f32.mrb[4].mxu0 }
 0x1d7   : > { %v571_v32 = vmul.f32 0.35355338, %v565_v30  ;;  %v1358_v33 = vpop.f32.mrb[5].mxu0 }
 0x1d8   : > { %v568_v34 = vpop.f32.mrb[6].mxu0 }
 0x1d9   : > { %v1359_v35 = vpop.f32.mrb[7].mxu0  ;;  %v572_v36 = vsel %vm1640_vm3, %v571_v32, -1e+09 }
 0x1da   : > { %v573_v37 = vsel %vm524_vm2, %v572_v36, -inf }
 0x1db   : > { %574 = vmax.xlane.f32.xlu1 %v573_v37 }
 0x249   : > { %v683_v38 = vpop.f32.mrb[8].mxu0 }
 0x24a   : > { %v689_v39 = vmul.f32 0.35355338, %v683_v38  ;;  %v1370_v40 = vpop.f32.mrb[9].mxu0 }
 0x24b   : > { %v686_v41 = vpop.f32.mrb[10].mxu0 }
 0x24c   : > { %v1371_v42 = vpop.f32.mrb[11].mxu0  ;;  %v690_v43 = vsel %vm1640_vm3, %v689_v39, -1e+09 }
 0x24d   : > { %v691_v44 = vsel %vm524_vm2, %v690_v43, -inf }
 0x24e   : > { %692 = vmax.xlane.f32.xlu1 %v691_v44 }
 0x25f   : > { %586 = vrot.lane.b32.xlu1 %v1621_v18, %s1492_s0 }
 0x268   : > { %v575_v45 = vpop.xlane.xlu1 %574 }
 0x269   : > { %v576_v46 = vsub.f32 %v572_v36, %v575_v45 }
 0x26b   : > { %v577_v47 = vmul.f32 1.442695, %v576_v46 }
 0x26d   : > { %1448 = vpow2.f32 %v577_v47 }
 0x277   : > { %v1449_v48 = vpop.eup %1448 }
 0x278   : > { %v579_v49 = vsel %vm524_vm2, %v1449_v48, 0.0 }
 0x279   : > { %580 = vadd.xlane.f32.xlu0 %v579_v49 }
 0x2db   : > { %v693_v50 = vpop.xlane.xlu1 %692 }
 0x2dc   : > { %v694_v51 = vsub.f32 %v690_v43, %v693_v50 }
 0x2de   : > { %v695_v52 = vmul.f32 1.442695, %v694_v51 }
 0x2df   : > { %v587_v53 = vpop.permute.xlu1 %586 }
 0x2e0   : > { %1450 = vpow2.f32 %v695_v52  ;;  %v593_v54 = vsel %vm591_vm4, %v587_v53, 0 }
 0x2e1   : > { %1361 = vmatpush3.bf16.msra.mxu1 %v593_v54 }
 0x2e2   : > { %1372 = vmatprep.subr.bf16.mxu1 %v1489_v1 }
 0x2ea   : > { %v1451_v55 = vpop.eup %1450 }
 0x2eb   : > { %v697_v56 = vsel %vm524_vm2, %v1451_v55, 0.0 }
 0x2ec   : > { %698 = vadd.xlane.f32.xlu1 %v697_v56  ;;  %v959_v56 = vld [vmem:[%s1754_s7 + $0x10] sm:$0xff] }
 0x2fd   : > { %703 = vrot.lane.b32.xlu1 %v1621_v18, %s1493_s27 }
 0x301   : > { %848 = vrot.lane.b32.xlu1 %v1621_v18, %s1494_s28 }
 0x305   : > { %846 = vrot.lane.b32.xlu1 %v1624_v22, %s1494_s28 }
 0x306   : > { %v581_v57 = vpop.xlane.xlu0 %580 }
 0x307   : > { %1452 = vrcp.f32 %v581_v57  ;;  %v960_v57 = vpack.c.bf16 %v959_v56, %v959_v56 }
 0x311   : > { %v1453_v58 = vpop.eup %1452 }
 0x312   : > { %v583_v59 = vmul.f32 %v1453_v58, %v1449_v48  ;;  %v965_v58 = vsel %vm591_vm4, %v960_v57, 0 }
 0x314   : > { %v584_v60 = vpack.c.bf16 %v583_v59, %v583_v59 }
 0x316   : > { %1363 = vmatmul.mubr.msk.bf16.vlgmr.msra.gmra.mrb[4].mxu1 %vm524_vm2, %v584_v60 }
 0x317   : > { %1374 = vmatprep.mubr.msk.bf16.mxu1 %vm1490_vm0, %v1489_v1 }
 0x379   : > { %v699_v0 = vpop.xlane.xlu1 %698 }
 0x37a   : > { %1454 = vrcp.f32 %v699_v0 }
 0x37d   : > { %v704_v2 = vpop.permute.xlu1 %703 }
 0x37e   : > { %v709_v3 = vsel %vm591_vm4, %v704_v2, 0 }
 0x37f   : > { %1373 = vmatpush3.bf16.msra.mxu1 %v709_v3 }
 0x380   : > { %1384 = vmatprep.subr.bf16.mxu1 %v1489_v1 }
 0x381   : > { %v849_v16 = vpop.permute.xlu1 %848 }
 0x382   : > { %v854_v23 = vsel %vm524_vm2, %v849_v16, 0 }
 0x384   : > { %v1455_v6 = vpop.eup %1454 }
 0x385   : > { %v701_v8 = vmul.f32 %v1455_v6, %v1451_v55  ;;  %v847_v25 = vpop.permute.xlu1 %846 }
 0x387   : > { %v702_v9 = vpack.c.bf16 %v701_v8, %v701_v8 }
 0x389   : > { %1375 = vmatmul.mubr.msk.bf16.vlgmr.msra.gmra.mrb[8].mxu1 %vm524_vm2, %v702_v9 }
 0x38a   : > { %1385 = vmatpush3.bf16.msra.mxu1 %v804_v10  ;;  %1386 = vmatprep.mubr.msk.bf16.mxu1 %vm1490_vm0, %v1489_v1 }
 0x38b   : > { %1396 = vmatprep.subr.bf16.mxu1 %v1489_v1 }
 0x3e9   : > { %v629_v11 = vpop.f32.mrb[4].mxu1 }
 0x3ea   : > { %v635_v12 = vpack.c.bf16 %v629_v11, %v629_v11  ;;  %v1364_v13 = vpop.f32.mrb[5].mxu1 }
 0x3eb   : > { %v632_v14 = vpop.f32.mrb[6].mxu1 }
 0x3ec   : > { %v1365_v15 = vpop.f32.mrb[7].mxu1  ;;  %1387 = vmatmul.mubr.msk.bf16.vlgmr.msra.gmra.mrb[12].mxu1 %vm524_vm2, %v635_v12 }
 0x3ed   : > { %1398 = vmatprep.mubr.msk.bf16.mxu1 %vm1490_vm0, %v1489_v1 }
 0x45c   : > { %v745_v17 = vpop.f32.mrb[8].mxu1 }
 0x45d   : > { %v751_v19 = vpack.c.bf16 %v745_v17, %v745_v17  ;;  %v1376_v20 = vpop.f32.mrb[9].mxu1 }
 0x45e   : > { %v748_v21 = vpop.f32.mrb[10].mxu1 }
 0x45f   : > { %v1377_v24 = vpop.f32.mrb[11].mxu1  ;;  %1381 = vmatmul.mubr.msk.bf16.vlgmr.msra.gmra.mrb[12].mxu0 %vm524_vm2, %v751_v19 }
 0x460   : > { %1391 = vmatpush3.bf16.xpose.msra.mxu0 %v854_v23  ;;  %1392 = vmatprep.mubr.msk.bf16.mxu0 %vm1490_vm0, %v1489_v1 }
 0x461   : > { %1402 = vmatprep.subr.bf16.mxu0 %v1489_v1 }
 0x467   : > { %1393 = vmatmul.mubr.msk.bf16.vlgmr.msra.gmra.mrb[16].mxu0 %vm524_vm2, %v847_v25 }
 0x468   : > { %1404 = vmatprep.mubr.msk.bf16.mxu0 %vm1490_vm0, %v1489_v1  ;;  %1403 = vmatpush3.bf16.msra.mxu0 %v965_v58 }
 0x469   : > { %1414 = vmatprep.subr.bf16.mxu0 %v1489_v1 }
 0x4bf   : > { %v840_v26 = vpop.f32.mrb[12].mxu1 }
 0x4c0   : > { %v1388_v27 = vpop.f32.mrb[13].mxu1 }
 0x4c1   : > { %v843_v28 = vpop.f32.mrb[14].mxu1 }
 0x4c2   : > { %v1389_v29 = vpop.f32.mrb[15].mxu1 }
 0x532   : > { %v794_v30 = vpop.f32.mrb[12].mxu0 }
 0x533   : > { %v1687_v32 = vadd.f32 %v840_v26, %v794_v30  ;;  %v1382_v33 = vpop.f32.mrb[13].mxu0 }
 0x534   : > { %v797_v34 = vpop.f32.mrb[14].mxu0 }
 0x535   : > { %v1383_v35 = vpop.f32.mrb[15].mxu0 }
 0x53a   : > { %v890_v36 = vpop.f32.mrb[16].mxu0 }
 0x53b   : > { %v896_v37 = vmul.f32 0.35355338, %v890_v36  ;;  %v1394_v38 = vpop.f32.mrb[17].mxu0 }
 0x53c   : > { %v893_v39 = vpop.f32.mrb[18].mxu0 }
 0x53d   : > { %v1395_v40 = vpop.f32.mrb[19].mxu0  ;;  %v897_v41 = vsel %vm1640_vm3, %v896_v37, -1e+09  ;;  %v1303_v37 = vld [vmem:[%s1755_s8] ss:$0 sm:$0xff] }
 0x53e   : > { %v898_v42 = vsel %vm524_vm2, %v897_v41, -inf }
 0x53f   : > { %899 = vmax.xlane.f32.xlu0 %v898_v42 }
 0x555   : > { %910 = vrot.lane.b32.xlu0 %v1621_v18, %s1495_s15 }
 0x559   : > { %1010 = vrot.lane.b32.xlu0 %v1621_v18, %s1496_s16 }
 0x55d   : > { %1008 = vrot.lane.b32.xlu0 %v1624_v22, %s1496_s16 }
 0x5cc   : > { %v900_v43 = vpop.xlane.xlu0 %899 }
 0x5cd   : > { %v901_v44 = vsub.f32 %v897_v41, %v900_v43 }
 0x5cf   : > { %v902_v45 = vmul.f32 1.442695, %v901_v44 }
 0x5d0   : > { %v911_v46 = vpop.permute.xlu0 %910 }
 0x5d1   : > { %1456 = vpow2.f32 %v902_v45  ;;  %v916_v47 = vsel %vm591_vm4, %v911_v46, 0 }
 0x5d2   : > { %1397 = vmatpush3.bf16.msra.mxu1 %v916_v47 }
 0x5d3   : > { %1408 = vmatprep.subr.bf16.mxu1 %v1489_v1 }
 0x5d4   : > { %v1011_v53 = vpop.permute.xlu0 %1010 }
 0x5d5   : > { %v1016_v54 = vsel %vm524_vm2, %v1011_v53, 0 }
 0x5d8   : > { %v1009_v55 = vpop.permute.xlu0 %1008 }
 0x5db   : > { %v1457_v48 = vpop.eup %1456 }
 0x5dc   : > { %v904_v49 = vsel %vm524_vm2, %v1457_v48, 0.0 }
 0x5dd   : > { %905 = vadd.xlane.f32.xlu1 %v904_v49 }
 0x66a   : > { %v906_v50 = vpop.xlane.xlu1 %905 }
 0x66b   : > { %1458 = vrcp.f32 %v906_v50 }
 0x675   : > { %v1459_v51 = vpop.eup %1458 }
 0x676   : > { %v908_v52 = vmul.f32 %v1459_v51, %v1457_v48 }
 0x678   : > { %v909_v22 = vpack.c.bf16 %v908_v52, %v908_v52  ;;  %v1305_v52 = vld [vmem:[%s1757_s10] ss:$0 sm:$0xff] }
 0x67a   : > { %1399 = vmatmul.mubr.msk.bf16.vlgmr.msra.gmra.mrb[16].mxu1 %vm524_vm2, %v909_v22 }
 0x67b   : > { %1409 = vmatpush3.bf16.xpose.msra.mxu1 %v1016_v54  ;;  %1410 = vmatprep.mubr.msk.bf16.mxu1 %vm1490_vm0, %v1489_v1 }
 0x67c   : > { %1420 = vmatprep.subr.bf16.mxu1 %v1489_v1 }
 0x682   : > { %1411 = vmatmul.mubr.msk.bf16.vlgmr.msra.gmra.mrb[20].mxu1 %vm524_vm2, %v1009_v55 }
 0x683   : > { %1422 = vmatprep.mubr.msk.bf16.mxu1 %vm1490_vm0, %v1489_v1 }
 0x74d   : > { %v952_v59 = vpop.f32.mrb[16].mxu1 }
 0x74e   : > { %v958_v60 = vpack.c.bf16 %v952_v59, %v952_v59  ;;  %v1400_v61 = vpop.f32.mrb[17].mxu1 }
 0x74f   : > { %v955_v62 = vpop.f32.mrb[18].mxu1 }
 0x750   : > { %v1401_v63 = vpop.f32.mrb[19].mxu1  ;;  %1405 = vmatmul.mubr.msk.bf16.vlgmr.msra.gmra.mrb[20].mxu0 %vm524_vm2, %v958_v60 }
 0x751   : > { %1416 = vmatprep.mubr.msk.bf16.mxu0 %vm1490_vm0, %v1489_v1  ;;  %v1121_v1 = vld [vmem:[%s1754_s7 + $0x18] sm:$0xff] }
 0x752   : > { %v1122_v31 = vpack.c.bf16 %v1121_v1, %v1121_v1 }
 0x754   : > { %v1127_v14 = vsel %vm591_vm4, %v1122_v31, 0 }
 0x755   : > { %v1052_v0 = vpop.f32.mrb[20].mxu1  ;;  %1421 = vmatpush3.bf16.msra.mxu1 %v1127_v14 }
 0x756   : > { %v1058_v2 = vmul.f32 0.35355338, %v1052_v0  ;;  %v1412_v3 = vpop.f32.mrb[21].mxu1 }
 0x757   : > { %v1055_v4 = vpop.f32.mrb[22].mxu1 }
 0x758   : > { %v1413_v5 = vpop.f32.mrb[23].mxu1  ;;  %v1059_v6 = vsel %vm1640_vm3, %v1058_v2, -1e+09 }
 0x759   : > { %v1060_v8 = vsel %vm524_vm2, %v1059_v6, -inf }
 0x75a   : > { %1061 = vmax.xlane.f32.xlu0 %v1060_v8 }
 0x7e7   : > { %v1062_v9 = vpop.xlane.xlu0 %1061 }
 0x7e8   : > { %v1063_v10 = vsub.f32 %v1059_v6, %v1062_v9 }
 0x7ea   : > { %v1064_v11 = vmul.f32 1.442695, %v1063_v10 }
 0x7ec   : > { %1460 = vpow2.f32 %v1064_v11 }
 0x7f6   : > { %v1461_v12 = vpop.eup %1460 }
 0x7f7   : > { %v1066_v13 = vsel %vm524_vm2, %v1461_v12, 0.0 }
 0x7f8   : > { %1067 = vadd.xlane.f32.xlu1 %v1066_v13 }
 0x809   : > { %1072 = vrot.lane.b32.xlu1 %v1621_v18, %s1497_s19 }
 0x823   : > { %v1001_v15 = vpop.f32.mrb[20].mxu0 }
 0x824   : > { %v1007_v16 = vadd.f32 %v1001_v15, %v1687_v32  ;;  %v1406_v17 = vpop.f32.mrb[21].mxu0 }
 0x825   : > { %v1004_v19 = vpop.f32.mrb[22].mxu0 }
 0x826   : > { %v1407_v20 = vpop.f32.mrb[23].mxu0 }
 0x885   : > { %v1068_v21 = vpop.xlane.xlu1 %1067 }
 0x886   : > { %1462 = vrcp.f32 %v1068_v21 }
 0x889   : > { %v1073_v23 = vpop.permute.xlu1 %1072 }
 0x88a   : > { %v1078_v24 = vsel %vm591_vm4, %v1073_v23, 0 }
 0x88b   : > { %1415 = vmatpush3.bf16.msra.mxu0 %v1078_v24 }
 0x890   : > { %v1463_v18 = vpop.eup %1462 }
 0x891   : > { %v1070_v25 = vmul.f32 %v1463_v18, %v1461_v12 }
 0x893   : > { %v1071_v26 = vpack.c.bf16 %v1070_v25, %v1070_v25 }
 0x895   : > { %1417 = vmatmul.mubr.msk.bf16.vlgmr.msra.gmra.mrb[24].mxu0 %vm524_vm2, %v1071_v26 }
 0x968   : > { %v1114_v27 = vpop.f32.mrb[24].mxu0 }
 0x969   : > { %v1120_v28 = vpack.c.bf16 %v1114_v27, %v1114_v27  ;;  %v1418_v29 = vpop.f32.mrb[25].mxu0 }
 0x96a   : > { %v1117_v30 = vpop.f32.mrb[26].mxu0 }
 0x96b   : > { %v1419_v33 = vpop.f32.mrb[27].mxu0  ;;  %1423 = vmatmul.mubr.msk.bf16.vlgmr.msra.gmra.mrb[24].mxu1 %vm524_vm2, %v1120_v28 }
 0xa3e   : > { %v1163_v32 = vpop.f32.mrb[24].mxu1 }
 0xa3f   : > { %v1169_v34 = vadd.f32 %v1163_v32, %v1007_v16  ;;  %v1424_v35 = vpop.f32.mrb[25].mxu1 }
 0xa40   : > { %v1166_v36 = vpop.f32.mrb[26].mxu1 }
 0xa41   : > { %v1170_v38 = vadd.f32 %v1169_v34, %v1604_v7  ;;  %v1425_v39 = vpop.f32.mrb[27].mxu1  ;;  %v1304_v7 = vld [vmem:[%s1756_s9] ss:$0 sm:$0xff] }
 0xa43   : > { %v1178_v40 = vadd.f32 %v1303_v37, %v1170_v38 }
 0xa45   : > { %v1181_v41 = vsel %vm407_vm1, %v1178_v40, 0.0 }
 0xa46   : > { %1182 = vadd.xlane.f32.xlu1 %v1181_v41 }
 0xad3   : > { %v1183_v42 = vpop.xlane.xlu1 %1182 }
 0xad4   : > { %v1185_v43 = vmul.f32 0.03125, %v1183_v42 }
 0xad6   : > { %v1186_v44 = vsub.f32 %v1178_v40, %v1185_v43 }
 0xad8   : > { %v1187_v45 = vmul.f32 %v1186_v44, %v1186_v44 }
 0xada   : > { %v1188_v46 = vsel %vm407_vm1, %v1187_v45, 0.0 }
 0xadb   : > { %1189 = vadd.xlane.f32.xlu0 %v1188_v46 }
 0xb68   : > { %v1190_v47 = vpop.xlane.xlu0 %1189 }
 0xb69   : > { %v1191_v48 = vmul.f32 0.03125, %v1190_v47 }
 0xb6b   : > { %v1192_v49 = vadd.f32 1e-05, %v1191_v48 }
 0xb6d   : > { %1464 = vrsqrt.f32 %v1192_v49 }
 0xb77   : > { %v1465_v50 = vpop.eup %1464 }
 0xb78   : > { %v1194_v51 = vmul.f32 %v1465_v50, %v1186_v44 }
 0xb7a   : > { %v1201_v53 = vmul.f32 %v1304_v7, %v1194_v51 }
 0xb7c   : > { %v1208_v22 = vadd.f32 %v1305_v52, %v1201_v53 }
 0xb7e   : > { %1209 = vst.msk [vmem:[%s378_s30] sm:$0xff] %vm407_vm1, %v1208_v22 }
 0xb7f PF: > { %s27_s22 = sadd.s32 1, %s1486_s22  }
 0xb80   : > { %p24_p9 = scmp.ge.s32.totalorder %s27_s22, 4  }
 0xb82   :  { %26 = sbr.rel (!%p24_p9) target bundleno = 16 (0x10), region = 93 }

// kernel: model_forward.21
= control target key start
LH: loop header
LB: loop body
LE: loop exit
PB: predicated region body
PF: predicated region fallthrough
CT: control target
= control target key end

     0   :  { %10 = vsyncpa [#allocation3], 0  ;;  %vm28_vm0 = vcmask 261120   ;;  %s588_s0 = inlined_call_operand.vmem [shape: f32[16,32], index: 0, kind: input, shape index: {}]   ;;  %s589_s1 = inlined_call_operand.vmem [shape: f32[64,32], index: 1, kind: input, shape index: {}]   ;;  %s590_s2 = inlined_call_operand.vmem [shape: s32[16,1], index: 2, kind: input, shape index: {}]   ;;  %s591_s3 = inlined_call_operand.hbm [shape: f32[1,1], index: 3, kind: output, shape index: {0}]   ;;  %s592_s4 = inlined_call_operand.hbm [shape: f32[1,1], index: 4, kind: output, shape index: {1}]  }
   0x1   :  { %v20_v0 = vld [vmem:[%s589_s1] sm:$0xff]  ;;  %v21_v1 = vld [vmem:[%s589_s1 + $0x8] sm:$0xff]  ;;  %v22_v2 = vld [vmem:[%s589_s1 + $0x10] sm:$0xff] }
   0x2   :  { %v355_v3 = vpack.c.bf16 %v21_v1, %v20_v0  ;;  %vm483_vm1 = vmpackc.low %vm28_vm0, %vm28_vm0  ;;  %v23_v5 = vld [vmem:[%s589_s1 + $0x18] sm:$0xff]  ;;  %v18_v7 = vld [vmem:[%s588_s0] sm:$0xff] }
   0x3   :  { %v361_v6 = vpack.c.bf16 %v23_v5, %v22_v2 }
   0x4   :  { %357 = vmatprep.subr.msk.bf16.mxu0 %vm483_vm1, %v355_v3 }
   0x5   :  { %11 = vsyncpa [#allocation5], 0  ;;  %360 = vmatpush3.bf16.xpose.msk.msra.mxu0 %vm483_vm1, %v355_v3  ;;  %352 = vmatprep.mubr.msk.f32.mxu0 %vm28_vm0, %v18_v7  ;;  %v24_v8 = vld [vmem:[%s589_s1 + $0x20] sm:$0xff]  ;;  %v25_v9 = vld [vmem:[%s589_s1 + $0x28] sm:$0xff]  ;;  %vm146_vm2 = vcmask 523264   ;;  %v443_v19 = vmov 0   ;;  %v136_v20 = vlaneseq }
   0x6   :  { %363 = vmatprep.subr.msk.bf16.mxu0 %vm483_vm1, %v361_v6  ;;  %v367_v10 = vpack.c.bf16 %v25_v9, %v24_v8  ;;  %v26_v11 = vld [vmem:[%s589_s1 + $0x30] sm:$0xff]  ;;  %v27_v12 = vld [vmem:[%s589_s1 + $0x38] sm:$0xff]  ;;  %v19_v14 = vld [vmem:[%s588_s0 + $0x8] sm:$0xff]  ;;  %384 = vset.pattern.permute.xlu1 %v443_v19  ;;  %v444_v2 = vmov 0.0   ;;  %vm248_vm11 = vcmask 7168   ;;  %vm260_vm14 = vcmask 0  }
   0x7   :  { %v373_v13 = vpack.c.bf16 %v27_v12, %v26_v11  ;;  %383 = vset.pattern.permute.xlu0 %v443_v19  ;;  %v137_v21 = vand.u32 127, %v136_v20  ;;  %v535_v40 = vld [vmem:[%s590_s2] sm:$0xff]  ;;  %v541_v41 = vld [vmem:[%s590_s2 + $0x8] sm:$0xff]  ;;  %s445_s2 = smov [#allocation2]   ;;  %s446_s12 = smov [#allocation4]  }
   0x8   :  { %vm193_vm9 = vcmp.ne.s32.totalorder %v541_v41, 4294967196  ;;  %vm192_vm10 = vcmp.ne.s32.totalorder %v535_v40, 4294967196  ;;  %s290_s11 = sshll.u32 %s445_s2, 4  ;;  %s300_s13 = sshll.u32 %s446_s12, 4  ;;  %s291_s11 = int_to_ptr.vmem [resolvable:$true] %s290_s11  ;;  %s301_s13 = int_to_ptr.vmem [resolvable:$true] %s300_s13 }
   0x9   :  { %v323_v3 = vsel %vm193_vm9, 1.0, %v444_v2  ;;  %v322_v4 = vsel %vm192_vm10, 1.0, %v444_v2  ;;  %s395_s14 = scalar_lea.vmem %s291_s11, 16  ;;  %s399_s15 = scalar_lea.vmem %s291_s11, 32 }
   0xa   :  { %v272_v5 = vsel %vm248_vm11, %v323_v3, 0.0  ;;  %p396_p0 = scmp.ne.s32.totalorder %s291_s11, %s395_s14  ;;  %p400_p1 = scmp.lt.s32.totalorder %s291_s11, %s291_s11 }
   0xb   :  { %p401_p2 = scmp.lt.s32.totalorder %s399_s15, %s395_s14 }
   0xd   :  { %366 = vmatpush3.bf16.xpose.msk.msra.mxu0 %vm483_vm1, %v361_v6  ;;  %v271_v6 = vsel %vm248_vm11, %v322_v4, 0.0  ;;  %p402_p3 = por %p401_p2, %p400_p1 }
   0xe   :  { %369 = vmatprep.subr.msk.bf16.mxu0 %vm483_vm1, %v367_v10  ;;  %v273_v7 = vadd.f32 %v272_v5, %v271_v6 }
   0xf   :  { %p403_p4 = pnand %p402_p3, %p396_p0 }
  0x10   :  { %v274_v8 = vrot.slane %v273_v7, 4 }
  0x12   :  { %v275_v11 = vadd.f32 %v274_v8, %v273_v7 }
  0x15   :  { %372 = vmatpush3.bf16.xpose.msk.msra.mxu0 %vm483_vm1, %v367_v10 }
  0x16   :  { %375 = vmatprep.subr.msk.bf16.mxu0 %vm483_vm1, %v373_v13 }
  0x1d   :  { %378 = vmatpush3.bf16.xpose.msk.msra.mxu0 %vm483_vm1, %v373_v13 }
  0x24   :  { %353 = vmatmul.mubr.msk.f32.vlgmr.msra.gmra.mrb[0].mxu0 %vm28_vm0, %v19_v14 }
  0xf7   :  { %v354_v15 = vpop.f32.mrb[0].mxu0 }
  0xf8   :  { %v125_v16 = vpop.f32.mrb[1].mxu0  ;;  %v150_v18 = vsel %vm146_vm2, %v354_v15, -inf }
  0xf9   :  { %v147_v17 = vsel %vm146_vm2, %v125_v16, -inf }
  0xfa   :  { %148 = vmax.xlane.f32.xlu0 %v147_v17 }
  0xfe   :  { %151 = vmax.xlane.f32.xlu0 %v150_v18 }
 0x187   :  { %v149_v22 = vpop.xlane.xlu0 %148 }
 0x188   :  { %vm206_vm3 = vcmp.eq.f32.partialorder %v125_v16, %v149_v22  ;;  %v153_v24 = vsub.f32 %v125_v16, %v149_v22 }
 0x189   :  { %v208_v23 = vsel %vm206_vm3, %v137_v21, 64 }
 0x18a   :  { %v210_v25 = vsel %vm146_vm2, %v208_v23, 2147483647  ;;  %v155_v31 = vmul.f32 1.442695, %v153_v24 }
 0x18b   :  { %v152_v26 = vpop.xlane.xlu0 %151  ;;  %v212_v27 = vshra.s32 %v210_v25, 16  ;;  %v211_v42 = vand.u32 65535, %v210_v25 }
 0x18c   :  { %v154_v28 = vsub.f32 %v354_v15, %v152_v26  ;;  %vm207_vm4 = vcmp.eq.f32.partialorder %v354_v15, %v152_v26  ;;  %v276_v15 = vrot.slane %v275_v11, 2 }
 0x18d   :  { %v209_v29 = vsel %vm207_vm4, %v137_v21, 64  ;;  %v214_v30 = vcvt.s32.f32 %v212_v27  ;;  %v213_v44 = vcvt.s32.f32 %v211_v42 }
 0x18e   :  { %v157_v32 = vmul.f32 1.442695, %v154_v28  ;;  %v225_v33 = vsel %vm146_vm2, %v209_v29, 2147483647  ;;  %v277_v22 = vadd.f32 %v276_v15, %v275_v11 }
 0x18f   :  { %215 = vmin.xlane.f32.xlu0 %v214_v30  ;;  %v227_v34 = vshra.s32 %v225_v33, 16  ;;  %v226_v62 = vand.u32 65535, %v225_v33 }
 0x190   :  { %385 = vpow2.f32 %v157_v32 }
 0x191   :  { %v229_v35 = vcvt.s32.f32 %v227_v34  ;;  %387 = vpow2.f32 %v155_v31  ;;  %v228_v0 = vcvt.s32.f32 %v226_v62  ;;  %v278_v31 = vrot.slane %v277_v22, 1 }
 0x193   :  { %230 = vmin.xlane.f32.xlu1 %v229_v35  ;;  %v279_v42 = vadd.f32 %v278_v31, %v277_v22 }
 0x19a   :  { %v386_v36 = vpop.eup %385 }
 0x19b   :  { %v162_v37 = vsel %vm146_vm2, %v386_v36, 0.0  ;;  %v388_v38 = vpop.eup %387 }
 0x19c   :  { %163 = vadd.xlane.f32.xlu1 %v162_v37  ;;  %v159_v39 = vsel %vm146_vm2, %v388_v38, 0.0 }
 0x1a0   :  { %160 = vadd.xlane.f32.xlu1 %v159_v39 }
 0x1a5   :  { %139 = vperm.xlu0 %383, %v535_v40  }
 0x1b1   :  { %142 = vperm.xlu1 %384, %v541_v41  }
 0x21c   :  { %v216_v43 = vpop.xlane.xlu0 %215 }
 0x21d   :  { %vm217_vm5 = vcmp.eq.f32.partialorder %v214_v30, %v216_v43  ;;  %v222_v14 = vcvt.f32.s32 %v216_v43 }
 0x21e   :  { %v218_v45 = vsel %vm217_vm5, %v213_v44, inf }
 0x21f   :  { %219 = vmin.xlane.f32.xlu1 %v218_v45  ;;  %v223_v20 = vshll.u32 %v222_v14, 16 }
 0x220   :  { %v544_v46 = vpop.xlane.xlu1 %230 }
 0x221   :  { %vm232_vm8 = vcmp.eq.f32.partialorder %v229_v35, %v544_v46 }
 0x222   :  { %v233_v1 = vsel %vm232_vm8, %v228_v0, inf }
 0x224   :  { %v140_v57 = vpop.permute.xlu0 %139 }
 0x225   :  { %vm144_vm7 = vcmp.eq.s32.totalorder %v137_v21, %v140_v57 }
 0x229   :  { %v164_v47 = vpop.xlane.xlu1 %163 }
 0x22a   :  { %389 = vlog2.f32 %v164_v47 }
 0x22d   :  { %v161_v48 = vpop.xlane.xlu1 %160 }
 0x22e   :  { %391 = vlog2.f32 %v161_v48 }
 0x231   :  { %v143_v53 = vpop.permute.xlu1 %142 }
 0x232   :  { %vm145_vm6 = vcmp.eq.s32.totalorder %v137_v21, %v143_v53 }
 0x234   :  { %v390_v49 = vpop.eup %389 }
 0x235   :  { %v168_v50 = vmul.f32 0.6931472, %v390_v49  ;;  %v280_v49 = vmax.f32 %v279_v42, 1.0 }
 0x237   :  { %v170_v51 = vsub.f32 %v154_v28, %v168_v50  ;;  %v237_v28 = vcvt.f32.s32 %v544_v46  ;;  %393 = vrcp.f32 %v280_v49 }
 0x238   :  { %v392_v52 = vpop.eup %391 }
 0x239   :  { %v166_v54 = vmul.f32 0.6931472, %v392_v52  ;;  %v184_v55 = vsel %vm146_vm2, %v170_v51, 0.0  ;;  %v172_v59 = vsel %vm145_vm6, %v170_v51, 0.0  ;;  %v238_v35 = vshll.u32 %v237_v28, 16 }
 0x23a   :  { %185 = vadd.xlane.f32.xlu0 %v184_v55  ;;  %v176_v60 = vsel %vm146_vm2, %v172_v59, 0.0 }
 0x23b   :  { %v169_v56 = vsub.f32 %v153_v24, %v166_v54 }
 0x23d   :  { %v181_v58 = vsel %vm146_vm2, %v169_v56, 0.0  ;;  %v171_v61 = vsel %vm144_vm7, %v169_v56, 0.0 }
 0x23e   :  { %182 = vadd.xlane.f32.xlu1 %v181_v58  ;;  %v173_v63 = vsel %vm146_vm2, %v171_v61, 0.0 }
 0x242   :  { %177 = vadd.xlane.f32.xlu1 %v176_v60 }
 0x246   :  { %174 = vadd.xlane.f32.xlu1 %v173_v63 }
 0x24a   :  { %234 = vmin.xlane.f32.xlu1 %v233_v1  ;;  %v394_v1 = vpop.eup %393 }
 0x2ac   :  { %v220_v9 = vpop.xlane.xlu1 %219 }
 0x2ad   :  { %v221_v16 = vcvt.f32.s32 %v220_v9 }
 0x2af   :  { %v224_v23 = vadd.s32 %v223_v20, %v221_v16 }
 0x2b1   :  { %vm240_vm12 = vcmp.eq.s32.totalorder %v224_v23, %v535_v40 }
 0x2b2   :  { %v324_v39 = vsel %vm240_vm12, 1.0, %v444_v2 }
 0x2b3   :  { %v246_v45 = vmul.f32 %v324_v39, %v322_v4 }
 0x2b5   :  { %v262_v52 = vsel %vm248_vm11, %v246_v45, 0.0 }
 0x2c7   :  { %v186_v10 = vpop.xlane.xlu0 %185 }
 0x2c8   :  { %v189_v12 = vmul.f32 0.015625, %v186_v10 }
 0x2ca   :  { %v191_v17 = vsub.f32 0.0, %v189_v12 }
 0x2cb   :  { %v183_v13 = vpop.xlane.xlu1 %182 }
 0x2cc   :  { %v188_v18 = vmul.f32 0.015625, %v183_v13  ;;  %v201_v24 = vmul.f32 0.1, %v191_v17 }
 0x2ce   :  { %v190_v25 = vsub.f32 0.0, %v188_v18 }
 0x2cf   :  { %v178_v19 = vpop.xlane.xlu1 %177 }
 0x2d0   :  { %v180_v21 = vsub.f32 0.0, %v178_v19  ;;  %v200_v32 = vmul.f32 0.1, %v190_v25 }
 0x2d2   :  { %v199_v26 = vmul.f32 0.9, %v180_v21 }
 0x2d3   :  { %v175_v27 = vpop.xlane.xlu1 %174 }
 0x2d4   :  { %v203_v29 = vadd.f32 %v201_v24, %v199_v26  ;;  %v179_v30 = vsub.f32 0.0, %v175_v27 }
 0x2d6   :  { %v198_v33 = vmul.f32 0.9, %v179_v30  ;;  %v205_v36 = vmul.f32 %v323_v3, %v203_v29 }
 0x2d7   :  { %v235_v34 = vpop.xlane.xlu1 %234 }
 0x2d8   :  { %v202_v37 = vadd.f32 %v200_v32, %v198_v33  ;;  %v236_v38 = vcvt.f32.s32 %v235_v34  ;;  %v250_v47 = vsel %vm248_vm11, %v205_v36, 0.0 }
 0x2da   :  { %v204_v43 = vmul.f32 %v322_v4, %v202_v37  ;;  %v239_v44 = vadd.s32 %v238_v35, %v236_v38 }
 0x2dc   :  { %v249_v46 = vsel %vm248_vm11, %v204_v43, 0.0  ;;  %vm241_vm13 = vcmp.eq.s32.totalorder %v239_v44, %v541_v41 }
 0x2dd   :  { %v251_v48 = vadd.f32 %v250_v47, %v249_v46  ;;  %v325_v40 = vsel %vm241_vm13, 1.0, %v444_v2 }
 0x2de   :  { %v247_v50 = vmul.f32 %v325_v40, %v323_v3 }
 0x2df   :  { %v252_v51 = vrot.slane %v251_v48, 4 }
 0x2e0   :  { %v263_v53 = vsel %vm248_vm11, %v247_v50, 0.0 }
 0x2e1   :  { %v264_v54 = vadd.f32 %v263_v53, %v262_v52  ;;  %v253_v55 = vadd.f32 %v252_v51, %v251_v48 }
 0x2e3   :  { %v265_v56 = vrot.slane %v264_v54, 4  ;;  %v254_v57 = vrot.slane %v253_v55, 2 }
 0x2e5   :  { %v255_v58 = vadd.f32 %v254_v57, %v253_v55  ;;  %v266_v59 = vadd.f32 %v265_v56, %v264_v54 }
 0x2e7   :  { %v256_v60 = vrot.slane %v255_v58, 1  ;;  %v267_v61 = vrot.slane %v266_v59, 2 }
 0x2e9   :  { %v257_v41 = vadd.f32 %v256_v60, %v255_v58  ;;  %v268_v62 = vadd.f32 %v267_v61, %v266_v59 }
 0x2eb   :  { %v259_v63 = vmul.f32 0.5, %v257_v41  ;;  %v269_v0 = vrot.slane %v268_v62, 1 }
 0x2ed   :  { %261 = vst.msk [vmem:[#allocation2] sm:$0x1] %vm260_vm14, %v259_v63  ;;  %v270_v2 = vadd.f32 %v269_v0, %v268_v62 }
 0x2ee   :  { %406 = shalt.err (!%p403_p4)
}
 0x2ef   :  { %s407_s18 = scalar_lea.hbm %s591_s3, 16 }
 0x2f0   :  { %p408_p5 = scmp.ne.s32.totalorder %s591_s3, %s407_s18  ;;  %p411_p6 = scmp.lt.u32.totalorder %s407_s18, %s591_s3 }
 0x2f2   :  { %p413_p7 = pnand %p411_p6, %p408_p5 }
 0x2f4   :  { %416 = shalt.err (!%p413_p7)
}
 0x2f5   :  { %293 = dma.vmem_to_hbm [thread:$0]  %s291_s11, 16, %s591_s3, [#allocation3]   ;;  %v282_v3 = vmul.f32 %v394_v1, %v270_v2 }
 0x2f6   :  { %s417_s25 = scalar_lea.vmem %s301_s13, 16  ;;  %s421_s26 = scalar_lea.vmem %s301_s13, 32 }
 0x2f7   :  { %283 = vst.msk [vmem:[#allocation4] sm:$0x1] %vm260_vm14, %v282_v3  ;;  %p418_p8 = scmp.ne.s32.totalorder %s301_s13, %s417_s25  ;;  %p422_p9 = scmp.lt.s32.totalorder %s301_s13, %s301_s13 }
 0x2f8   :  { %p423_p10 = scmp.lt.s32.totalorder %s421_s26, %s417_s25 }
 0x2fa   :  { %p424_p11 = por %p423_p10, %p422_p9 }
 0x2fc   :  { %p425_p12 = pnand %p424_p11, %p418_p8 }
 0x2fe   :  { %428 = shalt.err (!%p425_p12)
}
 0x2ff   :  { %s429_s29 = scalar_lea.hbm %s592_s4, 16 }
 0x300   :  { %p430_p13 = scmp.ne.s32.totalorder %s592_s4, %s429_s29  ;;  %p433_p0 = scmp.lt.u32.totalorder %s429_s29, %s592_s4 }
 0x302   :  { %p435_p1 = pnand %p433_p0, %p430_p13 }
 0x304   :  { %438 = shalt.err (!%p435_p1)
}
 0x305   :  { %303 = dma.vmem_to_hbm [thread:$0]  %s301_s13, 16, %s592_s4, [#allocation5]  }
 0x306   :  { %439 = dma.done.wait [#allocation3], 16  }
 0x307   :  { %440 = vsyncadd [#allocation3], 4294967280 }
 0x308   :  { %441 = dma.done.wait [#allocation5], 16  }
 0x309   :  { %442 = vsyncadd [#allocation5], 4294967280 }
 0x30a   :  { %310 = vsyncpa [#allocation3], 1 }
 0x30b   :  { %311 = vsyncpa [#allocation5], 1 }

</bundles_post_ra>
